<compile_context>
chip_gen: v7x
topology: tpu7x:2x2x1
jax: 0.10.0
libtpu: 0.0.40
codegen_flags: <defaults>
</compile_context>

<pallas_src>
import functools
import math

import jax
import jax.numpy as jnp
from jax import lax
from jax.experimental import pallas as pl
from jax.experimental.pallas import tpu as pltpu


T_CHUNK = 16   # timesteps per LSTM grid step (amortizes ~600-cycle grid-step overhead)


# ----------------------------------------------------------------------------
# Helpers
# ----------------------------------------------------------------------------
def _round_up(x, m):
    return (x + m - 1) // m * m


def _pick_tile(n, candidates):
    for c in candidates:
        if c <= n and n % c == 0:
            return c
    return n


def _device_kind():
    try:
        return jax.devices()[0].device_kind.lower()
    except Exception:
        return ""


def _num_tensorcores():
    # v7x has 2 TensorCores per chip; v5e/v6e have 1.
    return 2 if "v7" in _device_kind() else 1


def _is_v5():
    return "v5" in _device_kind()


def _vmem_cap_bytes():
    # Headroom under physical VMEM (64 MiB on v7x, 128 MiB on v5e/v6e).
    return (56 << 20) if _num_tensorcores() == 2 else (100 << 20)


def _invariant_spec(block_shape, index_map):
    """BlockSpec for a grid-invariant operand: request a single VMEM buffer."""
    try:
        return pl.BlockSpec(block_shape, index_map, pipeline_mode=pl.Buffered(1))
    except Exception:  # older jax without pipeline_mode support
        return pl.BlockSpec(block_shape, index_map)


# ----------------------------------------------------------------------------
# Fused LSTM layer kernel.
# Per (batch-block, time-chunk) grid step:
#   (1) one MXU matmul projects the whole chunk: x @ W_ih + b -> f32 VMEM scratch
#   (2) serial step loop: gates = gx[t] + h @ W_hh, elementwise gate math, write y[t]
# Gate order matches torch.nn.LSTM: [i, f, g, o]; each gate occupies a lane-aligned
# 128-multiple column block [g*H_p, (g+1)*H_p).
# ----------------------------------------------------------------------------
def lstm_fused_kernel(x_ref, w_ih_ref, w_hh_ref, b_ref, y_ref,
                      h_scr, c_scr, gx_scr, *, act_dtype):
    t_chunk, b_blk, e_in = x_ref.shape
    H = h_scr.shape[1]

    @pl.when(pl.program_id(1) == 0)        # first time chunk of this batch block
    def _init():
        h_scr[...] = jnp.zeros_like(h_scr)
        c_scr[...] = jnp.zeros_like(c_scr)

    # (1) Fused input projection for the whole chunk: one MXU matmul into VMEM only.
    x_flat = x_ref[...].reshape(t_chunk * b_blk, e_in)
    gx_scr[...] = (
        jnp.dot(x_flat, w_ih_ref[...], preferred_element_type=jnp.float32)
        + b_ref[...]
    ).reshape(t_chunk, b_blk, 4 * H)

    w_hh = w_hh_ref[...]                   # hoisted out of the step loop

    # (2) Serial recurrence over the chunk.
    def step(t, carry):
        h_prev = h_scr[...]                # bf16
        c_prev = c_scr[...]                # f32
        gates = gx_scr[t] + jnp.dot(h_prev, w_hh,
                                    preferred_element_type=jnp.float32)
        g_act = gates.astype(act_dtype)    # bf16 transcendentals on v6e/v7x, f32 on v5e
        i_g = jax.nn.sigmoid(g_act[:, 0 * H:1 * H])
        f_g = jax.nn.sigmoid(g_act[:, 1 * H:2 * H])
        g_g = jnp.tanh(g_act[:, 2 * H:3 * H])
        o_g = jax.nn.sigmoid(g_act[:, 3 * H:4 * H])

        c_new = f_g.astype(jnp.float32) * c_prev + (i_g * g_g).astype(jnp.float32)
        h_new = (o_g * jnp.tanh(c_new.astype(act_dtype))).astype(jnp.bfloat16)

        c_scr[...] = c_new
        h_scr[...] = h_new
        y_ref[t] = h_new
        return carry

    # Unrolled: lets the LLO scheduler overlap the h@W_hh MXU push with the previous
    # step's VPU/EUP gate math.
    lax.fori_loop(0, t_chunk, step, 0, unroll=True)


def lstm_layer(x, w_ih, w_hh, bias, *, h_p, b_blk, act_dtype):
    """x: (T_p, B_p, E_in_p) bf16 -> (T_p, B_p, H_p) bf16 (one LSTM layer)."""
    T_p, B_p, E_in_p = x.shape
    G_p = 4 * h_p
    grid = (B_p // b_blk, T_p // T_CHUNK)   # time innermost: sequential per batch block

    # VMEM accounting for this block configuration (weights counted double-buffered
    # conservatively, in case Buffered(1) is not honored).
    need = (
        2 * T_CHUNK * b_blk * E_in_p * 2      # x chunk, bf16, double-buffered
        + 2 * T_CHUNK * b_blk * h_p * 2       # y chunk, bf16, double-buffered
        + 2 * E_in_p * G_p * 2                # w_ih bf16
        + 2 * h_p * G_p * 2                   # w_hh bf16
        + 2 * G_p * 4                         # bias f32
        + T_CHUNK * b_blk * G_p * 4           # fused gate scratch, f32 (single)
        + b_blk * h_p * (2 + 4)               # h (bf16) + c (f32) state
    )
    vmem_limit = min(max(int(need * 1.25) + (2 << 20), 32 << 20), _vmem_cap_bytes())

    kernel = functools.partial(lstm_fused_kernel, act_dtype=act_dtype)
    return pl.pallas_call(
        kernel,
        out_shape=jax.ShapeDtypeStruct((T_p, B_p, h_p), jnp.bfloat16),
        grid=grid,
        in_specs=[
            pl.BlockSpec((T_CHUNK, b_blk, E_in_p), lambda b, t: (t, b, 0)),
            _invariant_spec((E_in_p, G_p), lambda b, t: (0, 0)),
            _invariant_spec((h_p, G_p), lambda b, t: (0, 0)),
            pl.BlockSpec((1, G_p), lambda b, t: (0, 0)),
        ],
        out_specs=pl.BlockSpec((T_CHUNK, b_blk, h_p), lambda b, t: (t, b, 0)),
        scratch_shapes=[
            pltpu.VMEM((b_blk, h_p), jnp.bfloat16),              # h state
            pltpu.VMEM((b_blk, h_p), jnp.float32),               # c state
            pltpu.VMEM((T_CHUNK, b_blk, G_p), jnp.float32),      # fused gate pre-acts
        ],
        compiler_params=pltpu.CompilerParams(
            dimension_semantics=("parallel", "arbitrary"),
            vmem_limit_bytes=vmem_limit,
        ),
    )(x, w_ih, w_hh, bias)


# ----------------------------------------------------------------------------
# Output head: time-major hidden states -> batch-major logits, transpose folded
# into the BlockSpec index maps (no standalone HBM transpose).
# ----------------------------------------------------------------------------
def head_kernel(x_ref, w_ref, b_ref, o_ref):
    o_ref[0] = (
        jnp.dot(x_ref[...], w_ref[...], preferred_element_type=jnp.float32)
        + b_ref[...]
    ).astype(o_ref.dtype)


def output_head(x_tm, w_out, b_out):
    """x_tm: (T_p, B_p, H_p) bf16 time-major -> (B_p, T_p, V_p) f32 logits."""
    T_p, B_p, H_p = x_tm.shape
    V_p = w_out.shape[1]

    big_vmem = _num_tensorcores() == 1        # 128-MiB chips can afford bigger tiles
    t_blk = _pick_tile(T_p, (512, 256, 128, 64, 32, 16, 8))
    tn = _pick_tile(V_p, (1024, 512, 256, 128) if big_vmem else (512, 256, 128))

    # Free view: merge the two trailing (row-major contiguous) dims so the per-batch
    # column slice is a lane-aligned (t_blk, H_p) block.
    x2d = x_tm.reshape(T_p, B_p * H_p)

    need = 2 * (t_blk * H_p * 2 + H_p * tn * 2 + tn * 4 + t_blk * tn * 4)
    vmem_limit = min(max(int(need * 1.25) + (2 << 20), 32 << 20), _vmem_cap_bytes())

    return pl.pallas_call(
        head_kernel,
        out_shape=jax.ShapeDtypeStruct((B_p, T_p, V_p), jnp.float32),
        grid=(B_p, T_p // t_blk, V_p // tn),
        in_specs=[
            pl.BlockSpec((t_blk, H_p), lambda b, ti, vj: (ti, b)),
            pl.BlockSpec((H_p, tn), lambda b, ti, vj: (0, vj)),
            pl.BlockSpec((1, tn), lambda b, ti, vj: (0, vj)),
        ],
        out_specs=pl.BlockSpec((1, t_blk, tn), lambda b, ti, vj: (b, ti, vj)),
        compiler_params=pltpu.CompilerParams(
            dimension_semantics=("parallel", "parallel", "parallel"),
            vmem_limit_bytes=vmem_limit,
        ),
    )(x2d, w_out, b_out)


# ----------------------------------------------------------------------------
# Full RNN forward: embedding -> num_layers x LSTM -> linear head.
# ----------------------------------------------------------------------------
def rnn_forward(input_ids, params):
    E_p, H_p, V_p = params["E_p"], params["H_p"], params["V_p"]
    V = params["vocab_size"]

    B, T = input_ids.shape
    n_cores = _num_tensorcores()
    # Batch blocking: single block on 1-TC chips (max matmul M per recurrence step);
    # exactly two equal blocks on v7x so "parallel" shards across both TensorCores.
    n_bblocks = 2 if (n_cores == 2 and B > 8) else 1
    B_p = _round_up(B, 8 * n_bblocks)
    b_blk = B_p // n_bblocks
    T_p = _round_up(T, T_CHUNK)

    act_dtype = jnp.float32 if _is_v5() else jnp.bfloat16   # bf16 EUP only on v6e/v7x

    # Embedding gather straight into the padded time-major bf16 activation (the table
    # is stored bf16 with E already padded to E_p; only the tiny id matrix transposes).
    x = jnp.take(params["embedding"], input_ids.T, axis=0)          # (T, B, E_p) bf16
    x = jnp.zeros((T_p, B_p, E_p), jnp.bfloat16).at[:T, :B, :].set(x)

    for layer in params["lstm_layers"]:
        x = lstm_layer(x, layer["w_ih"], layer["w_hh"], layer["b"],
                       h_p=H_p, b_blk=b_blk, act_dtype=act_dtype)   # (T_p, B_p, H_p)

    logits = output_head(x, params["w_out"], params["b_out"])        # (B_p, T_p, V_p)
    return logits[:B, :T, :V]


# ----------------------------------------------------------------------------
# Deterministic parameter init (shapes follow the PyTorch module's __init__),
# padded to TPU-friendly shapes; matmul operands bf16.  Gate k of W_ih/W_hh/b is
# placed at columns [k*H_p, k*H_p + H) so every gate slice is lane-aligned.
# ----------------------------------------------------------------------------
def _pad_gate_matrix(w, H, H_p, K_p):
    K = w.shape[0]
    out = jnp.zeros((K_p, 4 * H_p), w.dtype)
    for g in range(4):
        out = out.at[:K, g * H_p:g * H_p + H].set(w[:, g * H:(g + 1) * H])
    return out


def init_params(key, vocab_size, embedding_size, hidden_size, num_layers, pad_idx):
    E_p = _round_up(embedding_size, 128)
    H_p = _round_up(hidden_size, 128)
    V_p = _round_up(vocab_size, 128)

    keys = jax.random.split(key, 1 + 4 * num_layers + 2)
    k_iter = iter(keys)

    # nn.Embedding: N(0,1), padding_idx row zeroed; stored bf16 with E padded to E_p.
    emb = jax.random.normal(next(k_iter), (vocab_size, embedding_size), jnp.float32)
    emb = emb.at[pad_idx].set(0.0)
    emb_p = (jnp.zeros((vocab_size, E_p), jnp.float32)
             .at[:, :embedding_size].set(emb).astype(jnp.bfloat16))

    stdv = 1.0 / math.sqrt(hidden_size)
    layers = []
    for l in range(num_layers):
        in_dim = embedding_size if l == 0 else hidden_size
        in_dim_p = E_p if l == 0 else H_p
        w_ih = jax.random.uniform(next(k_iter), (in_dim, 4 * hidden_size),
                                  jnp.float32, -stdv, stdv)
        w_hh = jax.random.uniform(next(k_iter), (hidden_size, 4 * hidden_size),
                                  jnp.float32, -stdv, stdv)
        b_ih = jax.random.uniform(next(k_iter), (1, 4 * hidden_size),
                                  jnp.float32, -stdv, stdv)
        b_hh = jax.random.uniform(next(k_iter), (1, 4 * hidden_size),
                                  jnp.float32, -stdv, stdv)
        layers.append({
            "w_ih": _pad_gate_matrix(w_ih, hidden_size, H_p, in_dim_p).astype(jnp.bfloat16),
            "w_hh": _pad_gate_matrix(w_hh, hidden_size, H_p, H_p).astype(jnp.bfloat16),
            "b": _pad_gate_matrix(b_ih + b_hh, hidden_size, H_p, 1),   # (1, 4*H_p) f32
        })

    # nn.Linear(hidden_size, vocab_size): uniform(-1/sqrt(H), 1/sqrt(H)).
    w_out = jax.random.uniform(next(k_iter), (hidden_size, vocab_size),
                               jnp.float32, -stdv, stdv)
    b_out = jax.random.uniform(next(k_iter), (1, vocab_size),
                               jnp.float32, -stdv, stdv)
    w_out_p = (jnp.zeros((H_p, V_p), jnp.float32)
               .at[:hidden_size, :vocab_size].set(w_out).astype(jnp.bfloat16))
    b_out_p = jnp.zeros((1, V_p), jnp.float32).at[:, :vocab_size].set(b_out)

    return {
        "embedding": emb_p,
        "lstm_layers": layers,
        "w_out": w_out_p,
        "b_out": b_out_p,
        "hidden_size": hidden_size,
        "vocab_size": vocab_size,
        "E_p": E_p,
        "H_p": H_p,
        "V_p": V_p,
    }


if __name__ == "__main__":
    # Small, forward-consistent shapes.
    B, T = 2, 8
    vocab_size = 32
    embedding_size = 16
    hidden_size = 32
    num_layers = 2
    pad_idx = 0

    key = jax.random.PRNGKey(0)
    k_params, k_ids = jax.random.split(key)

    params = init_params(k_params, vocab_size, embedding_size, hidden_size,
                         num_layers, pad_idx)
    input_ids = jax.random.randint(k_ids, (B, T), 0, vocab_size, dtype=jnp.int32)

    fwd = jax.jit(functools.partial(rnn_forward, params=params))
    logits = fwd(input_ids)
    jax.block_until_ready(logits)

    assert logits.shape == (B, T, vocab_size), logits.shape
    assert logits.dtype == jnp.float32
    assert bool(jnp.isfinite(logits).all())
    print("KERNEL_OK")
</pallas_src>

<mosaic_0001>
module attributes {stable_mosaic.version = 11 : i64} {
  func.func @head_kernel(%arg0: i32, %arg1: i32, %arg2: i32, %arg3: memref<16x128xbf16, #tpu.memory_space<vmem>>, %arg4: memref<128x128xbf16, #tpu.memory_space<vmem>>, %arg5: memref<1x128xf32, #tpu.memory_space<vmem>>, %arg6: memref<1x16x128xf32, #tpu.memory_space<vmem>>) attributes {dimension_semantics = [#tpu.dimension_semantics<parallel>, #tpu.dimension_semantics<parallel>, #tpu.dimension_semantics<parallel>], iteration_bounds = array<i64: 8, 1, 1>, scalar_prefetch = 0 : i64, scratch_operands = 0 : i64, tpu.core_type = #tpu.core_type<tc>, window_params = [{transform_indices = @transform_0, window_bounds = array<i64: 16, 128>}, {transform_indices = @transform_1, window_bounds = array<i64: 128, 128>}, {transform_indices = @transform_2, window_bounds = array<i64: 1, 128>}, {transform_indices = @transform_3, window_bounds = array<i64: 1, 16, 128>}]} {
    %c0 = arith.constant 0 : index
    %c0_0 = arith.constant 0 : index
    %0 = vector.load %arg3[%c0, %c0_0] : memref<16x128xbf16, #tpu.memory_space<vmem>>, vector<16x128xbf16>
    %c0_1 = arith.constant 0 : index
    %c0_2 = arith.constant 0 : index
    %1 = vector.load %arg4[%c0_1, %c0_2] : memref<128x128xbf16, #tpu.memory_space<vmem>>, vector<128x128xbf16>
    %cst = arith.constant dense<0.000000e+00> : vector<16x128xf32>
    %2 = tpu.matmul %0, %1, %cst {dimension_numbers = #tpu.dot_dimension_numbers<[1], [0], [0], [1], [0, 0, 1, 1], [], []>} : vector<16x128xbf16>, vector<128x128xbf16>, vector<16x128xf32> -> vector<16x128xf32>
    %c0_3 = arith.constant 0 : index
    %c0_4 = arith.constant 0 : index
    %3 = vector.load %arg5[%c0_3, %c0_4] : memref<1x128xf32, #tpu.memory_space<vmem>>, vector<1x128xf32>
    %4 = vector.broadcast %3 : vector<1x128xf32> to vector<16x128xf32>
    %5 = arith.addf %2, %4 : vector<16x128xf32>
    %c0_5 = arith.constant 0 : index
    %c0_6 = arith.constant 0 : index
    %c0_7 = arith.constant 0 : index
    %6 = vector.load %arg6[%c0_5, %c0_6, %c0_7] : memref<1x16x128xf32, #tpu.memory_space<vmem>>, vector<1x16x128xf32>
    %7 = vector.shape_cast %6 : vector<1x16x128xf32> to vector<16x128xf32>
    %8 = vector.shape_cast %5 : vector<16x128xf32> to vector<1x16x128xf32>
    tpu.vector_store %arg6[%c0_5, %c0_6, %c0_7], %8 {strides = array<i32>} : memref<1x16x128xf32, #tpu.memory_space<vmem>>, vector<1x16x128xf32>,
    return
  }
  func.func @transform_0(%arg0: i32, %arg1: i32, %arg2: i32) -> (i32, i32) {
    %c0_i32 = arith.constant 0 : i32
    return %arg1, %arg0 : i32, i32
  }
  func.func @transform_1(%arg0: i32, %arg1: i32, %arg2: i32) -> (i32, i32) {
    %c0_i32 = arith.constant 0 : i32
    %c0_i32_0 = arith.constant 0 : i32
    return %c0_i32, %arg2 : i32, i32
  }
  func.func @transform_2(%arg0: i32, %arg1: i32, %arg2: i32) -> (i32, i32) {
    %c0_i32 = arith.constant 0 : i32
    %c0_i32_0 = arith.constant 0 : i32
    return %c0_i32, %arg2 : i32, i32
  }
  func.func @transform_3(%arg0: i32, %arg1: i32, %arg2: i32) -> (i32, i32, i32) {
    %c0_i32 = arith.constant 0 : i32
    return %arg0, %arg1, %arg2 : i32, i32, i32
  }
}

module attributes {stable_mosaic.version = 11 : i64} {
  func.func @lstm_fused_kernel(%arg0: i32, %arg1: i32, %arg2: memref<16x8x128xbf16, #tpu.memory_space<vmem>>, %arg3: memref<128x512xbf16, #tpu.memory_space<vmem>>, %arg4: memref<128x512xbf16, #tpu.memory_space<vmem>>, %arg5: memref<1x512xf32, #tpu.memory_space<vmem>>, %arg6: memref<16x8x128xbf16, #tpu.memory_space<vmem>>, %arg7: memref<8x128xbf16, #tpu.memory_space<vmem>>, %arg8: memref<8x128xf32, #tpu.memory_space<vmem>>, %arg9: memref<16x8x512xf32, #tpu.memory_space<vmem>>) attributes {dimension_semantics = [#tpu.dimension_semantics<parallel>, #tpu.dimension_semantics<arbitrary>], iteration_bounds = array<i64: 1, 1>, scalar_prefetch = 0 : i64, scratch_operands = 3 : i64, tpu.core_type = #tpu.core_type<tc>, window_params = [{transform_indices = @transform_0, window_bounds = array<i64: 16, 8, 128>}, {pipeline_mode = #tpu.pipeline_mode<synchronous>, transform_indices = @transform_1, window_bounds = array<i64: 128, 512>}, {pipeline_mode = #tpu.pipeline_mode<synchronous>, transform_indices = @transform_2, window_bounds = array<i64: 128, 512>}, {pipeline_mode = #tpu.pipeline_mode<synchronous>, transform_indices = @transform_3, window_bounds = array<i64: 1, 512>}, {transform_indices = @transform_4, window_bounds = array<i64: 16, 8, 128>}]} {
    %c0_i32 = arith.constant 0 : i32
    %0 = arith.cmpi eq, %arg1, %c0_i32 : i32
    %1 = arith.extui %0 : i1 to i32
    %c0_i32_0 = arith.constant 0 : i32
    %2 = arith.cmpi ne, %1, %c0_i32_0 : i32
    scf.if %2 {
      %cst_269 = arith.constant 0.000000e+00 : bf16
      %685 = vector.broadcast %cst_269 : bf16 to vector<8x128xbf16>
      %c0_270 = arith.constant 0 : index
      %c0_271 = arith.constant 0 : index
      %686 = vector.load %arg7[%c0_270, %c0_271] : memref<8x128xbf16, #tpu.memory_space<vmem>>, vector<8x128xbf16>
      tpu.vector_store %arg7[%c0_270, %c0_271], %685 {strides = array<i32>} : memref<8x128xbf16, #tpu.memory_space<vmem>>, vector<8x128xbf16>,
      %cst_272 = arith.constant 0.000000e+00 : f32
      %687 = vector.broadcast %cst_272 : f32 to vector<8x128xf32>
      %c0_273 = arith.constant 0 : index
      %c0_274 = arith.constant 0 : index
      %688 = vector.load %arg8[%c0_273, %c0_274] : memref<8x128xf32, #tpu.memory_space<vmem>>, vector<8x128xf32>
      tpu.vector_store %arg8[%c0_273, %c0_274], %687 {strides = array<i32>} : memref<8x128xf32, #tpu.memory_space<vmem>>, vector<8x128xf32>,
    } else {
    }
    %c0 = arith.constant 0 : index
    %c0_1 = arith.constant 0 : index
    %c0_2 = arith.constant 0 : index
    %3 = vector.load %arg2[%c0, %c0_1, %c0_2] : memref<16x8x128xbf16, #tpu.memory_space<vmem>>, vector<16x8x128xbf16>
    %4 = vector.shape_cast %3 : vector<16x8x128xbf16> to vector<128x128xbf16>
    %c0_3 = arith.constant 0 : index
    %c0_4 = arith.constant 0 : index
    %5 = vector.load %arg3[%c0_3, %c0_4] : memref<128x512xbf16, #tpu.memory_space<vmem>>, vector<128x512xbf16>
    %cst = arith.constant dense<0.000000e+00> : vector<128x512xf32>
    %6 = tpu.matmul %4, %5, %cst {dimension_numbers = #tpu.dot_dimension_numbers<[1], [0], [0], [1], [0, 0, 1, 1], [], []>} : vector<128x128xbf16>, vector<128x512xbf16>, vector<128x512xf32> -> vector<128x512xf32>
    %c0_5 = arith.constant 0 : index
    %c0_6 = arith.constant 0 : index
    %7 = vector.load %arg5[%c0_5, %c0_6] : memref<1x512xf32, #tpu.memory_space<vmem>>, vector<1x512xf32>
    %8 = vector.broadcast %7 : vector<1x512xf32> to vector<128x512xf32>
    %9 = arith.addf %6, %8 : vector<128x512xf32>
    %10 = vector.shape_cast %9 : vector<128x512xf32> to vector<16x8x512xf32>
    %c0_7 = arith.constant 0 : index
    %c0_8 = arith.constant 0 : index
    %c0_9 = arith.constant 0 : index
    %11 = vector.load %arg9[%c0_7, %c0_8, %c0_9] : memref<16x8x512xf32, #tpu.memory_space<vmem>>, vector<16x8x512xf32>
    tpu.vector_store %arg9[%c0_7, %c0_8, %c0_9], %10 {strides = array<i32>} : memref<16x8x512xf32, #tpu.memory_space<vmem>>, vector<16x8x512xf32>,
    %c0_10 = arith.constant 0 : index
    %c0_11 = arith.constant 0 : index
    %12 = vector.load %arg4[%c0_10, %c0_11] : memref<128x512xbf16, #tpu.memory_space<vmem>>, vector<128x512xbf16>
    %c0_i32_12 = arith.constant 0 : i32
    %c0_13 = arith.constant 0 : index
    %c0_14 = arith.constant 0 : index
    %13 = vector.load %arg7[%c0_13, %c0_14] : memref<8x128xbf16, #tpu.memory_space<vmem>>, vector<8x128xbf16>
    %c0_15 = arith.constant 0 : index
    %c0_16 = arith.constant 0 : index
    %14 = vector.load %arg8[%c0_15, %c0_16] : memref<8x128xf32, #tpu.memory_space<vmem>>, vector<8x128xf32>
    %15 = arith.index_cast %c0_i32_12 : i32 to index
    %c0_17 = arith.constant 0 : index
    %c0_18 = arith.constant 0 : index
    %16 = vector.load %arg9[%15, %c0_17, %c0_18] : memref<16x8x512xf32, #tpu.memory_space<vmem>>, vector<1x8x512xf32>
    %17 = vector.shape_cast %16 : vector<1x8x512xf32> to vector<8x512xf32>
    %cst_19 = arith.constant dense<0.000000e+00> : vector<8x512xf32>
    %18 = tpu.matmul %13, %12, %cst_19 {dimension_numbers = #tpu.dot_dimension_numbers<[1], [0], [0], [1], [0, 0, 1, 1], [], []>} : vector<8x128xbf16>, vector<128x512xbf16>, vector<8x512xf32> -> vector<8x512xf32>
    %19 = arith.addf %17, %18 : vector<8x512xf32>
    %20 = arith.truncf %19 : vector<8x512xf32> to vector<8x512xbf16>
    %21 = vector.extract_strided_slice %20 {offsets = [0, 0], sizes = [8, 128], strides = [1, 1]} : vector<8x512xbf16> to vector<8x128xbf16>
    %22 = arith.negf %21 : vector<8x128xbf16>
    %23 = math.exp %22 : vector<8x128xbf16>
    %cst_20 = arith.constant 1.000000e+00 : bf16
    %24 = vector.broadcast %cst_20 : bf16 to vector<8x128xbf16>
    %25 = arith.addf %24, %23 : vector<8x128xbf16>
    %26 = arith.divf %24, %25 : vector<8x128xbf16>
    %27 = vector.extract_strided_slice %20 {offsets = [0, 128], sizes = [8, 128], strides = [1, 1]} : vector<8x512xbf16> to vector<8x128xbf16>
    %28 = arith.negf %27 : vector<8x128xbf16>
    %29 = math.exp %28 : vector<8x128xbf16>
    %cst_21 = arith.constant 1.000000e+00 : bf16
    %30 = vector.broadcast %cst_21 : bf16 to vector<8x128xbf16>
    %31 = arith.addf %30, %29 : vector<8x128xbf16>
    %32 = arith.divf %30, %31 : vector<8x128xbf16>
    %33 = vector.extract_strided_slice %20 {offsets = [0, 256], sizes = [8, 128], strides = [1, 1]} : vector<8x512xbf16> to vector<8x128xbf16>
    %34 = math.tanh %33 : vector<8x128xbf16>
    %35 = vector.extract_strided_slice %20 {offsets = [0, 384], sizes = [8, 128], strides = [1, 1]} : vector<8x512xbf16> to vector<8x128xbf16>
    %36 = arith.negf %35 : vector<8x128xbf16>
    %37 = math.exp %36 : vector<8x128xbf16>
    %cst_22 = arith.constant 1.000000e+00 : bf16
    %38 = vector.broadcast %cst_22 : bf16 to vector<8x128xbf16>
    %39 = arith.addf %38, %37 : vector<8x128xbf16>
    %40 = arith.divf %38, %39 : vector<8x128xbf16>
    %41 = arith.extf %32 : vector<8x128xbf16> to vector<8x128xf32>
    %42 = arith.mulf %41, %14 : vector<8x128xf32>
    %43 = arith.mulf %26, %34 : vector<8x128xbf16>
    %44 = arith.extf %43 : vector<8x128xbf16> to vector<8x128xf32>
    %45 = arith.addf %42, %44 : vector<8x128xf32>
    %46 = arith.truncf %45 : vector<8x128xf32> to vector<8x128xbf16>
    %47 = math.tanh %46 : vector<8x128xbf16>
    %48 = arith.mulf %40, %47 : vector<8x128xbf16>
    %c0_23 = arith.constant 0 : index
    %c0_24 = arith.constant 0 : index
    %49 = vector.load %arg8[%c0_23, %c0_24] : memref<8x128xf32, #tpu.memory_space<vmem>>, vector<8x128xf32>
    tpu.vector_store %arg8[%c0_23, %c0_24], %45 {strides = array<i32>} : memref<8x128xf32, #tpu.memory_space<vmem>>, vector<8x128xf32>,
    %c0_25 = arith.constant 0 : index
    %c0_26 = arith.constant 0 : index
    %50 = vector.load %arg7[%c0_25, %c0_26] : memref<8x128xbf16, #tpu.memory_space<vmem>>, vector<8x128xbf16>
    tpu.vector_store %arg7[%c0_25, %c0_26], %48 {strides = array<i32>} : memref<8x128xbf16, #tpu.memory_space<vmem>>, vector<8x128xbf16>,
    %51 = arith.index_cast %c0_i32_12 : i32 to index
    %c0_27 = arith.constant 0 : index
    %c0_28 = arith.constant 0 : index
    %52 = vector.load %arg6[%51, %c0_27, %c0_28] : memref<16x8x128xbf16, #tpu.memory_space<vmem>>, vector<1x8x128xbf16>
    %53 = vector.shape_cast %52 : vector<1x8x128xbf16> to vector<8x128xbf16>
    %54 = vector.shape_cast %48 : vector<8x128xbf16> to vector<1x8x128xbf16>
    tpu.vector_store %arg6[%51, %c0_27, %c0_28], %54 {strides = array<i32>} : memref<16x8x128xbf16, #tpu.memory_space<vmem>>, vector<1x8x128xbf16>,
    %c1_i32 = arith.constant 1 : i32
    %c0_29 = arith.constant 0 : index
    %c0_30 = arith.constant 0 : index
    %55 = vector.load %arg7[%c0_29, %c0_30] : memref<8x128xbf16, #tpu.memory_space<vmem>>, vector<8x128xbf16>
    %c0_31 = arith.constant 0 : index
    %c0_32 = arith.constant 0 : index
    %56 = vector.load %arg8[%c0_31, %c0_32] : memref<8x128xf32, #tpu.memory_space<vmem>>, vector<8x128xf32>
    %57 = arith.index_cast %c1_i32 : i32 to index
    %c0_33 = arith.constant 0 : index
    %c0_34 = arith.constant 0 : index
    %58 = vector.load %arg9[%57, %c0_33, %c0_34] : memref<16x8x512xf32, #tpu.memory_space<vmem>>, vector<1x8x512xf32>
    %59 = vector.shape_cast %58 : vector<1x8x512xf32> to vector<8x512xf32>
    %cst_35 = arith.constant dense<0.000000e+00> : vector<8x512xf32>
    %60 = tpu.matmul %55, %12, %cst_35 {dimension_numbers = #tpu.dot_dimension_numbers<[1], [0], [0], [1], [0, 0, 1, 1], [], []>} : vector<8x128xbf16>, vector<128x512xbf16>, vector<8x512xf32> -> vector<8x512xf32>
    %61 = arith.addf %59, %60 : vector<8x512xf32>
    %62 = arith.truncf %61 : vector<8x512xf32> to vector<8x512xbf16>
    %63 = vector.extract_strided_slice %62 {offsets = [0, 0], sizes = [8, 128], strides = [1, 1]} : vector<8x512xbf16> to vector<8x128xbf16>
    %64 = arith.negf %63 : vector<8x128xbf16>
    %65 = math.exp %64 : vector<8x128xbf16>
    %cst_36 = arith.constant 1.000000e+00 : bf16
    %66 = vector.broadcast %cst_36 : bf16 to vector<8x128xbf16>
    %67 = arith.addf %66, %65 : vector<8x128xbf16>
    %68 = arith.divf %66, %67 : vector<8x128xbf16>
    %69 = vector.extract_strided_slice %62 {offsets = [0, 128], sizes = [8, 128], strides = [1, 1]} : vector<8x512xbf16> to vector<8x128xbf16>
    %70 = arith.negf %69 : vector<8x128xbf16>
    %71 = math.exp %70 : vector<8x128xbf16>
    %cst_37 = arith.constant 1.000000e+00 : bf16
    %72 = vector.broadcast %cst_37 : bf16 to vector<8x128xbf16>
    %73 = arith.addf %72, %71 : vector<8x128xbf16>
    %74 = arith.divf %72, %73 : vector<8x128xbf16>
    %75 = vector.extract_strided_slice %62 {offsets = [0, 256], sizes = [8, 128], strides = [1, 1]} : vector<8x512xbf16> to vector<8x128xbf16>
    %76 = math.tanh %75 : vector<8x128xbf16>
    %77 = vector.extract_strided_slice %62 {offsets = [0, 384], sizes = [8, 128], strides = [1, 1]} : vector<8x512xbf16> to vector<8x128xbf16>
    %78 = arith.negf %77 : vector<8x128xbf16>
    %79 = math.exp %78 : vector<8x128xbf16>
    %cst_38 = arith.constant 1.000000e+00 : bf16
    %80 = vector.broadcast %cst_38 : bf16 to vector<8x128xbf16>
    %81 = arith.addf %80, %79 : vector<8x128xbf16>
    %82 = arith.divf %80, %81 : vector<8x128xbf16>
    %83 = arith.extf %74 : vector<8x128xbf16> to vector<8x128xf32>
    %84 = arith.mulf %83, %56 : vector<8x128xf32>
    %85 = arith.mulf %68, %76 : vector<8x128xbf16>
    %86 = arith.extf %85 : vector<8x128xbf16> to vector<8x128xf32>
    %87 = arith.addf %84, %86 : vector<8x128xf32>
    %88 = arith.truncf %87 : vector<8x128xf32> to vector<8x128xbf16>
    %89 = math.tanh %88 : vector<8x128xbf16>
    %90 = arith.mulf %82, %89 : vector<8x128xbf16>
    %c0_39 = arith.constant 0 : index
    %c0_40 = arith.constant 0 : index
    %91 = vector.load %arg8[%c0_39, %c0_40] : memref<8x128xf32, #tpu.memory_space<vmem>>, vector<8x128xf32>
    tpu.vector_store %arg8[%c0_39, %c0_40], %87 {strides = array<i32>} : memref<8x128xf32, #tpu.memory_space<vmem>>, vector<8x128xf32>,
    %c0_41 = arith.constant 0 : index
    %c0_42 = arith.constant 0 : index
    %92 = vector.load %arg7[%c0_41, %c0_42] : memref<8x128xbf16, #tpu.memory_space<vmem>>, vector<8x128xbf16>
    tpu.vector_store %arg7[%c0_41, %c0_42], %90 {strides = array<i32>} : memref<8x128xbf16, #tpu.memory_space<vmem>>, vector<8x128xbf16>,
    %93 = arith.index_cast %c1_i32 : i32 to index
    %c0_43 = arith.constant 0 : index
    %c0_44 = arith.constant 0 : index
    %94 = vector.load %arg6[%93, %c0_43, %c0_44] : memref<16x8x128xbf16, #tpu.memory_space<vmem>>, vector<1x8x128xbf16>
    %95 = vector.shape_cast %94 : vector<1x8x128xbf16> to vector<8x128xbf16>
    %96 = vector.shape_cast %90 : vector<8x128xbf16> to vector<1x8x128xbf16>
    tpu.vector_store %arg6[%93, %c0_43, %c0_44], %96 {strides = array<i32>} : memref<16x8x128xbf16, #tpu.memory_space<vmem>>, vector<1x8x128xbf16>,
    %c2_i32 = arith.constant 2 : i32
    %c0_45 = arith.constant 0 : index
    %c0_46 = arith.constant 0 : index
    %97 = vector.load %arg7[%c0_45, %c0_46] : memref<8x128xbf16, #tpu.memory_space<vmem>>, vector<8x128xbf16>
    %c0_47 = arith.constant 0 : index
    %c0_48 = arith.constant 0 : index
    %98 = vector.load %arg8[%c0_47, %c0_48] : memref<8x128xf32, #tpu.memory_space<vmem>>, vector<8x128xf32>
    %99 = arith.index_cast %c2_i32 : i32 to index
    %c0_49 = arith.constant 0 : index
    %c0_50 = arith.constant 0 : index
    %100 = vector.load %arg9[%99, %c0_49, %c0_50] : memref<16x8x512xf32, #tpu.memory_space<vmem>>, vector<1x8x512xf32>
    %101 = vector.shape_cast %100 : vector<1x8x512xf32> to vector<8x512xf32>
    %cst_51 = arith.constant dense<0.000000e+00> : vector<8x512xf32>
    %102 = tpu.matmul %97, %12, %cst_51 {dimension_numbers = #tpu.dot_dimension_numbers<[1], [0], [0], [1], [0, 0, 1, 1], [], []>} : vector<8x128xbf16>, vector<128x512xbf16>, vector<8x512xf32> -> vector<8x512xf32>
    %103 = arith.addf %101, %102 : vector<8x512xf32>
    %104 = arith.truncf %103 : vector<8x512xf32> to vector<8x512xbf16>
    %105 = vector.extract_strided_slice %104 {offsets = [0, 0], sizes = [8, 128], strides = [1, 1]} : vector<8x512xbf16> to vector<8x128xbf16>
    %106 = arith.negf %105 : vector<8x128xbf16>
    %107 = math.exp %106 : vector<8x128xbf16>
    %cst_52 = arith.constant 1.000000e+00 : bf16
    %108 = vector.broadcast %cst_52 : bf16 to vector<8x128xbf16>
    %109 = arith.addf %108, %107 : vector<8x128xbf16>
    %110 = arith.divf %108, %109 : vector<8x128xbf16>
    %111 = vector.extract_strided_slice %104 {offsets = [0, 128], sizes = [8, 128], strides = [1, 1]} : vector<8x512xbf16> to vector<8x128xbf16>
    %112 = arith.negf %111 : vector<8x128xbf16>
    %113 = math.exp %112 : vector<8x128xbf16>
    %cst_53 = arith.constant 1.000000e+00 : bf16
    %114 = vector.broadcast %cst_53 : bf16 to vector<8x128xbf16>
    %115 = arith.addf %114, %113 : vector<8x128xbf16>
    %116 = arith.divf %114, %115 : vector<8x128xbf16>
    %117 = vector.extract_strided_slice %104 {offsets = [0, 256], sizes = [8, 128], strides = [1, 1]} : vector<8x512xbf16> to vector<8x128xbf16>
    %118 = math.tanh %117 : vector<8x128xbf16>
    %119 = vector.extract_strided_slice %104 {offsets = [0, 384], sizes = [8, 128], strides = [1, 1]} : vector<8x512xbf16> to vector<8x128xbf16>
    %120 = arith.negf %119 : vector<8x128xbf16>
    %121 = math.exp %120 : vector<8x128xbf16>
    %cst_54 = arith.constant 1.000000e+00 : bf16
    %122 = vector.broadcast %cst_54 : bf16 to vector<8x128xbf16>
    %123 = arith.addf %122, %121 : vector<8x128xbf16>
    %124 = arith.divf %122, %123 : vector<8x128xbf16>
    %125 = arith.extf %116 : vector<8x128xbf16> to vector<8x128xf32>
    %126 = arith.mulf %125, %98 : vector<8x128xf32>
    %127 = arith.mulf %110, %118 : vector<8x128xbf16>
    %128 = arith.extf %127 : vector<8x128xbf16> to vector<8x128xf32>
    %129 = arith.addf %126, %128 : vector<8x128xf32>
    %130 = arith.truncf %129 : vector<8x128xf32> to vector<8x128xbf16>
    %131 = math.tanh %130 : vector<8x128xbf16>
    %132 = arith.mulf %124, %131 : vector<8x128xbf16>
    %c0_55 = arith.constant 0 : index
    %c0_56 = arith.constant 0 : index
    %133 = vector.load %arg8[%c0_55, %c0_56] : memref<8x128xf32, #tpu.memory_space<vmem>>, vector<8x128xf32>
    tpu.vector_store %arg8[%c0_55, %c0_56], %129 {strides = array<i32>} : memref<8x128xf32, #tpu.memory_space<vmem>>, vector<8x128xf32>,
    %c0_57 = arith.constant 0 : index
    %c0_58 = arith.constant 0 : index
    %134 = vector.load %arg7[%c0_57, %c0_58] : memref<8x128xbf16, #tpu.memory_space<vmem>>, vector<8x128xbf16>
    tpu.vector_store %arg7[%c0_57, %c0_58], %132 {strides = array<i32>} : memref<8x128xbf16, #tpu.memory_space<vmem>>, vector<8x128xbf16>,
    %135 = arith.index_cast %c2_i32 : i32 to index
    %c0_59 = arith.constant 0 : index
    %c0_60 = arith.constant 0 : index
    %136 = vector.load %arg6[%135, %c0_59, %c0_60] : memref<16x8x128xbf16, #tpu.memory_space<vmem>>, vector<1x8x128xbf16>
    %137 = vector.shape_cast %136 : vector<1x8x128xbf16> to vector<8x128xbf16>
    %138 = vector.shape_cast %132 : vector<8x128xbf16> to vector<1x8x128xbf16>
    tpu.vector_store %arg6[%135, %c0_59, %c0_60], %138 {strides = array<i32>} : memref<16x8x128xbf16, #tpu.memory_space<vmem>>, vector<1x8x128xbf16>,
    %c3_i32 = arith.constant 3 : i32
    %c0_61 = arith.constant 0 : index
    %c0_62 = arith.constant 0 : index
    %139 = vector.load %arg7[%c0_61, %c0_62] : memref<8x128xbf16, #tpu.memory_space<vmem>>, vector<8x128xbf16>
    %c0_63 = arith.constant 0 : index
    %c0_64 = arith.constant 0 : index
    %140 = vector.load %arg8[%c0_63, %c0_64] : memref<8x128xf32, #tpu.memory_space<vmem>>, vector<8x128xf32>
    %141 = arith.index_cast %c3_i32 : i32 to index
    %c0_65 = arith.constant 0 : index
    %c0_66 = arith.constant 0 : index
    %142 = vector.load %arg9[%141, %c0_65, %c0_66] : memref<16x8x512xf32, #tpu.memory_space<vmem>>, vector<1x8x512xf32>
    %143 = vector.shape_cast %142 : vector<1x8x512xf32> to vector<8x512xf32>
    %cst_67 = arith.constant dense<0.000000e+00> : vector<8x512xf32>
    %144 = tpu.matmul %139, %12, %cst_67 {dimension_numbers = #tpu.dot_dimension_numbers<[1], [0], [0], [1], [0, 0, 1, 1], [], []>} : vector<8x128xbf16>, vector<128x512xbf16>, vector<8x512xf32> -> vector<8x512xf32>
    %145 = arith.addf %143, %144 : vector<8x512xf32>
    %146 = arith.truncf %145 : vector<8x512xf32> to vector<8x512xbf16>
    %147 = vector.extract_strided_slice %146 {offsets = [0, 0], sizes = [8, 128], strides = [1, 1]} : vector<8x512xbf16> to vector<8x128xbf16>
    %148 = arith.negf %147 : vector<8x128xbf16>
    %149 = math.exp %148 : vector<8x128xbf16>
    %cst_68 = arith.constant 1.000000e+00 : bf16
    %150 = vector.broadcast %cst_68 : bf16 to vector<8x128xbf16>
    %151 = arith.addf %150, %149 : vector<8x128xbf16>
    %152 = arith.divf %150, %151 : vector<8x128xbf16>
    %153 = vector.extract_strided_slice %146 {offsets = [0, 128], sizes = [8, 128], strides = [1, 1]} : vector<8x512xbf16> to vector<8x128xbf16>
    %154 = arith.negf %153 : vector<8x128xbf16>
    %155 = math.exp %154 : vector<8x128xbf16>
    %cst_69 = arith.constant 1.000000e+00 : bf16
    %156 = vector.broadcast %cst_69 : bf16 to vector<8x128xbf16>
    %157 = arith.addf %156, %155 : vector<8x128xbf16>
    %158 = arith.divf %156, %157 : vector<8x128xbf16>
    %159 = vector.extract_strided_slice %146 {offsets = [0, 256], sizes = [8, 128], strides = [1, 1]} : vector<8x512xbf16> to vector<8x128xbf16>
    %160 = math.tanh %159 : vector<8x128xbf16>
    %161 = vector.extract_strided_slice %146 {offsets = [0, 384], sizes = [8, 128], strides = [1, 1]} : vector<8x512xbf16> to vector<8x128xbf16>
    %162 = arith.negf %161 : vector<8x128xbf16>
    %163 = math.exp %162 : vector<8x128xbf16>
    %cst_70 = arith.constant 1.000000e+00 : bf16
    %164 = vector.broadcast %cst_70 : bf16 to vector<8x128xbf16>
    %165 = arith.addf %164, %163 : vector<8x128xbf16>
    %166 = arith.divf %164, %165 : vector<8x128xbf16>
    %167 = arith.extf %158 : vector<8x128xbf16> to vector<8x128xf32>
    %168 = arith.mulf %167, %140 : vector<8x128xf32>
    %169 = arith.mulf %152, %160 : vector<8x128xbf16>
    %170 = arith.extf %169 : vector<8x128xbf16> to vector<8x128xf32>
    %171 = arith.addf %168, %170 : vector<8x128xf32>
    %172 = arith.truncf %171 : vector<8x128xf32> to vector<8x128xbf16>
    %173 = math.tanh %172 : vector<8x128xbf16>
    %174 = arith.mulf %166, %173 : vector<8x128xbf16>
    %c0_71 = arith.constant 0 : index
    %c0_72 = arith.constant 0 : index
    %175 = vector.load %arg8[%c0_71, %c0_72] : memref<8x128xf32, #tpu.memory_space<vmem>>, vector<8x128xf32>
    tpu.vector_store %arg8[%c0_71, %c0_72], %171 {strides = array<i32>} : memref<8x128xf32, #tpu.memory_space<vmem>>, vector<8x128xf32>,
    %c0_73 = arith.constant 0 : index
    %c0_74 = arith.constant 0 : index
    %176 = vector.load %arg7[%c0_73, %c0_74] : memref<8x128xbf16, #tpu.memory_space<vmem>>, vector<8x128xbf16>
    tpu.vector_store %arg7[%c0_73, %c0_74], %174 {strides = array<i32>} : memref<8x128xbf16, #tpu.memory_space<vmem>>, vector<8x128xbf16>,
    %177 = arith.index_cast %c3_i32 : i32 to index
    %c0_75 = arith.constant 0 : index
    %c0_76 = arith.constant 0 : index
    %178 = vector.load %arg6[%177, %c0_75, %c0_76] : memref<16x8x128xbf16, #tpu.memory_space<vmem>>, vector<1x8x128xbf16>
    %179 = vector.shape_cast %178 : vector<1x8x128xbf16> to vector<8x128xbf16>
    %180 = vector.shape_cast %174 : vector<8x128xbf16> to vector<1x8x128xbf16>
    tpu.vector_store %arg6[%177, %c0_75, %c0_76], %180 {strides = array<i32>} : memref<16x8x128xbf16, #tpu.memory_space<vmem>>, vector<1x8x128xbf16>,
    %c4_i32 = arith.constant 4 : i32
    %c0_77 = arith.constant 0 : index
    %c0_78 = arith.constant 0 : index
    %181 = vector.load %arg7[%c0_77, %c0_78] : memref<8x128xbf16, #tpu.memory_space<vmem>>, vector<8x128xbf16>
    %c0_79 = arith.constant 0 : index
    %c0_80 = arith.constant 0 : index
    %182 = vector.load %arg8[%c0_79, %c0_80] : memref<8x128xf32, #tpu.memory_space<vmem>>, vector<8x128xf32>
    %183 = arith.index_cast %c4_i32 : i32 to index
    %c0_81 = arith.constant 0 : index
    %c0_82 = arith.constant 0 : index
    %184 = vector.load %arg9[%183, %c0_81, %c0_82] : memref<16x8x512xf32, #tpu.memory_space<vmem>>, vector<1x8x512xf32>
    %185 = vector.shape_cast %184 : vector<1x8x512xf32> to vector<8x512xf32>
    %cst_83 = arith.constant dense<0.000000e+00> : vector<8x512xf32>
    %186 = tpu.matmul %181, %12, %cst_83 {dimension_numbers = #tpu.dot_dimension_numbers<[1], [0], [0], [1], [0, 0, 1, 1], [], []>} : vector<8x128xbf16>, vector<128x512xbf16>, vector<8x512xf32> -> vector<8x512xf32>
    %187 = arith.addf %185, %186 : vector<8x512xf32>
    %188 = arith.truncf %187 : vector<8x512xf32> to vector<8x512xbf16>
    %189 = vector.extract_strided_slice %188 {offsets = [0, 0], sizes = [8, 128], strides = [1, 1]} : vector<8x512xbf16> to vector<8x128xbf16>
    %190 = arith.negf %189 : vector<8x128xbf16>
    %191 = math.exp %190 : vector<8x128xbf16>
    %cst_84 = arith.constant 1.000000e+00 : bf16
    %192 = vector.broadcast %cst_84 : bf16 to vector<8x128xbf16>
    %193 = arith.addf %192, %191 : vector<8x128xbf16>
    %194 = arith.divf %192, %193 : vector<8x128xbf16>
    %195 = vector.extract_strided_slice %188 {offsets = [0, 128], sizes = [8, 128], strides = [1, 1]} : vector<8x512xbf16> to vector<8x128xbf16>
    %196 = arith.negf %195 : vector<8x128xbf16>
    %197 = math.exp %196 : vector<8x128xbf16>
    %cst_85 = arith.constant 1.000000e+00 : bf16
    %198 = vector.broadcast %cst_85 : bf16 to vector<8x128xbf16>
    %199 = arith.addf %198, %197 : vector<8x128xbf16>
    %200 = arith.divf %198, %199 : vector<8x128xbf16>
    %201 = vector.extract_strided_slice %188 {offsets = [0, 256], sizes = [8, 128], strides = [1, 1]} : vector<8x512xbf16> to vector<8x128xbf16>
    %202 = math.tanh %201 : vector<8x128xbf16>
    %203 = vector.extract_strided_slice %188 {offsets = [0, 384], sizes = [8, 128], strides = [1, 1]} : vector<8x512xbf16> to vector<8x128xbf16>
    %204 = arith.negf %203 : vector<8x128xbf16>
    %205 = math.exp %204 : vector<8x128xbf16>
    %cst_86 = arith.constant 1.000000e+00 : bf16
    %206 = vector.broadcast %cst_86 : bf16 to vector<8x128xbf16>
    %207 = arith.addf %206, %205 : vector<8x128xbf16>
    %208 = arith.divf %206, %207 : vector<8x128xbf16>
    %209 = arith.extf %200 : vector<8x128xbf16> to vector<8x128xf32>
    %210 = arith.mulf %209, %182 : vector<8x128xf32>
    %211 = arith.mulf %194, %202 : vector<8x128xbf16>
    %212 = arith.extf %211 : vector<8x128xbf16> to vector<8x128xf32>
    %213 = arith.addf %210, %212 : vector<8x128xf32>
    %214 = arith.truncf %213 : vector<8x128xf32> to vector<8x128xbf16>
    %215 = math.tanh %214 : vector<8x128xbf16>
    %216 = arith.mulf %208, %215 : vector<8x128xbf16>
    %c0_87 = arith.constant 0 : index
    %c0_88 = arith.constant 0 : index
    %217 = vector.load %arg8[%c0_87, %c0_88] : memref<8x128xf32, #tpu.memory_space<vmem>>, vector<8x128xf32>
    tpu.vector_store %arg8[%c0_87, %c0_88], %213 {strides = array<i32>} : memref<8x128xf32, #tpu.memory_space<vmem>>, vector<8x128xf32>,
    %c0_89 = arith.constant 0 : index
    %c0_90 = arith.constant 0 : index
    %218 = vector.load %arg7[%c0_89, %c0_90] : memref<8x128xbf16, #tpu.memory_space<vmem>>, vector<8x128xbf16>
    tpu.vector_store %arg7[%c0_89, %c0_90], %216 {strides = array<i32>} : memref<8x128xbf16, #tpu.memory_space<vmem>>, vector<8x128xbf16>,
    %219 = arith.index_cast %c4_i32 : i32 to index
    %c0_91 = arith.constant 0 : index
    %c0_92 = arith.constant 0 : index
    %220 = vector.load %arg6[%219, %c0_91, %c0_92] : memref<16x8x128xbf16, #tpu.memory_space<vmem>>, vector<1x8x128xbf16>
    %221 = vector.shape_cast %220 : vector<1x8x128xbf16> to vector<8x128xbf16>
    %222 = vector.shape_cast %216 : vector<8x128xbf16> to vector<1x8x128xbf16>
    tpu.vector_store %arg6[%219, %c0_91, %c0_92], %222 {strides = array<i32>} : memref<16x8x128xbf16, #tpu.memory_space<vmem>>, vector<1x8x128xbf16>,
    %c5_i32 = arith.constant 5 : i32
    %c0_93 = arith.constant 0 : index
    %c0_94 = arith.constant 0 : index
    %223 = vector.load %arg7[%c0_93, %c0_94] : memref<8x128xbf16, #tpu.memory_space<vmem>>, vector<8x128xbf16>
    %c0_95 = arith.constant 0 : index
    %c0_96 = arith.constant 0 : index
    %224 = vector.load %arg8[%c0_95, %c0_96] : memref<8x128xf32, #tpu.memory_space<vmem>>, vector<8x128xf32>
    %225 = arith.index_cast %c5_i32 : i32 to index
    %c0_97 = arith.constant 0 : index
    %c0_98 = arith.constant 0 : index
    %226 = vector.load %arg9[%225, %c0_97, %c0_98] : memref<16x8x512xf32, #tpu.memory_space<vmem>>, vector<1x8x512xf32>
    %227 = vector.shape_cast %226 : vector<1x8x512xf32> to vector<8x512xf32>
    %cst_99 = arith.constant dense<0.000000e+00> : vector<8x512xf32>
    %228 = tpu.matmul %223, %12, %cst_99 {dimension_numbers = #tpu.dot_dimension_numbers<[1], [0], [0], [1], [0, 0, 1, 1], [], []>} : vector<8x128xbf16>, vector<128x512xbf16>, vector<8x512xf32> -> vector<8x512xf32>
    %229 = arith.addf %227, %228 : vector<8x512xf32>
    %230 = arith.truncf %229 : vector<8x512xf32> to vector<8x512xbf16>
    %231 = vector.extract_strided_slice %230 {offsets = [0, 0], sizes = [8, 128], strides = [1, 1]} : vector<8x512xbf16> to vector<8x128xbf16>
    %232 = arith.negf %231 : vector<8x128xbf16>
    %233 = math.exp %232 : vector<8x128xbf16>
    %cst_100 = arith.constant 1.000000e+00 : bf16
    %234 = vector.broadcast %cst_100 : bf16 to vector<8x128xbf16>
    %235 = arith.addf %234, %233 : vector<8x128xbf16>
    %236 = arith.divf %234, %235 : vector<8x128xbf16>
    %237 = vector.extract_strided_slice %230 {offsets = [0, 128], sizes = [8, 128], strides = [1, 1]} : vector<8x512xbf16> to vector<8x128xbf16>
    %238 = arith.negf %237 : vector<8x128xbf16>
    %239 = math.exp %238 : vector<8x128xbf16>
    %cst_101 = arith.constant 1.000000e+00 : bf16
    %240 = vector.broadcast %cst_101 : bf16 to vector<8x128xbf16>
    %241 = arith.addf %240, %239 : vector<8x128xbf16>
    %242 = arith.divf %240, %241 : vector<8x128xbf16>
    %243 = vector.extract_strided_slice %230 {offsets = [0, 256], sizes = [8, 128], strides = [1, 1]} : vector<8x512xbf16> to vector<8x128xbf16>
    %244 = math.tanh %243 : vector<8x128xbf16>
    %245 = vector.extract_strided_slice %230 {offsets = [0, 384], sizes = [8, 128], strides = [1, 1]} : vector<8x512xbf16> to vector<8x128xbf16>
    %246 = arith.negf %245 : vector<8x128xbf16>
    %247 = math.exp %246 : vector<8x128xbf16>
    %cst_102 = arith.constant 1.000000e+00 : bf16
    %248 = vector.broadcast %cst_102 : bf16 to vector<8x128xbf16>
    %249 = arith.addf %248, %247 : vector<8x128xbf16>
    %250 = arith.divf %248, %249 : vector<8x128xbf16>
    %251 = arith.extf %242 : vector<8x128xbf16> to vector<8x128xf32>
    %252 = arith.mulf %251, %224 : vector<8x128xf32>
    %253 = arith.mulf %236, %244 : vector<8x128xbf16>
    %254 = arith.extf %253 : vector<8x128xbf16> to vector<8x128xf32>
    %255 = arith.addf %252, %254 : vector<8x128xf32>
    %256 = arith.truncf %255 : vector<8x128xf32> to vector<8x128xbf16>
    %257 = math.tanh %256 : vector<8x128xbf16>
    %258 = arith.mulf %250, %257 : vector<8x128xbf16>
    %c0_103 = arith.constant 0 : index
    %c0_104 = arith.constant 0 : index
    %259 = vector.load %arg8[%c0_103, %c0_104] : memref<8x128xf32, #tpu.memory_space<vmem>>, vector<8x128xf32>
    tpu.vector_store %arg8[%c0_103, %c0_104], %255 {strides = array<i32>} : memref<8x128xf32, #tpu.memory_space<vmem>>, vector<8x128xf32>,
    %c0_105 = arith.constant 0 : index
    %c0_106 = arith.constant 0 : index
    %260 = vector.load %arg7[%c0_105, %c0_106] : memref<8x128xbf16, #tpu.memory_space<vmem>>, vector<8x128xbf16>
    tpu.vector_store %arg7[%c0_105, %c0_106], %258 {strides = array<i32>} : memref<8x128xbf16, #tpu.memory_space<vmem>>, vector<8x128xbf16>,
    %261 = arith.index_cast %c5_i32 : i32 to index
    %c0_107 = arith.constant 0 : index
    %c0_108 = arith.constant 0 : index
    %262 = vector.load %arg6[%261, %c0_107, %c0_108] : memref<16x8x128xbf16, #tpu.memory_space<vmem>>, vector<1x8x128xbf16>
    %263 = vector.shape_cast %262 : vector<1x8x128xbf16> to vector<8x128xbf16>
    %264 = vector.shape_cast %258 : vector<8x128xbf16> to vector<1x8x128xbf16>
    tpu.vector_store %arg6[%261, %c0_107, %c0_108], %264 {strides = array<i32>} : memref<16x8x128xbf16, #tpu.memory_space<vmem>>, vector<1x8x128xbf16>,
    %c6_i32 = arith.constant 6 : i32
    %c0_109 = arith.constant 0 : index
    %c0_110 = arith.constant 0 : index
    %265 = vector.load %arg7[%c0_109, %c0_110] : memref<8x128xbf16, #tpu.memory_space<vmem>>, vector<8x128xbf16>
    %c0_111 = arith.constant 0 : index
    %c0_112 = arith.constant 0 : index
    %266 = vector.load %arg8[%c0_111, %c0_112] : memref<8x128xf32, #tpu.memory_space<vmem>>, vector<8x128xf32>
    %267 = arith.index_cast %c6_i32 : i32 to index
    %c0_113 = arith.constant 0 : index
    %c0_114 = arith.constant 0 : index
    %268 = vector.load %arg9[%267, %c0_113, %c0_114] : memref<16x8x512xf32, #tpu.memory_space<vmem>>, vector<1x8x512xf32>
    %269 = vector.shape_cast %268 : vector<1x8x512xf32> to vector<8x512xf32>
    %cst_115 = arith.constant dense<0.000000e+00> : vector<8x512xf32>
    %270 = tpu.matmul %265, %12, %cst_115 {dimension_numbers = #tpu.dot_dimension_numbers<[1], [0], [0], [1], [0, 0, 1, 1], [], []>} : vector<8x128xbf16>, vector<128x512xbf16>, vector<8x512xf32> -> vector<8x512xf32>
    %271 = arith.addf %269, %270 : vector<8x512xf32>
    %272 = arith.truncf %271 : vector<8x512xf32> to vector<8x512xbf16>
    %273 = vector.extract_strided_slice %272 {offsets = [0, 0], sizes = [8, 128], strides = [1, 1]} : vector<8x512xbf16> to vector<8x128xbf16>
    %274 = arith.negf %273 : vector<8x128xbf16>
    %275 = math.exp %274 : vector<8x128xbf16>
    %cst_116 = arith.constant 1.000000e+00 : bf16
    %276 = vector.broadcast %cst_116 : bf16 to vector<8x128xbf16>
    %277 = arith.addf %276, %275 : vector<8x128xbf16>
    %278 = arith.divf %276, %277 : vector<8x128xbf16>
    %279 = vector.extract_strided_slice %272 {offsets = [0, 128], sizes = [8, 128], strides = [1, 1]} : vector<8x512xbf16> to vector<8x128xbf16>
    %280 = arith.negf %279 : vector<8x128xbf16>
    %281 = math.exp %280 : vector<8x128xbf16>
    %cst_117 = arith.constant 1.000000e+00 : bf16
    %282 = vector.broadcast %cst_117 : bf16 to vector<8x128xbf16>
    %283 = arith.addf %282, %281 : vector<8x128xbf16>
    %284 = arith.divf %282, %283 : vector<8x128xbf16>
    %285 = vector.extract_strided_slice %272 {offsets = [0, 256], sizes = [8, 128], strides = [1, 1]} : vector<8x512xbf16> to vector<8x128xbf16>
    %286 = math.tanh %285 : vector<8x128xbf16>
    %287 = vector.extract_strided_slice %272 {offsets = [0, 384], sizes = [8, 128], strides = [1, 1]} : vector<8x512xbf16> to vector<8x128xbf16>
    %288 = arith.negf %287 : vector<8x128xbf16>
    %289 = math.exp %288 : vector<8x128xbf16>
    %cst_118 = arith.constant 1.000000e+00 : bf16
    %290 = vector.broadcast %cst_118 : bf16 to vector<8x128xbf16>
    %291 = arith.addf %290, %289 : vector<8x128xbf16>
    %292 = arith.divf %290, %291 : vector<8x128xbf16>
    %293 = arith.extf %284 : vector<8x128xbf16> to vector<8x128xf32>
    %294 = arith.mulf %293, %266 : vector<8x128xf32>
    %295 = arith.mulf %278, %286 : vector<8x128xbf16>
    %296 = arith.extf %295 : vector<8x128xbf16> to vector<8x128xf32>
    %297 = arith.addf %294, %296 : vector<8x128xf32>
    %298 = arith.truncf %297 : vector<8x128xf32> to vector<8x128xbf16>
    %299 = math.tanh %298 : vector<8x128xbf16>
    %300 = arith.mulf %292, %299 : vector<8x128xbf16>
    %c0_119 = arith.constant 0 : index
    %c0_120 = arith.constant 0 : index
    %301 = vector.load %arg8[%c0_119, %c0_120] : memref<8x128xf32, #tpu.memory_space<vmem>>, vector<8x128xf32>
    tpu.vector_store %arg8[%c0_119, %c0_120], %297 {strides = array<i32>} : memref<8x128xf32, #tpu.memory_space<vmem>>, vector<8x128xf32>,
    %c0_121 = arith.constant 0 : index
    %c0_122 = arith.constant 0 : index
    %302 = vector.load %arg7[%c0_121, %c0_122] : memref<8x128xbf16, #tpu.memory_space<vmem>>, vector<8x128xbf16>
    tpu.vector_store %arg7[%c0_121, %c0_122], %300 {strides = array<i32>} : memref<8x128xbf16, #tpu.memory_space<vmem>>, vector<8x128xbf16>,
    %303 = arith.index_cast %c6_i32 : i32 to index
    %c0_123 = arith.constant 0 : index
    %c0_124 = arith.constant 0 : index
    %304 = vector.load %arg6[%303, %c0_123, %c0_124] : memref<16x8x128xbf16, #tpu.memory_space<vmem>>, vector<1x8x128xbf16>
    %305 = vector.shape_cast %304 : vector<1x8x128xbf16> to vector<8x128xbf16>
    %306 = vector.shape_cast %300 : vector<8x128xbf16> to vector<1x8x128xbf16>
    tpu.vector_store %arg6[%303, %c0_123, %c0_124], %306 {strides = array<i32>} : memref<16x8x128xbf16, #tpu.memory_space<vmem>>, vector<1x8x128xbf16>,
    %c7_i32 = arith.constant 7 : i32
    %c0_125 = arith.constant 0 : index
    %c0_126 = arith.constant 0 : index
    %307 = vector.load %arg7[%c0_125, %c0_126] : memref<8x128xbf16, #tpu.memory_space<vmem>>, vector<8x128xbf16>
    %c0_127 = arith.constant 0 : index
    %c0_128 = arith.constant 0 : index
    %308 = vector.load %arg8[%c0_127, %c0_128] : memref<8x128xf32, #tpu.memory_space<vmem>>, vector<8x128xf32>
    %309 = arith.index_cast %c7_i32 : i32 to index
    %c0_129 = arith.constant 0 : index
    %c0_130 = arith.constant 0 : index
    %310 = vector.load %arg9[%309, %c0_129, %c0_130] : memref<16x8x512xf32, #tpu.memory_space<vmem>>, vector<1x8x512xf32>
    %311 = vector.shape_cast %310 : vector<1x8x512xf32> to vector<8x512xf32>
    %cst_131 = arith.constant dense<0.000000e+00> : vector<8x512xf32>
    %312 = tpu.matmul %307, %12, %cst_131 {dimension_numbers = #tpu.dot_dimension_numbers<[1], [0], [0], [1], [0, 0, 1, 1], [], []>} : vector<8x128xbf16>, vector<128x512xbf16>, vector<8x512xf32> -> vector<8x512xf32>
    %313 = arith.addf %311, %312 : vector<8x512xf32>
    %314 = arith.truncf %313 : vector<8x512xf32> to vector<8x512xbf16>
    %315 = vector.extract_strided_slice %314 {offsets = [0, 0], sizes = [8, 128], strides = [1, 1]} : vector<8x512xbf16> to vector<8x128xbf16>
    %316 = arith.negf %315 : vector<8x128xbf16>
    %317 = math.exp %316 : vector<8x128xbf16>
    %cst_132 = arith.constant 1.000000e+00 : bf16
    %318 = vector.broadcast %cst_132 : bf16 to vector<8x128xbf16>
    %319 = arith.addf %318, %317 : vector<8x128xbf16>
    %320 = arith.divf %318, %319 : vector<8x128xbf16>
    %321 = vector.extract_strided_slice %314 {offsets = [0, 128], sizes = [8, 128], strides = [1, 1]} : vector<8x512xbf16> to vector<8x128xbf16>
    %322 = arith.negf %321 : vector<8x128xbf16>
    %323 = math.exp %322 : vector<8x128xbf16>
    %cst_133 = arith.constant 1.000000e+00 : bf16
    %324 = vector.broadcast %cst_133 : bf16 to vector<8x128xbf16>
    %325 = arith.addf %324, %323 : vector<8x128xbf16>
    %326 = arith.divf %324, %325 : vector<8x128xbf16>
    %327 = vector.extract_strided_slice %314 {offsets = [0, 256], sizes = [8, 128], strides = [1, 1]} : vector<8x512xbf16> to vector<8x128xbf16>
    %328 = math.tanh %327 : vector<8x128xbf16>
    %329 = vector.extract_strided_slice %314 {offsets = [0, 384], sizes = [8, 128], strides = [1, 1]} : vector<8x512xbf16> to vector<8x128xbf16>
    %330 = arith.negf %329 : vector<8x128xbf16>
    %331 = math.exp %330 : vector<8x128xbf16>
    %cst_134 = arith.constant 1.000000e+00 : bf16
    %332 = vector.broadcast %cst_134 : bf16 to vector<8x128xbf16>
    %333 = arith.addf %332, %331 : vector<8x128xbf16>
    %334 = arith.divf %332, %333 : vector<8x128xbf16>
    %335 = arith.extf %326 : vector<8x128xbf16> to vector<8x128xf32>
    %336 = arith.mulf %335, %308 : vector<8x128xf32>
    %337 = arith.mulf %320, %328 : vector<8x128xbf16>
    %338 = arith.extf %337 : vector<8x128xbf16> to vector<8x128xf32>
    %339 = arith.addf %336, %338 : vector<8x128xf32>
    %340 = arith.truncf %339 : vector<8x128xf32> to vector<8x128xbf16>
    %341 = math.tanh %340 : vector<8x128xbf16>
    %342 = arith.mulf %334, %341 : vector<8x128xbf16>
    %c0_135 = arith.constant 0 : index
    %c0_136 = arith.constant 0 : index
    %343 = vector.load %arg8[%c0_135, %c0_136] : memref<8x128xf32, #tpu.memory_space<vmem>>, vector<8x128xf32>
    tpu.vector_store %arg8[%c0_135, %c0_136], %339 {strides = array<i32>} : memref<8x128xf32, #tpu.memory_space<vmem>>, vector<8x128xf32>,
    %c0_137 = arith.constant 0 : index
    %c0_138 = arith.constant 0 : index
    %344 = vector.load %arg7[%c0_137, %c0_138] : memref<8x128xbf16, #tpu.memory_space<vmem>>, vector<8x128xbf16>
    tpu.vector_store %arg7[%c0_137, %c0_138], %342 {strides = array<i32>} : memref<8x128xbf16, #tpu.memory_space<vmem>>, vector<8x128xbf16>,
    %345 = arith.index_cast %c7_i32 : i32 to index
    %c0_139 = arith.constant 0 : index
    %c0_140 = arith.constant 0 : index
    %346 = vector.load %arg6[%345, %c0_139, %c0_140] : memref<16x8x128xbf16, #tpu.memory_space<vmem>>, vector<1x8x128xbf16>
    %347 = vector.shape_cast %346 : vector<1x8x128xbf16> to vector<8x128xbf16>
    %348 = vector.shape_cast %342 : vector<8x128xbf16> to vector<1x8x128xbf16>
    tpu.vector_store %arg6[%345, %c0_139, %c0_140], %348 {strides = array<i32>} : memref<16x8x128xbf16, #tpu.memory_space<vmem>>, vector<1x8x128xbf16>,
    %c8_i32 = arith.constant 8 : i32
    %c0_141 = arith.constant 0 : index
    %c0_142 = arith.constant 0 : index
    %349 = vector.load %arg7[%c0_141, %c0_142] : memref<8x128xbf16, #tpu.memory_space<vmem>>, vector<8x128xbf16>
    %c0_143 = arith.constant 0 : index
    %c0_144 = arith.constant 0 : index
    %350 = vector.load %arg8[%c0_143, %c0_144] : memref<8x128xf32, #tpu.memory_space<vmem>>, vector<8x128xf32>
    %351 = arith.index_cast %c8_i32 : i32 to index
    %c0_145 = arith.constant 0 : index
    %c0_146 = arith.constant 0 : index
    %352 = vector.load %arg9[%351, %c0_145, %c0_146] : memref<16x8x512xf32, #tpu.memory_space<vmem>>, vector<1x8x512xf32>
    %353 = vector.shape_cast %352 : vector<1x8x512xf32> to vector<8x512xf32>
    %cst_147 = arith.constant dense<0.000000e+00> : vector<8x512xf32>
    %354 = tpu.matmul %349, %12, %cst_147 {dimension_numbers = #tpu.dot_dimension_numbers<[1], [0], [0], [1], [0, 0, 1, 1], [], []>} : vector<8x128xbf16>, vector<128x512xbf16>, vector<8x512xf32> -> vector<8x512xf32>
    %355 = arith.addf %353, %354 : vector<8x512xf32>
    %356 = arith.truncf %355 : vector<8x512xf32> to vector<8x512xbf16>
    %357 = vector.extract_strided_slice %356 {offsets = [0, 0], sizes = [8, 128], strides = [1, 1]} : vector<8x512xbf16> to vector<8x128xbf16>
    %358 = arith.negf %357 : vector<8x128xbf16>
    %359 = math.exp %358 : vector<8x128xbf16>
    %cst_148 = arith.constant 1.000000e+00 : bf16
    %360 = vector.broadcast %cst_148 : bf16 to vector<8x128xbf16>
    %361 = arith.addf %360, %359 : vector<8x128xbf16>
    %362 = arith.divf %360, %361 : vector<8x128xbf16>
    %363 = vector.extract_strided_slice %356 {offsets = [0, 128], sizes = [8, 128], strides = [1, 1]} : vector<8x512xbf16> to vector<8x128xbf16>
    %364 = arith.negf %363 : vector<8x128xbf16>
    %365 = math.exp %364 : vector<8x128xbf16>
    %cst_149 = arith.constant 1.000000e+00 : bf16
    %366 = vector.broadcast %cst_149 : bf16 to vector<8x128xbf16>
    %367 = arith.addf %366, %365 : vector<8x128xbf16>
    %368 = arith.divf %366, %367 : vector<8x128xbf16>
    %369 = vector.extract_strided_slice %356 {offsets = [0, 256], sizes = [8, 128], strides = [1, 1]} : vector<8x512xbf16> to vector<8x128xbf16>
    %370 = math.tanh %369 : vector<8x128xbf16>
    %371 = vector.extract_strided_slice %356 {offsets = [0, 384], sizes = [8, 128], strides = [1, 1]} : vector<8x512xbf16> to vector<8x128xbf16>
    %372 = arith.negf %371 : vector<8x128xbf16>
    %373 = math.exp %372 : vector<8x128xbf16>
    %cst_150 = arith.constant 1.000000e+00 : bf16
    %374 = vector.broadcast %cst_150 : bf16 to vector<8x128xbf16>
    %375 = arith.addf %374, %373 : vector<8x128xbf16>
    %376 = arith.divf %374, %375 : vector<8x128xbf16>
    %377 = arith.extf %368 : vector<8x128xbf16> to vector<8x128xf32>
    %378 = arith.mulf %377, %350 : vector<8x128xf32>
    %379 = arith.mulf %362, %370 : vector<8x128xbf16>
    %380 = arith.extf %379 : vector<8x128xbf16> to vector<8x128xf32>
    %381 = arith.addf %378, %380 : vector<8x128xf32>
    %382 = arith.truncf %381 : vector<8x128xf32> to vector<8x128xbf16>
    %383 = math.tanh %382 : vector<8x128xbf16>
    %384 = arith.mulf %376, %383 : vector<8x128xbf16>
    %c0_151 = arith.constant 0 : index
    %c0_152 = arith.constant 0 : index
    %385 = vector.load %arg8[%c0_151, %c0_152] : memref<8x128xf32, #tpu.memory_space<vmem>>, vector<8x128xf32>
    tpu.vector_store %arg8[%c0_151, %c0_152], %381 {strides = array<i32>} : memref<8x128xf32, #tpu.memory_space<vmem>>, vector<8x128xf32>,
    %c0_153 = arith.constant 0 : index
    %c0_154 = arith.constant 0 : index
    %386 = vector.load %arg7[%c0_153, %c0_154] : memref<8x128xbf16, #tpu.memory_space<vmem>>, vector<8x128xbf16>
    tpu.vector_store %arg7[%c0_153, %c0_154], %384 {strides = array<i32>} : memref<8x128xbf16, #tpu.memory_space<vmem>>, vector<8x128xbf16>,
    %387 = arith.index_cast %c8_i32 : i32 to index
    %c0_155 = arith.constant 0 : index
    %c0_156 = arith.constant 0 : index
    %388 = vector.load %arg6[%387, %c0_155, %c0_156] : memref<16x8x128xbf16, #tpu.memory_space<vmem>>, vector<1x8x128xbf16>
    %389 = vector.shape_cast %388 : vector<1x8x128xbf16> to vector<8x128xbf16>
    %390 = vector.shape_cast %384 : vector<8x128xbf16> to vector<1x8x128xbf16>
    tpu.vector_store %arg6[%387, %c0_155, %c0_156], %390 {strides = array<i32>} : memref<16x8x128xbf16, #tpu.memory_space<vmem>>, vector<1x8x128xbf16>,
    %c9_i32 = arith.constant 9 : i32
    %c0_157 = arith.constant 0 : index
    %c0_158 = arith.constant 0 : index
    %391 = vector.load %arg7[%c0_157, %c0_158] : memref<8x128xbf16, #tpu.memory_space<vmem>>, vector<8x128xbf16>
    %c0_159 = arith.constant 0 : index
    %c0_160 = arith.constant 0 : index
    %392 = vector.load %arg8[%c0_159, %c0_160] : memref<8x128xf32, #tpu.memory_space<vmem>>, vector<8x128xf32>
    %393 = arith.index_cast %c9_i32 : i32 to index
    %c0_161 = arith.constant 0 : index
    %c0_162 = arith.constant 0 : index
    %394 = vector.load %arg9[%393, %c0_161, %c0_162] : memref<16x8x512xf32, #tpu.memory_space<vmem>>, vector<1x8x512xf32>
    %395 = vector.shape_cast %394 : vector<1x8x512xf32> to vector<8x512xf32>
    %cst_163 = arith.constant dense<0.000000e+00> : vector<8x512xf32>
    %396 = tpu.matmul %391, %12, %cst_163 {dimension_numbers = #tpu.dot_dimension_numbers<[1], [0], [0], [1], [0, 0, 1, 1], [], []>} : vector<8x128xbf16>, vector<128x512xbf16>, vector<8x512xf32> -> vector<8x512xf32>
    %397 = arith.addf %395, %396 : vector<8x512xf32>
    %398 = arith.truncf %397 : vector<8x512xf32> to vector<8x512xbf16>
    %399 = vector.extract_strided_slice %398 {offsets = [0, 0], sizes = [8, 128], strides = [1, 1]} : vector<8x512xbf16> to vector<8x128xbf16>
    %400 = arith.negf %399 : vector<8x128xbf16>
    %401 = math.exp %400 : vector<8x128xbf16>
    %cst_164 = arith.constant 1.000000e+00 : bf16
    %402 = vector.broadcast %cst_164 : bf16 to vector<8x128xbf16>
    %403 = arith.addf %402, %401 : vector<8x128xbf16>
    %404 = arith.divf %402, %403 : vector<8x128xbf16>
    %405 = vector.extract_strided_slice %398 {offsets = [0, 128], sizes = [8, 128], strides = [1, 1]} : vector<8x512xbf16> to vector<8x128xbf16>
    %406 = arith.negf %405 : vector<8x128xbf16>
    %407 = math.exp %406 : vector<8x128xbf16>
    %cst_165 = arith.constant 1.000000e+00 : bf16
    %408 = vector.broadcast %cst_165 : bf16 to vector<8x128xbf16>
    %409 = arith.addf %408, %407 : vector<8x128xbf16>
    %410 = arith.divf %408, %409 : vector<8x128xbf16>
    %411 = vector.extract_strided_slice %398 {offsets = [0, 256], sizes = [8, 128], strides = [1, 1]} : vector<8x512xbf16> to vector<8x128xbf16>
    %412 = math.tanh %411 : vector<8x128xbf16>
    %413 = vector.extract_strided_slice %398 {offsets = [0, 384], sizes = [8, 128], strides = [1, 1]} : vector<8x512xbf16> to vector<8x128xbf16>
    %414 = arith.negf %413 : vector<8x128xbf16>
    %415 = math.exp %414 : vector<8x128xbf16>
    %cst_166 = arith.constant 1.000000e+00 : bf16
    %416 = vector.broadcast %cst_166 : bf16 to vector<8x128xbf16>
    %417 = arith.addf %416, %415 : vector<8x128xbf16>
    %418 = arith.divf %416, %417 : vector<8x128xbf16>
    %419 = arith.extf %410 : vector<8x128xbf16> to vector<8x128xf32>
    %420 = arith.mulf %419, %392 : vector<8x128xf32>
    %421 = arith.mulf %404, %412 : vector<8x128xbf16>
    %422 = arith.extf %421 : vector<8x128xbf16> to vector<8x128xf32>
    %423 = arith.addf %420, %422 : vector<8x128xf32>
    %424 = arith.truncf %423 : vector<8x128xf32> to vector<8x128xbf16>
    %425 = math.tanh %424 : vector<8x128xbf16>
    %426 = arith.mulf %418, %425 : vector<8x128xbf16>
    %c0_167 = arith.constant 0 : index
    %c0_168 = arith.constant 0 : index
    %427 = vector.load %arg8[%c0_167, %c0_168] : memref<8x128xf32, #tpu.memory_space<vmem>>, vector<8x128xf32>
    tpu.vector_store %arg8[%c0_167, %c0_168], %423 {strides = array<i32>} : memref<8x128xf32, #tpu.memory_space<vmem>>, vector<8x128xf32>,
    %c0_169 = arith.constant 0 : index
    %c0_170 = arith.constant 0 : index
    %428 = vector.load %arg7[%c0_169, %c0_170] : memref<8x128xbf16, #tpu.memory_space<vmem>>, vector<8x128xbf16>
    tpu.vector_store %arg7[%c0_169, %c0_170], %426 {strides = array<i32>} : memref<8x128xbf16, #tpu.memory_space<vmem>>, vector<8x128xbf16>,
    %429 = arith.index_cast %c9_i32 : i32 to index
    %c0_171 = arith.constant 0 : index
    %c0_172 = arith.constant 0 : index
    %430 = vector.load %arg6[%429, %c0_171, %c0_172] : memref<16x8x128xbf16, #tpu.memory_space<vmem>>, vector<1x8x128xbf16>
    %431 = vector.shape_cast %430 : vector<1x8x128xbf16> to vector<8x128xbf16>
    %432 = vector.shape_cast %426 : vector<8x128xbf16> to vector<1x8x128xbf16>
    tpu.vector_store %arg6[%429, %c0_171, %c0_172], %432 {strides = array<i32>} : memref<16x8x128xbf16, #tpu.memory_space<vmem>>, vector<1x8x128xbf16>,
    %c10_i32 = arith.constant 10 : i32
    %c0_173 = arith.constant 0 : index
    %c0_174 = arith.constant 0 : index
    %433 = vector.load %arg7[%c0_173, %c0_174] : memref<8x128xbf16, #tpu.memory_space<vmem>>, vector<8x128xbf16>
    %c0_175 = arith.constant 0 : index
    %c0_176 = arith.constant 0 : index
    %434 = vector.load %arg8[%c0_175, %c0_176] : memref<8x128xf32, #tpu.memory_space<vmem>>, vector<8x128xf32>
    %435 = arith.index_cast %c10_i32 : i32 to index
    %c0_177 = arith.constant 0 : index
    %c0_178 = arith.constant 0 : index
    %436 = vector.load %arg9[%435, %c0_177, %c0_178] : memref<16x8x512xf32, #tpu.memory_space<vmem>>, vector<1x8x512xf32>
    %437 = vector.shape_cast %436 : vector<1x8x512xf32> to vector<8x512xf32>
    %cst_179 = arith.constant dense<0.000000e+00> : vector<8x512xf32>
    %438 = tpu.matmul %433, %12, %cst_179 {dimension_numbers = #tpu.dot_dimension_numbers<[1], [0], [0], [1], [0, 0, 1, 1], [], []>} : vector<8x128xbf16>, vector<128x512xbf16>, vector<8x512xf32> -> vector<8x512xf32>
    %439 = arith.addf %437, %438 : vector<8x512xf32>
    %440 = arith.truncf %439 : vector<8x512xf32> to vector<8x512xbf16>
    %441 = vector.extract_strided_slice %440 {offsets = [0, 0], sizes = [8, 128], strides = [1, 1]} : vector<8x512xbf16> to vector<8x128xbf16>
    %442 = arith.negf %441 : vector<8x128xbf16>
    %443 = math.exp %442 : vector<8x128xbf16>
    %cst_180 = arith.constant 1.000000e+00 : bf16
    %444 = vector.broadcast %cst_180 : bf16 to vector<8x128xbf16>
    %445 = arith.addf %444, %443 : vector<8x128xbf16>
    %446 = arith.divf %444, %445 : vector<8x128xbf16>
    %447 = vector.extract_strided_slice %440 {offsets = [0, 128], sizes = [8, 128], strides = [1, 1]} : vector<8x512xbf16> to vector<8x128xbf16>
    %448 = arith.negf %447 : vector<8x128xbf16>
    %449 = math.exp %448 : vector<8x128xbf16>
    %cst_181 = arith.constant 1.000000e+00 : bf16
    %450 = vector.broadcast %cst_181 : bf16 to vector<8x128xbf16>
    %451 = arith.addf %450, %449 : vector<8x128xbf16>
    %452 = arith.divf %450, %451 : vector<8x128xbf16>
    %453 = vector.extract_strided_slice %440 {offsets = [0, 256], sizes = [8, 128], strides = [1, 1]} : vector<8x512xbf16> to vector<8x128xbf16>
    %454 = math.tanh %453 : vector<8x128xbf16>
    %455 = vector.extract_strided_slice %440 {offsets = [0, 384], sizes = [8, 128], strides = [1, 1]} : vector<8x512xbf16> to vector<8x128xbf16>
    %456 = arith.negf %455 : vector<8x128xbf16>
    %457 = math.exp %456 : vector<8x128xbf16>
    %cst_182 = arith.constant 1.000000e+00 : bf16
    %458 = vector.broadcast %cst_182 : bf16 to vector<8x128xbf16>
    %459 = arith.addf %458, %457 : vector<8x128xbf16>
    %460 = arith.divf %458, %459 : vector<8x128xbf16>
    %461 = arith.extf %452 : vector<8x128xbf16> to vector<8x128xf32>
    %462 = arith.mulf %461, %434 : vector<8x128xf32>
    %463 = arith.mulf %446, %454 : vector<8x128xbf16>
    %464 = arith.extf %463 : vector<8x128xbf16> to vector<8x128xf32>
    %465 = arith.addf %462, %464 : vector<8x128xf32>
    %466 = arith.truncf %465 : vector<8x128xf32> to vector<8x128xbf16>
    %467 = math.tanh %466 : vector<8x128xbf16>
    %468 = arith.mulf %460, %467 : vector<8x128xbf16>
    %c0_183 = arith.constant 0 : index
    %c0_184 = arith.constant 0 : index
    %469 = vector.load %arg8[%c0_183, %c0_184] : memref<8x128xf32, #tpu.memory_space<vmem>>, vector<8x128xf32>
    tpu.vector_store %arg8[%c0_183, %c0_184], %465 {strides = array<i32>} : memref<8x128xf32, #tpu.memory_space<vmem>>, vector<8x128xf32>,
    %c0_185 = arith.constant 0 : index
    %c0_186 = arith.constant 0 : index
    %470 = vector.load %arg7[%c0_185, %c0_186] : memref<8x128xbf16, #tpu.memory_space<vmem>>, vector<8x128xbf16>
    tpu.vector_store %arg7[%c0_185, %c0_186], %468 {strides = array<i32>} : memref<8x128xbf16, #tpu.memory_space<vmem>>, vector<8x128xbf16>,
    %471 = arith.index_cast %c10_i32 : i32 to index
    %c0_187 = arith.constant 0 : index
    %c0_188 = arith.constant 0 : index
    %472 = vector.load %arg6[%471, %c0_187, %c0_188] : memref<16x8x128xbf16, #tpu.memory_space<vmem>>, vector<1x8x128xbf16>
    %473 = vector.shape_cast %472 : vector<1x8x128xbf16> to vector<8x128xbf16>
    %474 = vector.shape_cast %468 : vector<8x128xbf16> to vector<1x8x128xbf16>
    tpu.vector_store %arg6[%471, %c0_187, %c0_188], %474 {strides = array<i32>} : memref<16x8x128xbf16, #tpu.memory_space<vmem>>, vector<1x8x128xbf16>,
    %c11_i32 = arith.constant 11 : i32
    %c0_189 = arith.constant 0 : index
    %c0_190 = arith.constant 0 : index
    %475 = vector.load %arg7[%c0_189, %c0_190] : memref<8x128xbf16, #tpu.memory_space<vmem>>, vector<8x128xbf16>
    %c0_191 = arith.constant 0 : index
    %c0_192 = arith.constant 0 : index
    %476 = vector.load %arg8[%c0_191, %c0_192] : memref<8x128xf32, #tpu.memory_space<vmem>>, vector<8x128xf32>
    %477 = arith.index_cast %c11_i32 : i32 to index
    %c0_193 = arith.constant 0 : index
    %c0_194 = arith.constant 0 : index
    %478 = vector.load %arg9[%477, %c0_193, %c0_194] : memref<16x8x512xf32, #tpu.memory_space<vmem>>, vector<1x8x512xf32>
    %479 = vector.shape_cast %478 : vector<1x8x512xf32> to vector<8x512xf32>
    %cst_195 = arith.constant dense<0.000000e+00> : vector<8x512xf32>
    %480 = tpu.matmul %475, %12, %cst_195 {dimension_numbers = #tpu.dot_dimension_numbers<[1], [0], [0], [1], [0, 0, 1, 1], [], []>} : vector<8x128xbf16>, vector<128x512xbf16>, vector<8x512xf32> -> vector<8x512xf32>
    %481 = arith.addf %479, %480 : vector<8x512xf32>
    %482 = arith.truncf %481 : vector<8x512xf32> to vector<8x512xbf16>
    %483 = vector.extract_strided_slice %482 {offsets = [0, 0], sizes = [8, 128], strides = [1, 1]} : vector<8x512xbf16> to vector<8x128xbf16>
    %484 = arith.negf %483 : vector<8x128xbf16>
    %485 = math.exp %484 : vector<8x128xbf16>
    %cst_196 = arith.constant 1.000000e+00 : bf16
    %486 = vector.broadcast %cst_196 : bf16 to vector<8x128xbf16>
    %487 = arith.addf %486, %485 : vector<8x128xbf16>
    %488 = arith.divf %486, %487 : vector<8x128xbf16>
    %489 = vector.extract_strided_slice %482 {offsets = [0, 128], sizes = [8, 128], strides = [1, 1]} : vector<8x512xbf16> to vector<8x128xbf16>
    %490 = arith.negf %489 : vector<8x128xbf16>
    %491 = math.exp %490 : vector<8x128xbf16>
    %cst_197 = arith.constant 1.000000e+00 : bf16
    %492 = vector.broadcast %cst_197 : bf16 to vector<8x128xbf16>
    %493 = arith.addf %492, %491 : vector<8x128xbf16>
    %494 = arith.divf %492, %493 : vector<8x128xbf16>
    %495 = vector.extract_strided_slice %482 {offsets = [0, 256], sizes = [8, 128], strides = [1, 1]} : vector<8x512xbf16> to vector<8x128xbf16>
    %496 = math.tanh %495 : vector<8x128xbf16>
    %497 = vector.extract_strided_slice %482 {offsets = [0, 384], sizes = [8, 128], strides = [1, 1]} : vector<8x512xbf16> to vector<8x128xbf16>
    %498 = arith.negf %497 : vector<8x128xbf16>
    %499 = math.exp %498 : vector<8x128xbf16>
    %cst_198 = arith.constant 1.000000e+00 : bf16
    %500 = vector.broadcast %cst_198 : bf16 to vector<8x128xbf16>
    %501 = arith.addf %500, %499 : vector<8x128xbf16>
    %502 = arith.divf %500, %501 : vector<8x128xbf16>
    %503 = arith.extf %494 : vector<8x128xbf16> to vector<8x128xf32>
    %504 = arith.mulf %503, %476 : vector<8x128xf32>
    %505 = arith.mulf %488, %496 : vector<8x128xbf16>
    %506 = arith.extf %505 : vector<8x128xbf16> to vector<8x128xf32>
    %507 = arith.addf %504, %506 : vector<8x128xf32>
    %508 = arith.truncf %507 : vector<8x128xf32> to vector<8x128xbf16>
    %509 = math.tanh %508 : vector<8x128xbf16>
    %510 = arith.mulf %502, %509 : vector<8x128xbf16>
    %c0_199 = arith.constant 0 : index
    %c0_200 = arith.constant 0 : index
    %511 = vector.load %arg8[%c0_199, %c0_200] : memref<8x128xf32, #tpu.memory_space<vmem>>, vector<8x128xf32>
    tpu.vector_store %arg8[%c0_199, %c0_200], %507 {strides = array<i32>} : memref<8x128xf32, #tpu.memory_space<vmem>>, vector<8x128xf32>,
    %c0_201 = arith.constant 0 : index
    %c0_202 = arith.constant 0 : index
    %512 = vector.load %arg7[%c0_201, %c0_202] : memref<8x128xbf16, #tpu.memory_space<vmem>>, vector<8x128xbf16>
    tpu.vector_store %arg7[%c0_201, %c0_202], %510 {strides = array<i32>} : memref<8x128xbf16, #tpu.memory_space<vmem>>, vector<8x128xbf16>,
    %513 = arith.index_cast %c11_i32 : i32 to index
    %c0_203 = arith.constant 0 : index
    %c0_204 = arith.constant 0 : index
    %514 = vector.load %arg6[%513, %c0_203, %c0_204] : memref<16x8x128xbf16, #tpu.memory_space<vmem>>, vector<1x8x128xbf16>
    %515 = vector.shape_cast %514 : vector<1x8x128xbf16> to vector<8x128xbf16>
    %516 = vector.shape_cast %510 : vector<8x128xbf16> to vector<1x8x128xbf16>
    tpu.vector_store %arg6[%513, %c0_203, %c0_204], %516 {strides = array<i32>} : memref<16x8x128xbf16, #tpu.memory_space<vmem>>, vector<1x8x128xbf16>,
    %c12_i32 = arith.constant 12 : i32
    %c0_205 = arith.constant 0 : index
    %c0_206 = arith.constant 0 : index
    %517 = vector.load %arg7[%c0_205, %c0_206] : memref<8x128xbf16, #tpu.memory_space<vmem>>, vector<8x128xbf16>
    %c0_207 = arith.constant 0 : index
    %c0_208 = arith.constant 0 : index
    %518 = vector.load %arg8[%c0_207, %c0_208] : memref<8x128xf32, #tpu.memory_space<vmem>>, vector<8x128xf32>
    %519 = arith.index_cast %c12_i32 : i32 to index
    %c0_209 = arith.constant 0 : index
    %c0_210 = arith.constant 0 : index
    %520 = vector.load %arg9[%519, %c0_209, %c0_210] : memref<16x8x512xf32, #tpu.memory_space<vmem>>, vector<1x8x512xf32>
    %521 = vector.shape_cast %520 : vector<1x8x512xf32> to vector<8x512xf32>
    %cst_211 = arith.constant dense<0.000000e+00> : vector<8x512xf32>
    %522 = tpu.matmul %517, %12, %cst_211 {dimension_numbers = #tpu.dot_dimension_numbers<[1], [0], [0], [1], [0, 0, 1, 1], [], []>} : vector<8x128xbf16>, vector<128x512xbf16>, vector<8x512xf32> -> vector<8x512xf32>
    %523 = arith.addf %521, %522 : vector<8x512xf32>
    %524 = arith.truncf %523 : vector<8x512xf32> to vector<8x512xbf16>
    %525 = vector.extract_strided_slice %524 {offsets = [0, 0], sizes = [8, 128], strides = [1, 1]} : vector<8x512xbf16> to vector<8x128xbf16>
    %526 = arith.negf %525 : vector<8x128xbf16>
    %527 = math.exp %526 : vector<8x128xbf16>
    %cst_212 = arith.constant 1.000000e+00 : bf16
    %528 = vector.broadcast %cst_212 : bf16 to vector<8x128xbf16>
    %529 = arith.addf %528, %527 : vector<8x128xbf16>
    %530 = arith.divf %528, %529 : vector<8x128xbf16>
    %531 = vector.extract_strided_slice %524 {offsets = [0, 128], sizes = [8, 128], strides = [1, 1]} : vector<8x512xbf16> to vector<8x128xbf16>
    %532 = arith.negf %531 : vector<8x128xbf16>
    %533 = math.exp %532 : vector<8x128xbf16>
    %cst_213 = arith.constant 1.000000e+00 : bf16
    %534 = vector.broadcast %cst_213 : bf16 to vector<8x128xbf16>
    %535 = arith.addf %534, %533 : vector<8x128xbf16>
    %536 = arith.divf %534, %535 : vector<8x128xbf16>
    %537 = vector.extract_strided_slice %524 {offsets = [0, 256], sizes = [8, 128], strides = [1, 1]} : vector<8x512xbf16> to vector<8x128xbf16>
    %538 = math.tanh %537 : vector<8x128xbf16>
    %539 = vector.extract_strided_slice %524 {offsets = [0, 384], sizes = [8, 128], strides = [1, 1]} : vector<8x512xbf16> to vector<8x128xbf16>
    %540 = arith.negf %539 : vector<8x128xbf16>
    %541 = math.exp %540 : vector<8x128xbf16>
    %cst_214 = arith.constant 1.000000e+00 : bf16
    %542 = vector.broadcast %cst_214 : bf16 to vector<8x128xbf16>
    %543 = arith.addf %542, %541 : vector<8x128xbf16>
    %544 = arith.divf %542, %543 : vector<8x128xbf16>
    %545 = arith.extf %536 : vector<8x128xbf16> to vector<8x128xf32>
    %546 = arith.mulf %545, %518 : vector<8x128xf32>
    %547 = arith.mulf %530, %538 : vector<8x128xbf16>
    %548 = arith.extf %547 : vector<8x128xbf16> to vector<8x128xf32>
    %549 = arith.addf %546, %548 : vector<8x128xf32>
    %550 = arith.truncf %549 : vector<8x128xf32> to vector<8x128xbf16>
    %551 = math.tanh %550 : vector<8x128xbf16>
    %552 = arith.mulf %544, %551 : vector<8x128xbf16>
    %c0_215 = arith.constant 0 : index
    %c0_216 = arith.constant 0 : index
    %553 = vector.load %arg8[%c0_215, %c0_216] : memref<8x128xf32, #tpu.memory_space<vmem>>, vector<8x128xf32>
    tpu.vector_store %arg8[%c0_215, %c0_216], %549 {strides = array<i32>} : memref<8x128xf32, #tpu.memory_space<vmem>>, vector<8x128xf32>,
    %c0_217 = arith.constant 0 : index
    %c0_218 = arith.constant 0 : index
    %554 = vector.load %arg7[%c0_217, %c0_218] : memref<8x128xbf16, #tpu.memory_space<vmem>>, vector<8x128xbf16>
    tpu.vector_store %arg7[%c0_217, %c0_218], %552 {strides = array<i32>} : memref<8x128xbf16, #tpu.memory_space<vmem>>, vector<8x128xbf16>,
    %555 = arith.index_cast %c12_i32 : i32 to index
    %c0_219 = arith.constant 0 : index
    %c0_220 = arith.constant 0 : index
    %556 = vector.load %arg6[%555, %c0_219, %c0_220] : memref<16x8x128xbf16, #tpu.memory_space<vmem>>, vector<1x8x128xbf16>
    %557 = vector.shape_cast %556 : vector<1x8x128xbf16> to vector<8x128xbf16>
    %558 = vector.shape_cast %552 : vector<8x128xbf16> to vector<1x8x128xbf16>
    tpu.vector_store %arg6[%555, %c0_219, %c0_220], %558 {strides = array<i32>} : memref<16x8x128xbf16, #tpu.memory_space<vmem>>, vector<1x8x128xbf16>,
    %c13_i32 = arith.constant 13 : i32
    %c0_221 = arith.constant 0 : index
    %c0_222 = arith.constant 0 : index
    %559 = vector.load %arg7[%c0_221, %c0_222] : memref<8x128xbf16, #tpu.memory_space<vmem>>, vector<8x128xbf16>
    %c0_223 = arith.constant 0 : index
    %c0_224 = arith.constant 0 : index
    %560 = vector.load %arg8[%c0_223, %c0_224] : memref<8x128xf32, #tpu.memory_space<vmem>>, vector<8x128xf32>
    %561 = arith.index_cast %c13_i32 : i32 to index
    %c0_225 = arith.constant 0 : index
    %c0_226 = arith.constant 0 : index
    %562 = vector.load %arg9[%561, %c0_225, %c0_226] : memref<16x8x512xf32, #tpu.memory_space<vmem>>, vector<1x8x512xf32>
    %563 = vector.shape_cast %562 : vector<1x8x512xf32> to vector<8x512xf32>
    %cst_227 = arith.constant dense<0.000000e+00> : vector<8x512xf32>
    %564 = tpu.matmul %559, %12, %cst_227 {dimension_numbers = #tpu.dot_dimension_numbers<[1], [0], [0], [1], [0, 0, 1, 1], [], []>} : vector<8x128xbf16>, vector<128x512xbf16>, vector<8x512xf32> -> vector<8x512xf32>
    %565 = arith.addf %563, %564 : vector<8x512xf32>
    %566 = arith.truncf %565 : vector<8x512xf32> to vector<8x512xbf16>
    %567 = vector.extract_strided_slice %566 {offsets = [0, 0], sizes = [8, 128], strides = [1, 1]} : vector<8x512xbf16> to vector<8x128xbf16>
    %568 = arith.negf %567 : vector<8x128xbf16>
    %569 = math.exp %568 : vector<8x128xbf16>
    %cst_228 = arith.constant 1.000000e+00 : bf16
    %570 = vector.broadcast %cst_228 : bf16 to vector<8x128xbf16>
    %571 = arith.addf %570, %569 : vector<8x128xbf16>
    %572 = arith.divf %570, %571 : vector<8x128xbf16>
    %573 = vector.extract_strided_slice %566 {offsets = [0, 128], sizes = [8, 128], strides = [1, 1]} : vector<8x512xbf16> to vector<8x128xbf16>
    %574 = arith.negf %573 : vector<8x128xbf16>
    %575 = math.exp %574 : vector<8x128xbf16>
    %cst_229 = arith.constant 1.000000e+00 : bf16
    %576 = vector.broadcast %cst_229 : bf16 to vector<8x128xbf16>
    %577 = arith.addf %576, %575 : vector<8x128xbf16>
    %578 = arith.divf %576, %577 : vector<8x128xbf16>
    %579 = vector.extract_strided_slice %566 {offsets = [0, 256], sizes = [8, 128], strides = [1, 1]} : vector<8x512xbf16> to vector<8x128xbf16>
    %580 = math.tanh %579 : vector<8x128xbf16>
    %581 = vector.extract_strided_slice %566 {offsets = [0, 384], sizes = [8, 128], strides = [1, 1]} : vector<8x512xbf16> to vector<8x128xbf16>
    %582 = arith.negf %581 : vector<8x128xbf16>
    %583 = math.exp %582 : vector<8x128xbf16>
    %cst_230 = arith.constant 1.000000e+00 : bf16
    %584 = vector.broadcast %cst_230 : bf16 to vector<8x128xbf16>
    %585 = arith.addf %584, %583 : vector<8x128xbf16>
    %586 = arith.divf %584, %585 : vector<8x128xbf16>
    %587 = arith.extf %578 : vector<8x128xbf16> to vector<8x128xf32>
    %588 = arith.mulf %587, %560 : vector<8x128xf32>
    %589 = arith.mulf %572, %580 : vector<8x128xbf16>
    %590 = arith.extf %589 : vector<8x128xbf16> to vector<8x128xf32>
    %591 = arith.addf %588, %590 : vector<8x128xf32>
    %592 = arith.truncf %591 : vector<8x128xf32> to vector<8x128xbf16>
    %593 = math.tanh %592 : vector<8x128xbf16>
    %594 = arith.mulf %586, %593 : vector<8x128xbf16>
    %c0_231 = arith.constant 0 : index
    %c0_232 = arith.constant 0 : index
    %595 = vector.load %arg8[%c0_231, %c0_232] : memref<8x128xf32, #tpu.memory_space<vmem>>, vector<8x128xf32>
    tpu.vector_store %arg8[%c0_231, %c0_232], %591 {strides = array<i32>} : memref<8x128xf32, #tpu.memory_space<vmem>>, vector<8x128xf32>,
    %c0_233 = arith.constant 0 : index
    %c0_234 = arith.constant 0 : index
    %596 = vector.load %arg7[%c0_233, %c0_234] : memref<8x128xbf16, #tpu.memory_space<vmem>>, vector<8x128xbf16>
    tpu.vector_store %arg7[%c0_233, %c0_234], %594 {strides = array<i32>} : memref<8x128xbf16, #tpu.memory_space<vmem>>, vector<8x128xbf16>,
    %597 = arith.index_cast %c13_i32 : i32 to index
    %c0_235 = arith.constant 0 : index
    %c0_236 = arith.constant 0 : index
    %598 = vector.load %arg6[%597, %c0_235, %c0_236] : memref<16x8x128xbf16, #tpu.memory_space<vmem>>, vector<1x8x128xbf16>
    %599 = vector.shape_cast %598 : vector<1x8x128xbf16> to vector<8x128xbf16>
    %600 = vector.shape_cast %594 : vector<8x128xbf16> to vector<1x8x128xbf16>
    tpu.vector_store %arg6[%597, %c0_235, %c0_236], %600 {strides = array<i32>} : memref<16x8x128xbf16, #tpu.memory_space<vmem>>, vector<1x8x128xbf16>,
    %c14_i32 = arith.constant 14 : i32
    %c0_237 = arith.constant 0 : index
    %c0_238 = arith.constant 0 : index
    %601 = vector.load %arg7[%c0_237, %c0_238] : memref<8x128xbf16, #tpu.memory_space<vmem>>, vector<8x128xbf16>
    %c0_239 = arith.constant 0 : index
    %c0_240 = arith.constant 0 : index
    %602 = vector.load %arg8[%c0_239, %c0_240] : memref<8x128xf32, #tpu.memory_space<vmem>>, vector<8x128xf32>
    %603 = arith.index_cast %c14_i32 : i32 to index
    %c0_241 = arith.constant 0 : index
    %c0_242 = arith.constant 0 : index
    %604 = vector.load %arg9[%603, %c0_241, %c0_242] : memref<16x8x512xf32, #tpu.memory_space<vmem>>, vector<1x8x512xf32>
    %605 = vector.shape_cast %604 : vector<1x8x512xf32> to vector<8x512xf32>
    %cst_243 = arith.constant dense<0.000000e+00> : vector<8x512xf32>
    %606 = tpu.matmul %601, %12, %cst_243 {dimension_numbers = #tpu.dot_dimension_numbers<[1], [0], [0], [1], [0, 0, 1, 1], [], []>} : vector<8x128xbf16>, vector<128x512xbf16>, vector<8x512xf32> -> vector<8x512xf32>
    %607 = arith.addf %605, %606 : vector<8x512xf32>
    %608 = arith.truncf %607 : vector<8x512xf32> to vector<8x512xbf16>
    %609 = vector.extract_strided_slice %608 {offsets = [0, 0], sizes = [8, 128], strides = [1, 1]} : vector<8x512xbf16> to vector<8x128xbf16>
    %610 = arith.negf %609 : vector<8x128xbf16>
    %611 = math.exp %610 : vector<8x128xbf16>
    %cst_244 = arith.constant 1.000000e+00 : bf16
    %612 = vector.broadcast %cst_244 : bf16 to vector<8x128xbf16>
    %613 = arith.addf %612, %611 : vector<8x128xbf16>
    %614 = arith.divf %612, %613 : vector<8x128xbf16>
    %615 = vector.extract_strided_slice %608 {offsets = [0, 128], sizes = [8, 128], strides = [1, 1]} : vector<8x512xbf16> to vector<8x128xbf16>
    %616 = arith.negf %615 : vector<8x128xbf16>
    %617 = math.exp %616 : vector<8x128xbf16>
    %cst_245 = arith.constant 1.000000e+00 : bf16
    %618 = vector.broadcast %cst_245 : bf16 to vector<8x128xbf16>
    %619 = arith.addf %618, %617 : vector<8x128xbf16>
    %620 = arith.divf %618, %619 : vector<8x128xbf16>
    %621 = vector.extract_strided_slice %608 {offsets = [0, 256], sizes = [8, 128], strides = [1, 1]} : vector<8x512xbf16> to vector<8x128xbf16>
    %622 = math.tanh %621 : vector<8x128xbf16>
    %623 = vector.extract_strided_slice %608 {offsets = [0, 384], sizes = [8, 128], strides = [1, 1]} : vector<8x512xbf16> to vector<8x128xbf16>
    %624 = arith.negf %623 : vector<8x128xbf16>
    %625 = math.exp %624 : vector<8x128xbf16>
    %cst_246 = arith.constant 1.000000e+00 : bf16
    %626 = vector.broadcast %cst_246 : bf16 to vector<8x128xbf16>
    %627 = arith.addf %626, %625 : vector<8x128xbf16>
    %628 = arith.divf %626, %627 : vector<8x128xbf16>
    %629 = arith.extf %620 : vector<8x128xbf16> to vector<8x128xf32>
    %630 = arith.mulf %629, %602 : vector<8x128xf32>
    %631 = arith.mulf %614, %622 : vector<8x128xbf16>
    %632 = arith.extf %631 : vector<8x128xbf16> to vector<8x128xf32>
    %633 = arith.addf %630, %632 : vector<8x128xf32>
    %634 = arith.truncf %633 : vector<8x128xf32> to vector<8x128xbf16>
    %635 = math.tanh %634 : vector<8x128xbf16>
    %636 = arith.mulf %628, %635 : vector<8x128xbf16>
    %c0_247 = arith.constant 0 : index
    %c0_248 = arith.constant 0 : index
    %637 = vector.load %arg8[%c0_247, %c0_248] : memref<8x128xf32, #tpu.memory_space<vmem>>, vector<8x128xf32>
    tpu.vector_store %arg8[%c0_247, %c0_248], %633 {strides = array<i32>} : memref<8x128xf32, #tpu.memory_space<vmem>>, vector<8x128xf32>,
    %c0_249 = arith.constant 0 : index
    %c0_250 = arith.constant 0 : index
    %638 = vector.load %arg7[%c0_249, %c0_250] : memref<8x128xbf16, #tpu.memory_space<vmem>>, vector<8x128xbf16>
    tpu.vector_store %arg7[%c0_249, %c0_250], %636 {strides = array<i32>} : memref<8x128xbf16, #tpu.memory_space<vmem>>, vector<8x128xbf16>,
    %639 = arith.index_cast %c14_i32 : i32 to index
    %c0_251 = arith.constant 0 : index
    %c0_252 = arith.constant 0 : index
    %640 = vector.load %arg6[%639, %c0_251, %c0_252] : memref<16x8x128xbf16, #tpu.memory_space<vmem>>, vector<1x8x128xbf16>
    %641 = vector.shape_cast %640 : vector<1x8x128xbf16> to vector<8x128xbf16>
    %642 = vector.shape_cast %636 : vector<8x128xbf16> to vector<1x8x128xbf16>
    tpu.vector_store %arg6[%639, %c0_251, %c0_252], %642 {strides = array<i32>} : memref<16x8x128xbf16, #tpu.memory_space<vmem>>, vector<1x8x128xbf16>,
    %c15_i32 = arith.constant 15 : i32
    %c0_253 = arith.constant 0 : index
    %c0_254 = arith.constant 0 : index
    %643 = vector.load %arg7[%c0_253, %c0_254] : memref<8x128xbf16, #tpu.memory_space<vmem>>, vector<8x128xbf16>
    %c0_255 = arith.constant 0 : index
    %c0_256 = arith.constant 0 : index
    %644 = vector.load %arg8[%c0_255, %c0_256] : memref<8x128xf32, #tpu.memory_space<vmem>>, vector<8x128xf32>
    %645 = arith.index_cast %c15_i32 : i32 to index
    %c0_257 = arith.constant 0 : index
    %c0_258 = arith.constant 0 : index
    %646 = vector.load %arg9[%645, %c0_257, %c0_258] : memref<16x8x512xf32, #tpu.memory_space<vmem>>, vector<1x8x512xf32>
    %647 = vector.shape_cast %646 : vector<1x8x512xf32> to vector<8x512xf32>
    %cst_259 = arith.constant dense<0.000000e+00> : vector<8x512xf32>
    %648 = tpu.matmul %643, %12, %cst_259 {dimension_numbers = #tpu.dot_dimension_numbers<[1], [0], [0], [1], [0, 0, 1, 1], [], []>} : vector<8x128xbf16>, vector<128x512xbf16>, vector<8x512xf32> -> vector<8x512xf32>
    %649 = arith.addf %647, %648 : vector<8x512xf32>
    %650 = arith.truncf %649 : vector<8x512xf32> to vector<8x512xbf16>
    %651 = vector.extract_strided_slice %650 {offsets = [0, 0], sizes = [8, 128], strides = [1, 1]} : vector<8x512xbf16> to vector<8x128xbf16>
    %652 = arith.negf %651 : vector<8x128xbf16>
    %653 = math.exp %652 : vector<8x128xbf16>
    %cst_260 = arith.constant 1.000000e+00 : bf16
    %654 = vector.broadcast %cst_260 : bf16 to vector<8x128xbf16>
    %655 = arith.addf %654, %653 : vector<8x128xbf16>
    %656 = arith.divf %654, %655 : vector<8x128xbf16>
    %657 = vector.extract_strided_slice %650 {offsets = [0, 128], sizes = [8, 128], strides = [1, 1]} : vector<8x512xbf16> to vector<8x128xbf16>
    %658 = arith.negf %657 : vector<8x128xbf16>
    %659 = math.exp %658 : vector<8x128xbf16>
    %cst_261 = arith.constant 1.000000e+00 : bf16
    %660 = vector.broadcast %cst_261 : bf16 to vector<8x128xbf16>
    %661 = arith.addf %660, %659 : vector<8x128xbf16>
    %662 = arith.divf %660, %661 : vector<8x128xbf16>
    %663 = vector.extract_strided_slice %650 {offsets = [0, 256], sizes = [8, 128], strides = [1, 1]} : vector<8x512xbf16> to vector<8x128xbf16>
    %664 = math.tanh %663 : vector<8x128xbf16>
    %665 = vector.extract_strided_slice %650 {offsets = [0, 384], sizes = [8, 128], strides = [1, 1]} : vector<8x512xbf16> to vector<8x128xbf16>
    %666 = arith.negf %665 : vector<8x128xbf16>
    %667 = math.exp %666 : vector<8x128xbf16>
    %cst_262 = arith.constant 1.000000e+00 : bf16
    %668 = vector.broadcast %cst_262 : bf16 to vector<8x128xbf16>
    %669 = arith.addf %668, %667 : vector<8x128xbf16>
    %670 = arith.divf %668, %669 : vector<8x128xbf16>
    %671 = arith.extf %662 : vector<8x128xbf16> to vector<8x128xf32>
    %672 = arith.mulf %671, %644 : vector<8x128xf32>
    %673 = arith.mulf %656, %664 : vector<8x128xbf16>
    %674 = arith.extf %673 : vector<8x128xbf16> to vector<8x128xf32>
    %675 = arith.addf %672, %674 : vector<8x128xf32>
    %676 = arith.truncf %675 : vector<8x128xf32> to vector<8x128xbf16>
    %677 = math.tanh %676 : vector<8x128xbf16>
    %678 = arith.mulf %670, %677 : vector<8x128xbf16>
    %c0_263 = arith.constant 0 : index
    %c0_264 = arith.constant 0 : index
    %679 = vector.load %arg8[%c0_263, %c0_264] : memref<8x128xf32, #tpu.memory_space<vmem>>, vector<8x128xf32>
    tpu.vector_store %arg8[%c0_263, %c0_264], %675 {strides = array<i32>} : memref<8x128xf32, #tpu.memory_space<vmem>>, vector<8x128xf32>,
    %c0_265 = arith.constant 0 : index
    %c0_266 = arith.constant 0 : index
    %680 = vector.load %arg7[%c0_265, %c0_266] : memref<8x128xbf16, #tpu.memory_space<vmem>>, vector<8x128xbf16>
    tpu.vector_store %arg7[%c0_265, %c0_266], %678 {strides = array<i32>} : memref<8x128xbf16, #tpu.memory_space<vmem>>, vector<8x128xbf16>,
    %681 = arith.index_cast %c15_i32 : i32 to index
    %c0_267 = arith.constant 0 : index
    %c0_268 = arith.constant 0 : index
    %682 = vector.load %arg6[%681, %c0_267, %c0_268] : memref<16x8x128xbf16, #tpu.memory_space<vmem>>, vector<1x8x128xbf16>
    %683 = vector.shape_cast %682 : vector<1x8x128xbf16> to vector<8x128xbf16>
    %684 = vector.shape_cast %678 : vector<8x128xbf16> to vector<1x8x128xbf16>
    tpu.vector_store %arg6[%681, %c0_267, %c0_268], %684 {strides = array<i32>} : memref<16x8x128xbf16, #tpu.memory_space<vmem>>, vector<1x8x128xbf16>,
    %c16_i32 = arith.constant 16 : i32
    return
  }
  func.func @transform_0(%arg0: i32, %arg1: i32) -> (i32, i32, i32) {
    %c0_i32 = arith.constant 0 : i32
    %c0_i32_0 = arith.constant 0 : i32
    return %arg1, %arg0, %c0_i32 : i32, i32, i32
  }
  func.func @transform_1(%arg0: i32, %arg1: i32) -> (i32, i32) {
    %c0_i32 = arith.constant 0 : i32
    %c0_i32_0 = arith.constant 0 : i32
    %c0_i32_1 = arith.constant 0 : i32
    return %c0_i32, %c0_i32_0 : i32, i32
  }
  func.func @transform_2(%arg0: i32, %arg1: i32) -> (i32, i32) {
    %c0_i32 = arith.constant 0 : i32
    %c0_i32_0 = arith.constant 0 : i32
    %c0_i32_1 = arith.constant 0 : i32
    return %c0_i32, %c0_i32_0 : i32, i32
  }
  func.func @transform_3(%arg0: i32, %arg1: i32) -> (i32, i32) {
    %c0_i32 = arith.constant 0 : i32
    %c0_i32_0 = arith.constant 0 : i32
    %c0_i32_1 = arith.constant 0 : i32
    return %c0_i32, %c0_i32_0 : i32, i32
  }
  func.func @transform_4(%arg0: i32, %arg1: i32) -> (i32, i32, i32) {
    %c0_i32 = arith.constant 0 : i32
    %c0_i32_0 = arith.constant 0 : i32
    return %arg1, %arg0, %c0_i32 : i32, i32, i32
  }
}

</mosaic_0001>

<bundles_post_ra>
// kernel: rnn_forward.5
= control target key start
LH: loop header
LB: loop body
LE: loop exit
PB: predicated region body
PF: predicated region fallthrough
CT: control target
= control target key end

     0   :  { %s710_s12 = smov 0   ;;  %s712_s13 = smov 0   ;;  %s803_s0 = inlined_call_operand.vmem [shape: bf16[16,1024], index: 0, kind: input, shape index: {}]   ;;  %s804_s1 = inlined_call_operand.vmem [shape: bf16[128,128], index: 1, kind: input, shape index: {}]   ;;  %s805_s2 = inlined_call_operand.vmem [shape: f32[1,128], index: 2, kind: input, shape index: {}]   ;;  %s806_s3 = inlined_call_operand.vmem [shape: f32[8,16,128], index: 3, kind: output, shape index: {}]  }
   0x1   :  { %s714_s14 = smov 0   ;;  %s716_s15 = smov 0  }
   0x2   :  { %s718_s16 = smov 0  }
   0x3 LB: > { %s32_s17 = sadd.s32 1, %s682_s15  ;;  %p48_p1 = scmp.ne.s32.totalorder %s674_s13, %s670_s12  ;;  %s686_s16 = sphi %s718_s16, %s13_s16   ;;  %s682_s15 = sphi %s716_s15, %s810_s15   ;;  %s678_s14 = sphi %s714_s14, %s809_s14   ;;  %s674_s13 = sphi %s712_s13, %s808_s13   ;;  %s670_s12 = sphi %s710_s12, %s807_s12  }
   0x4   : > { %p34_p0 = scmp.ge.s32.totalorder %s32_s17, 8  ;;  %p49_p2 = scmp.eq.s32.totalorder %s686_s16, 0 }
   0x5   : > { %s41_s19 = sadd.s32 1, %s674_s13  ;;  %p548_p5 = scmp.ge.s32.totalorder %s686_s16, 8 }
   0x6   : > { %s812_s17 = smov (%p34_p0, %s32_s17), 0  ;;  %p50_p3 = por %p49_p2, %p48_p1 }
   0x7   : > { %s37_s18 = ssub.s32 %s682_s15, %s812_s17  ;;  %169 = sbr.rel (%p548_p5) target bundleno = 21 (0x15), region = 24 }
   0x8   : > { %p39_p4 = scmp.eq.s32.totalorder %s37_s18, 0 }
   0xa   : > { %s745_s20 = scalar_select %p39_p4, %s674_s13, %s41_s19  }
   0xe   : > { %172 = sbr.rel (!%p50_p3) target bundleno = 21 (0x15), region = 28  ;;  %s174_s21 = sand.u32 (%p50_p3), 1, %s674_s13  }
   0xf   : > { %s550_s22 = sshll.u32 (%p50_p3), %s682_s15, 2  ;;  %s549_s23 = sshll.u32 (%p50_p3), %s174_s21, 3 }
  0x10   : > { %s181_s26 = scalar_lea.vmem (%p50_p3), %s803_s0, %s550_s22  ;;  %s176_s27 = scalar_lea.vmem (%p50_p3), [#allocation2], %s549_s23 }
  0x11   : > { %v197_v0 = vld [vmem:[%s181_s26] sm:$0xf] (%p50_p3) }
  0x12   : > { %v199_v1 = vld [vmem:[%s181_s26 + $0x20] sm:$0xf] (%p50_p3)  ;;  %198 = vst [vmem:[%s176_s27] sm:$0xf] (%p50_p3), %v197_v0 }
  0x13   : > { %200 = vst [vmem:[%s176_s27 + $0x4] sm:$0xf] (%p50_p3), %v199_v1 }
  0x15 PF: > { %p551_p6 = scmp.ge.s32.totalorder %s686_s16, 1  ;;  %p226_p7 = scmp.lt.s32.totalorder %s686_s16, 9 }
  0x17   : > { %p227_p8 = pnand %p551_p6, %p226_p7 }
  0x18   : > { %v639_v2 = vld [vmem:[%s804_s1] sm:$0xff] (!%p227_p8)   ;;  %v688_v3 = vmov (!%p227_p8), 0.0   ;;  %v640_v4 = vld [vmem:[%s804_s1 + $0x8] sm:$0xff] (!%p227_p8)   ;;  %vm689_vm0 = vmmov (!%p227_p8), 0   ;;  %s233_s5 = sand.u32 (!%p227_p8), 1, %s670_s12   ;;  %v641_v5 = vld [vmem:[%s804_s1 + $0x10] sm:$0xff] (!%p227_p8)  }
  0x19   : > { %230 = sbr.rel (%p227_p8) target bundleno = 274 (0x112), region = 69  ;;  %577 = vmatprep.subr.bf16.mxu0 (!%p227_p8), %v688_v3  ;;  %593 = vmatprep.mubr.msk.bf16.mxu0 (!%p227_p8), %vm689_vm0, %v688_v3  ;;  %s552_s6 = sshll.u32 (!%p227_p8), %s233_s5, 3  ;;  %v642_v6 = vld [vmem:[%s804_s1 + $0x18] sm:$0xff] (!%p227_p8)   ;;  %v643_v7 = vld [vmem:[%s804_s1 + $0x20] sm:$0xff] (!%p227_p8)   ;;  %v644_v8 = vld [vmem:[%s804_s1 + $0x28] sm:$0xff] (!%p227_p8)  }
  0x1a   : > { %578 = vmatpush3.bf16.msra.mxu0 (!%p227_p8), %v639_v2  ;;  %s235_s9 = scalar_lea.vmem (!%p227_p8), [#allocation2], %s552_s6  ;;  %v645_v9 = vld [vmem:[%s804_s1 + $0x30] sm:$0xff] (!%p227_p8)   ;;  %v646_v10 = vld [vmem:[%s804_s1 + $0x38] sm:$0xff] (!%p227_p8)   ;;  %p279_p9 = scmp.lt.s32.totalorder (!%p227_p8), %s678_s14, 7  ;;  %v555_v12 = vld [vmem:[%s805_s2] ss:$0 sm:$0xff] (!%p227_p8) }
  0x1b   : > { %579 = vmatprep.subr.bf16.mxu0 (!%p227_p8), %v688_v3  ;;  %v647_v11 = vld [vmem:[%s235_s9] sm:$0xff] (!%p227_p8)  }
  0x1e   : > { %580 = vmatpush3.bf16.msra.mxu0 (!%p227_p8), %v640_v4 }
  0x1f   : > { %581 = vmatprep.subr.bf16.mxu0 (!%p227_p8), %v688_v3 }
  0x20   : > { %s814_s14 = smov (!%p279_p9, %s678_s14), 7 }
  0x21   : > { %s567_s26 = sshll.u32 %s814_s14, 4 }
  0x22   : > { %582 = vmatpush3.bf16.msra.mxu0 %v641_v5  ;;  %s289_s4 = scalar_lea.vmem %s806_s3, %s567_s26 }
  0x23   : > { %583 = vmatprep.subr.bf16.mxu0 %v688_v3 }
  0x26   : > { %584 = vmatpush3.bf16.msra.mxu0 %v642_v6 }
  0x27   : > { %585 = vmatprep.subr.bf16.mxu0 %v688_v3 }
  0x2a   : > { %586 = vmatpush3.bf16.msra.mxu0 %v643_v7 }
  0x2b   : > { %587 = vmatprep.subr.bf16.mxu0 %v688_v3 }
  0x2e   : > { %588 = vmatpush3.bf16.msra.mxu0 %v644_v8 }
  0x2f   : > { %589 = vmatprep.subr.bf16.mxu0 %v688_v3 }
  0x32   : > { %590 = vmatpush3.bf16.msra.mxu0 %v645_v9 }
  0x33   : > { %591 = vmatprep.subr.bf16.mxu0 %v688_v3 }
  0x36   : > { %592 = vmatpush3.bf16.msra.mxu0 %v646_v10 }
  0x39   : > { %594 = vmatmul.mubr.bf16.vlgmr.msra.gmra.mrb[0].mxu0 %v647_v11 }
 0x10c   : > { %v405_v13 = vpop.f32.mrb[0].mxu0 }
 0x10d   : > { %v406_v14 = vadd.f32 %v555_v12, %v405_v13  ;;  %v595_v15 = vpop.f32.mrb[1].mxu0 }
 0x10e   : > { %v408_v16 = vpop.f32.mrb[2].mxu0 }
 0x10f   : > { %412 = vst [vmem:[%s289_s4] sm:$0xff] %v406_v14  ;;  %v409_v17 = vadd.f32 %v555_v12, %v408_v16  ;;  %v596_v18 = vpop.f32.mrb[3].mxu0 }
 0x111   : > { %413 = vst [vmem:[%s289_s4 + $0x8] sm:$0xff] %v409_v17 }
 0x112 PF: > { %s13_s16 = sadd.s32 1, %s686_s16   ;;  %s807_s12 = smov %s674_s13 }
 0x113   : > { %p10_p10 = scmp.ge.s32.totalorder %s13_s16, 10   ;;  %s808_s13 = smov %s745_s20 }
 0x114   : > { %s809_s14 = smov %s682_s15  ;;  %s810_s15 = smov %s812_s17 }
 0x115   :  { %12 = sbr.rel (!%p10_p10) target bundleno = 3 (0x3), region = 114 }

// kernel: rnn_forward.3
= control target key start
LH: loop header
LB: loop body
LE: loop exit
PB: predicated region body
PF: predicated region fallthrough
CT: control target
= control target key end

     0   :  { %v5020_v1 = vmov 0   ;;  %s5015_s1 = inlined_call_operand.vmem [shape: bf16[128,512], index: 1, kind: input, shape index: {}]   ;;  %s5016_s0 = inlined_call_operand.vmem [shape: bf16[16,8,128], index: 0, kind: input, shape index: {}]   ;;  %s5017_s2 = inlined_call_operand.vmem [shape: bf16[128,512], index: 2, kind: input, shape index: {}]   ;;  %s5018_s3 = inlined_call_operand.vmem [shape: f32[1,512], index: 3, kind: input, shape index: {}]   ;;  %s5019_s4 = inlined_call_operand.vmem [shape: bf16[16,8,128], index: 4, kind: output, shape index: {}]  }
   0x1   :  { %v3019_v0 = vld [vmem:[%s5015_s1 + $0x4] ss:$16 sps:$4 sm:$0xff]   ;;  %335 = vmatprep.mubr.bf16.mxu0 %v5020_v1  ;;  %23 = vst [vmem:[#allocation2] sm:$0xf] %v5020_v1  ;;  %448 = vmatprep.mubr.bf16.mxu1 %v5020_v1  ;;  %v3021_v2 = vld [vmem:[%s5015_s1 + $0xc] ss:$16 sps:$4 sm:$0xff]  }
   0x2   :  { %303 = vmatprep.subr.bf16.mxu0 %v3019_v0  ;;  %v3023_v3 = vld [vmem:[%s5015_s1] ss:$16 sps:$4 sm:$0xff]   ;;  %v3024_v4 = vld [vmem:[%s5015_s1 + $0x8] ss:$16 sps:$4 sm:$0xff]   ;;  %416 = vmatprep.subr.bf16.mxu1 %v3021_v2  ;;  %v3025_v5 = vld [vmem:[%s5015_s1 + $0x24] ss:$16 sps:$4 sm:$0xff]  }
   0x3   :  { %304 = vmatpush1.bf16.msra.mxu0 %v3023_v3  ;;  %417 = vmatpush1.bf16.msra.mxu1 %v3024_v4  ;;  %v3027_v6 = vld [vmem:[%s5015_s1 + $0x2c] ss:$16 sps:$4 sm:$0xff]   ;;  %v3029_v7 = vld [vmem:[%s5015_s1 + $0x20] ss:$16 sps:$4 sm:$0xff]   ;;  %v3030_v8 = vld [vmem:[%s5015_s1 + $0x28] ss:$16 sps:$4 sm:$0xff]  }
   0x4   :  { %305 = vmatprep.subr.bf16.mxu0 %v3025_v5  ;;  %418 = vmatprep.subr.bf16.mxu1 %v3027_v6  ;;  %v3031_v9 = vld [vmem:[%s5015_s1 + $0x44] ss:$16 sps:$4 sm:$0xff]   ;;  %v3033_v10 = vld [vmem:[%s5015_s1 + $0x4c] ss:$16 sps:$4 sm:$0xff]   ;;  %v3035_v11 = vld [vmem:[%s5015_s1 + $0x40] ss:$16 sps:$4 sm:$0xff]  }
   0x5   :  { %v3036_v12 = vld [vmem:[%s5015_s1 + $0x48] ss:$16 sps:$4 sm:$0xff]   ;;  %v3037_v13 = vld [vmem:[%s5015_s1 + $0x64] ss:$16 sps:$4 sm:$0xff]   ;;  %v3039_v14 = vld [vmem:[%s5015_s1 + $0x6c] ss:$16 sps:$4 sm:$0xff]  }
   0x6   :  { %v3041_v15 = vld [vmem:[%s5015_s1 + $0x60] ss:$16 sps:$4 sm:$0xff]   ;;  %v3042_v16 = vld [vmem:[%s5015_s1 + $0x68] ss:$16 sps:$4 sm:$0xff]   ;;  %v3043_v17 = vld [vmem:[%s5015_s1 + $0x84] ss:$16 sps:$4 sm:$0xff]  }
   0x7   :  { %306 = vmatpush1.bf16.msra.mxu0 %v3029_v7  ;;  %419 = vmatpush1.bf16.msra.mxu1 %v3030_v8  ;;  %v3045_v18 = vld [vmem:[%s5015_s1 + $0x8c] ss:$16 sps:$4 sm:$0xff]   ;;  %v3047_v19 = vld [vmem:[%s5015_s1 + $0x80] ss:$16 sps:$4 sm:$0xff]   ;;  %v3048_v20 = vld [vmem:[%s5015_s1 + $0x88] ss:$16 sps:$4 sm:$0xff]  }
   0x8   :  { %307 = vmatprep.subr.bf16.mxu0 %v3031_v9  ;;  %420 = vmatprep.subr.bf16.mxu1 %v3033_v10  ;;  %v3049_v21 = vld [vmem:[%s5015_s1 + $0xa4] ss:$16 sps:$4 sm:$0xff]   ;;  %v3051_v22 = vld [vmem:[%s5015_s1 + $0xac] ss:$16 sps:$4 sm:$0xff]   ;;  %v3053_v23 = vld [vmem:[%s5015_s1 + $0xa0] ss:$16 sps:$4 sm:$0xff]  }
   0x9   :  { %v3054_v24 = vld [vmem:[%s5015_s1 + $0xa8] ss:$16 sps:$4 sm:$0xff]   ;;  %v3055_v25 = vld [vmem:[%s5015_s1 + $0xc4] ss:$16 sps:$4 sm:$0xff]   ;;  %v3057_v26 = vld [vmem:[%s5015_s1 + $0xcc] ss:$16 sps:$4 sm:$0xff]  }
   0xa   :  { %v3059_v27 = vld [vmem:[%s5015_s1 + $0xc0] ss:$16 sps:$4 sm:$0xff]   ;;  %v3060_v28 = vld [vmem:[%s5015_s1 + $0xc8] ss:$16 sps:$4 sm:$0xff]   ;;  %v3061_v29 = vld [vmem:[%s5015_s1 + $0xe4] ss:$16 sps:$4 sm:$0xff]  }
   0xb   :  { %308 = vmatpush1.bf16.msra.mxu0 %v3035_v11  ;;  %421 = vmatpush1.bf16.msra.mxu1 %v3036_v12  ;;  %v3063_v30 = vld [vmem:[%s5015_s1 + $0xec] ss:$16 sps:$4 sm:$0xff]   ;;  %v3065_v31 = vld [vmem:[%s5015_s1 + $0xe0] ss:$16 sps:$4 sm:$0xff]   ;;  %v3066_v32 = vld [vmem:[%s5015_s1 + $0xe8] ss:$16 sps:$4 sm:$0xff]   ;;  %v75_v11 = vlaneseq }
   0xc   :  { %309 = vmatprep.subr.bf16.mxu0 %v3037_v13  ;;  %422 = vmatprep.subr.bf16.mxu1 %v3039_v14  ;;  %v3571_v33 = vld [vmem:[%s5017_s2 + $0x4] ss:$16 sps:$4 sm:$0xff]   ;;  %v3576_v34 = vld [vmem:[%s5017_s2 + $0xc] ss:$16 sps:$4 sm:$0xff]   ;;  %v3584_v36 = vld [vmem:[%s5017_s2] ss:$16 sps:$4 sm:$0xff]  }
   0xd   :  { %v3067_v35 = vld [vmem:[%s5016_s0] sm:$0xff]   ;;  %v3596_v38 = vld [vmem:[%s5017_s2 + $0x8] ss:$16 sps:$4 sm:$0xff]   ;;  %v3601_v39 = vld [vmem:[%s5017_s2 + $0x2c] ss:$16 sps:$4 sm:$0xff]   ;;  %v76_v12 = vshrl.u32 %v75_v11, 7 }
   0xe   :  { %v3590_v37 = vld [vmem:[%s5017_s2 + $0x24] ss:$16 sps:$4 sm:$0xff]   ;;  %v3608_v40 = vld [vmem:[%s5017_s2 + $0x20] ss:$16 sps:$4 sm:$0xff]   ;;  %v3621_v42 = vld [vmem:[%s5017_s2 + $0x28] ss:$16 sps:$4 sm:$0xff]  }
   0xf   :  { %310 = vmatpush1.bf16.msra.mxu0 %v3041_v15  ;;  %423 = vmatpush1.bf16.msra.mxu1 %v3042_v16  ;;  %v3615_v41 = vld [vmem:[%s5017_s2 + $0x44] ss:$16 sps:$4 sm:$0xff]   ;;  %v3071_v43 = vld [vmem:[%s5016_s0 + $0x8] sm:$0xff]   ;;  %v3631_v44 = vld [vmem:[%s5017_s2 + $0x40] ss:$16 sps:$4 sm:$0xff]   ;;  %v85_v13 = vsub.s32 2, %v76_v12 }
  0x10   :  { %311 = vmatprep.subr.bf16.mxu0 %v3043_v17  ;;  %424 = vmatprep.subr.bf16.mxu1 %v3045_v18  ;;  %v3636_v45 = vld [vmem:[%s5017_s2 + $0x64] ss:$16 sps:$4 sm:$0xff]   ;;  %v3642_v46 = vld [vmem:[%s5017_s2 + $0x4c] ss:$16 sps:$4 sm:$0xff]   ;;  %v3648_v47 = vld [vmem:[%s5017_s2 + $0x48] ss:$16 sps:$4 sm:$0xff]  }
  0x11   :  { %v3653_v48 = vld [vmem:[%s5017_s2 + $0x6c] ss:$16 sps:$4 sm:$0xff]   ;;  %v3661_v49 = vld [vmem:[%s5017_s2 + $0x60] ss:$16 sps:$4 sm:$0xff]   ;;  %v3666_v50 = vld [vmem:[%s5017_s2 + $0x84] ss:$16 sps:$4 sm:$0xff]  }
  0x12   :  { %v3674_v51 = vld [vmem:[%s5017_s2 + $0x68] ss:$16 sps:$4 sm:$0xff]   ;;  %v3075_v52 = vld [vmem:[%s5016_s0 + $0x10] sm:$0xff]   ;;  %v3689_v54 = vld [vmem:[%s5017_s2 + $0x8c] ss:$16 sps:$4 sm:$0xff]   ;;  %v89_v14 = vsub.s32 3, %v76_v12 }
  0x13   :  { %312 = vmatpush1.bf16.msra.mxu0 %v3047_v19  ;;  %425 = vmatpush1.bf16.msra.mxu1 %v3048_v20  ;;  %v3683_v53 = vld [vmem:[%s5017_s2 + $0x80] ss:$16 sps:$4 sm:$0xff]   ;;  %v3695_v55 = vld [vmem:[%s5017_s2 + $0xa4] ss:$16 sps:$4 sm:$0xff]   ;;  %v3701_v56 = vld [vmem:[%s5017_s2 + $0x88] ss:$16 sps:$4 sm:$0xff]  }
  0x14   :  { %313 = vmatprep.subr.bf16.mxu0 %v3049_v21  ;;  %426 = vmatprep.subr.bf16.mxu1 %v3051_v22  ;;  %v3706_v57 = vld [vmem:[%s5017_s2 + $0xac] ss:$16 sps:$4 sm:$0xff]   ;;  %v3714_v58 = vld [vmem:[%s5017_s2 + $0xa0] ss:$16 sps:$4 sm:$0xff]   ;;  %v3721_v59 = vld [vmem:[%s5017_s2 + $0xc4] ss:$16 sps:$4 sm:$0xff]  }
  0x15   :  { %v3727_v60 = vld [vmem:[%s5017_s2 + $0xa8] ss:$16 sps:$4 sm:$0xff]   ;;  %v3737_v62 = vld [vmem:[%s5017_s2 + $0xc0] ss:$16 sps:$4 sm:$0xff]   ;;  %v3742_v63 = vld [vmem:[%s5017_s2 + $0xcc] ss:$16 sps:$4 sm:$0xff]  }
  0x16   :  { %v3082_v61 = vld [vmem:[%s5016_s0 + $0x18] sm:$0xff]   ;;  %v3749_v0 = vld [vmem:[%s5017_s2 + $0xe4] ss:$16 sps:$4 sm:$0xff]   ;;  %v3768_v4 = vld [vmem:[%s5017_s2 + $0xe0] ss:$16 sps:$4 sm:$0xff]   ;;  %v77_v15 = vsub.s32 0, %v76_v12 }
  0x17   :  { %314 = vmatpush1.bf16.msra.mxu0 %v3053_v23  ;;  %427 = vmatpush1.bf16.msra.mxu1 %v3054_v24  ;;  %v3754_v2 = vld [vmem:[%s5017_s2 + $0xc8] ss:$16 sps:$4 sm:$0xff]   ;;  %v3759_v3 = vld [vmem:[%s5017_s2 + $0xec] ss:$16 sps:$4 sm:$0xff]   ;;  %v3089_v6 = vld [vmem:[%s5016_s0 + $0x20] sm:$0xff]   ;;  %v81_v17 = vsub.s32 1, %v76_v12 }
  0x18   :  { %315 = vmatprep.subr.bf16.mxu0 %v3055_v25  ;;  %428 = vmatprep.subr.bf16.mxu1 %v3057_v26  ;;  %v3775_v5 = vld [vmem:[%s5017_s2 + $0xe8] ss:$16 sps:$4 sm:$0xff]   ;;  %v3103_v8 = vld [vmem:[%s5016_s0 + $0x30] sm:$0xff]   ;;  %v625_v10 = vld [vmem:[#allocation2] sm:$0xf] }
  0x19   :  { %v3096_v7 = vld [vmem:[%s5016_s0 + $0x28] sm:$0xff]   ;;  %v3113_v9 = vld [vmem:[%s5016_s0 + $0x38] sm:$0xff]   ;;  %v73_v16 = vld [vmem:[%s5018_s3] sm:$0xf] }
  0x1a   :  { %v3839_v18 = vrot.slane %v73_v16, %v85_v13  ;;  %v3845_v21 = vrot.slane %v73_v16, %v89_v14  ;;  %v3847_v22 = vrot.slane %v73_v16, %v77_v15  ;;  %v3853_v25 = vrot.slane %v73_v16, %v81_v17 }
  0x1b   :  { %316 = vmatpush1.bf16.msra.mxu0 %v3059_v27  ;;  %429 = vmatpush1.bf16.msra.mxu1 %v3060_v28 }
  0x1c   :  { %317 = vmatprep.subr.bf16.mxu0 %v3061_v29  ;;  %430 = vmatprep.subr.bf16.mxu1 %v3063_v30 }
  0x1f   :  { %318 = vmatpush1.bf16.msra.mxu0 %v3065_v31  ;;  %431 = vmatpush1.bf16.msra.mxu1 %v3066_v32 }
  0x20   :  { %791 = vmatprep.subr.bf16.mxu0 %v3571_v33  ;;  %832 = vmatprep.subr.bf16.mxu1 %v3576_v34 }
  0x22   :  { %336 = vmatmul.mubr.bf16.vlgmr.msra.gmra.mrb[0].mxu0 %v3067_v35  ;;  %449 = vmatmul.mubr.bf16.vlgmr.msra.gmra.mrb[0].mxu1 %v3067_v35 }
  0x23   :  { %792 = vmatpush1.bf16.msra.mxu0 %v3584_v36  ;;  %345 = vmatprep.mubr.bf16.mxu0 %v5020_v1 }
  0x24   :  { %458 = vmatprep.mubr.bf16.mxu1 %v5020_v1  ;;  %793 = vmatprep.subr.bf16.mxu0 %v3590_v37 }
  0x25   :  { %833 = vmatpush1.bf16.msra.mxu1 %v3596_v38 }
  0x26   :  { %834 = vmatprep.subr.bf16.mxu1 %v3601_v39 }
  0x27   :  { %794 = vmatpush1.bf16.msra.mxu0 %v3608_v40 }
  0x28   :  { %795 = vmatprep.subr.bf16.mxu0 %v3615_v41 }
  0x29   :  { %835 = vmatpush1.bf16.msra.mxu1 %v3621_v42 }
  0x2a   :  { %346 = vmatmul.mubr.bf16.gmra.mrb[4].mxu0 %v3071_v43  ;;  %459 = vmatmul.mubr.bf16.gmra.mrb[4].mxu1 %v3071_v43 }
  0x2b   :  { %355 = vmatprep.mubr.bf16.mxu0 %v5020_v1  ;;  %468 = vmatprep.mubr.bf16.mxu1 %v5020_v1 }
  0x2c   :  { %796 = vmatpush1.bf16.msra.mxu0 %v3631_v44  ;;  %836 = vmatprep.subr.bf16.mxu1 %v3642_v46 }
  0x2d   :  { %797 = vmatprep.subr.bf16.mxu0 %v3636_v45  ;;  %837 = vmatpush1.bf16.msra.mxu1 %v3648_v47 }
  0x2e   :  { %838 = vmatprep.subr.bf16.mxu1 %v3653_v48 }
  0x30   :  { %798 = vmatpush1.bf16.msra.mxu0 %v3661_v49 }
  0x31   :  { %799 = vmatprep.subr.bf16.mxu0 %v3666_v50  ;;  %839 = vmatpush1.bf16.msra.mxu1 %v3674_v51 }
  0x32   :  { %356 = vmatmul.mubr.bf16.gmra.mrb[8].mxu0 %v3075_v52  ;;  %469 = vmatmul.mubr.bf16.gmra.mrb[8].mxu1 %v3075_v52 }
  0x33   :  { %365 = vmatprep.mubr.bf16.mxu0 %v5020_v1  ;;  %478 = vmatprep.mubr.bf16.mxu1 %v5020_v1 }
  0x34   :  { %800 = vmatpush1.bf16.msra.mxu0 %v3683_v53  ;;  %840 = vmatprep.subr.bf16.mxu1 %v3689_v54 }
  0x35   :  { %801 = vmatprep.subr.bf16.mxu0 %v3695_v55  ;;  %841 = vmatpush1.bf16.msra.mxu1 %v3701_v56 }
  0x36   :  { %842 = vmatprep.subr.bf16.mxu1 %v3706_v57 }
  0x38   :  { %802 = vmatpush1.bf16.msra.mxu0 %v3714_v58 }
  0x39   :  { %803 = vmatprep.subr.bf16.mxu0 %v3721_v59  ;;  %843 = vmatpush1.bf16.msra.mxu1 %v3727_v60 }
  0x3a   :  { %366 = vmatmul.mubr.bf16.gmra.mrb[12].mxu0 %v3082_v61  ;;  %479 = vmatmul.mubr.bf16.gmra.mrb[12].mxu1 %v3082_v61 }
  0x3b   :  { %375 = vmatprep.mubr.bf16.mxu0 %v5020_v1  ;;  %488 = vmatprep.mubr.bf16.mxu1 %v5020_v1 }
  0x3c   :  { %804 = vmatpush1.bf16.msra.mxu0 %v3737_v62  ;;  %844 = vmatprep.subr.bf16.mxu1 %v3742_v63 }
  0x3d   :  { %805 = vmatprep.subr.bf16.mxu0 %v3749_v0  ;;  %845 = vmatpush1.bf16.msra.mxu1 %v3754_v2 }
  0x3e   :  { %846 = vmatprep.subr.bf16.mxu1 %v3759_v3 }
  0x40   :  { %806 = vmatpush1.bf16.msra.mxu0 %v3768_v4 }
  0x41   :  { %847 = vmatpush1.bf16.msra.mxu1 %v3775_v5  ;;  %921 = vmatprep.subr.bf16.mxu0 %v3571_v33 }
  0x42   :  { %376 = vmatmul.mubr.bf16.gmra.mrb[16].mxu0 %v3089_v6  ;;  %489 = vmatmul.mubr.bf16.gmra.mrb[16].mxu1 %v3089_v6 }
  0x43   :  { %385 = vmatprep.mubr.bf16.mxu0 %v5020_v1  ;;  %498 = vmatprep.mubr.bf16.mxu1 %v5020_v1 }
  0x44   :  { %962 = vmatprep.subr.bf16.mxu1 %v3576_v34 }
  0x4a   :  { %386 = vmatmul.mubr.bf16.gmra.mrb[20].mxu0 %v3096_v7  ;;  %499 = vmatmul.mubr.bf16.gmra.mrb[20].mxu1 %v3096_v7 }
  0x4b   :  { %395 = vmatprep.mubr.bf16.mxu0 %v5020_v1  ;;  %508 = vmatprep.mubr.bf16.mxu1 %v5020_v1 }
  0x52   :  { %396 = vmatmul.mubr.bf16.gmra.mrb[24].mxu0 %v3103_v8  ;;  %509 = vmatmul.mubr.bf16.gmra.mrb[24].mxu1 %v3103_v8 }
  0x53   :  { %405 = vmatprep.mubr.bf16.mxu0 %v5020_v1  ;;  %518 = vmatprep.mubr.bf16.mxu1 %v5020_v1 }
  0x5a   :  { %406 = vmatmul.mubr.bf16.gmra.mrb[28].mxu0 %v3113_v9  ;;  %519 = vmatmul.mubr.bf16.gmra.mrb[28].mxu1 %v3113_v9 }
  0x5b   :  { %823 = vmatprep.mubr.bf16.mxu0 %v5020_v1  ;;  %864 = vmatprep.mubr.bf16.mxu1 %v5020_v1 }
  0x62   :  { %824 = vmatmul.mubr.bf16.vlgmr.msra.gmra.mrb[32].mxu0 %v625_v10  ;;  %865 = vmatmul.mubr.bf16.vlgmr.msra.gmra.mrb[32].mxu1 %v625_v10 }
  0x63   :  { %922 = vmatpush1.bf16.msra.mxu0 %v3584_v36  ;;  %963 = vmatpush1.bf16.msra.mxu1 %v3596_v38 }
  0x64   :  { %923 = vmatprep.subr.bf16.mxu0 %v3590_v37  ;;  %964 = vmatprep.subr.bf16.mxu1 %v3601_v39 }
  0x65   :  { %953 = vmatprep.mubr.bf16.mxu0 %v5020_v1  ;;  %994 = vmatprep.mubr.bf16.mxu1 %v5020_v1 }
  0x67   :  { %924 = vmatpush1.bf16.msra.mxu0 %v3608_v40  ;;  %965 = vmatpush1.bf16.msra.mxu1 %v3621_v42 }
  0x68   :  { %925 = vmatprep.subr.bf16.mxu0 %v3615_v41  ;;  %966 = vmatprep.subr.bf16.mxu1 %v3642_v46 }
  0x6b   :  { %926 = vmatpush1.bf16.msra.mxu0 %v3631_v44  ;;  %967 = vmatpush1.bf16.msra.mxu1 %v3648_v47 }
  0x6c   :  { %927 = vmatprep.subr.bf16.mxu0 %v3636_v45  ;;  %968 = vmatprep.subr.bf16.mxu1 %v3653_v48 }
  0x6f   :  { %928 = vmatpush1.bf16.msra.mxu0 %v3661_v49  ;;  %969 = vmatpush1.bf16.msra.mxu1 %v3674_v51 }
  0x70   :  { %929 = vmatprep.subr.bf16.mxu0 %v3666_v50  ;;  %970 = vmatprep.subr.bf16.mxu1 %v3689_v54 }
  0x73   :  { %930 = vmatpush1.bf16.msra.mxu0 %v3683_v53  ;;  %971 = vmatpush1.bf16.msra.mxu1 %v3701_v56 }
  0x74   :  { %931 = vmatprep.subr.bf16.mxu0 %v3695_v55  ;;  %972 = vmatprep.subr.bf16.mxu1 %v3706_v57 }
  0x77   :  { %932 = vmatpush1.bf16.msra.mxu0 %v3714_v58  ;;  %973 = vmatpush1.bf16.msra.mxu1 %v3727_v60 }
  0x78   :  { %933 = vmatprep.subr.bf16.mxu0 %v3721_v59  ;;  %974 = vmatprep.subr.bf16.mxu1 %v3742_v63 }
  0x7b   :  { %934 = vmatpush1.bf16.msra.mxu0 %v3737_v62  ;;  %975 = vmatpush1.bf16.msra.mxu1 %v3754_v2 }
  0x7c   :  { %935 = vmatprep.subr.bf16.mxu0 %v3749_v0  ;;  %976 = vmatprep.subr.bf16.mxu1 %v3759_v3 }
  0x7f   :  { %936 = vmatpush1.bf16.msra.mxu0 %v3768_v4  ;;  %977 = vmatpush1.bf16.msra.mxu1 %v3775_v5 }
  0x80   :  { %1052 = vmatprep.subr.bf16.mxu0 %v3571_v33  ;;  %1093 = vmatprep.subr.bf16.mxu1 %v3576_v34 }
  0xf5   :  { %v3841_v19 = vpop.f32.mrb[0].mxu0  ;;  %v3843_v20 = vpop.f32.mrb[0].mxu1 }
  0xf6   :  { %v3849_v23 = vpop.f32.mrb[1].mxu0  ;;  %v3851_v24 = vpop.f32.mrb[1].mxu1 }
  0xf7   :  { %v341_v26 = vpop.f32.mrb[2].mxu0  ;;  %v454_v27 = vpop.f32.mrb[2].mxu1 }
  0xf8   :  { %v3856_v28 = vadd.f32 %v341_v26, %v3847_v22  ;;  %v343_v29 = vpop.f32.mrb[3].mxu0  ;;  %v3859_v30 = vadd.f32 %v454_v27, %v3839_v18  ;;  %v456_v31 = vpop.f32.mrb[3].mxu1 }
  0xf9   :  { %v3862_v32 = vadd.f32 %v343_v29, %v3853_v25  ;;  %v3865_v35 = vadd.f32 %v456_v31, %v3845_v21 }
  0xfd   :  { %v347_v43 = vpop.f32.mrb[4].mxu0  ;;  %v460_v52 = vpop.f32.mrb[4].mxu1 }
  0xfe   :  { %v3868_v61 = vadd.f32 %v347_v43, %v3847_v22  ;;  %v349_v6 = vpop.f32.mrb[5].mxu0  ;;  %v3871_v7 = vadd.f32 %v460_v52, %v3839_v18  ;;  %v462_v8 = vpop.f32.mrb[5].mxu1 }
  0xff   :  { %v3874_v9 = vadd.f32 %v349_v6, %v3853_v25  ;;  %v351_v10 = vpop.f32.mrb[6].mxu0  ;;  %v3877_v11 = vadd.f32 %v462_v8, %v3845_v21  ;;  %v464_v12 = vpop.f32.mrb[6].mxu1 }
 0x100   :  { %v3880_v13 = vadd.f32 %v351_v10, %v3847_v22  ;;  %v353_v14 = vpop.f32.mrb[7].mxu0  ;;  %v3883_v15 = vadd.f32 %v464_v12, %v3839_v18  ;;  %v466_v16 = vpop.f32.mrb[7].mxu1 }
 0x101   :  { %v3886_v17 = vadd.f32 %v353_v14, %v3853_v25  ;;  %v3889_v26 = vadd.f32 %v466_v16, %v3845_v21 }
 0x102   :  { %5022 = vst [vmem:[#allocation5_spill] sm:$0xff] %v3880_v13  ;;  %5023 = vst [vmem:[#allocation6_spill] sm:$0xff] %v3883_v15 }
 0x103   :  { %5024 = vst [vmem:[#allocation7_spill] sm:$0xff] %v3886_v17  ;;  %5025 = vst [vmem:[#allocation8_spill] sm:$0xff] %v3889_v26 }
 0x105   :  { %v357_v27 = vpop.f32.mrb[8].mxu0  ;;  %v470_v29 = vpop.f32.mrb[8].mxu1 }
 0x106   :  { %v3892_v31 = vadd.f32 %v357_v27, %v3847_v22  ;;  %v359_v43 = vpop.f32.mrb[9].mxu0  ;;  %v3895_v52 = vadd.f32 %v470_v29, %v3839_v18  ;;  %v472_v6 = vpop.f32.mrb[9].mxu1 }
 0x107   :  { %v3898_v8 = vadd.f32 %v359_v43, %v3853_v25  ;;  %v361_v10 = vpop.f32.mrb[10].mxu0  ;;  %v3901_v12 = vadd.f32 %v472_v6, %v3845_v21  ;;  %v474_v14 = vpop.f32.mrb[10].mxu1 }
 0x108   :  { %5026 = vst [vmem:[#allocation9_spill] sm:$0xff] %v3892_v31  ;;  %5027 = vst [vmem:[#allocation10_spill] sm:$0xff] %v3895_v52  ;;  %v3904_v16 = vadd.f32 %v361_v10, %v3847_v22  ;;  %v363_v1 = vpop.f32.mrb[11].mxu0  ;;  %v3907_v27 = vadd.f32 %v474_v14, %v3839_v18  ;;  %v476_v31 = vpop.f32.mrb[11].mxu1 }
 0x109   :  { %5028 = vst [vmem:[#allocation11_spill] sm:$0xff] %v3898_v8  ;;  %5029 = vst [vmem:[#allocation12_spill] sm:$0xff] %v3901_v12  ;;  %v3910_v29 = vadd.f32 %v363_v1, %v3853_v25  ;;  %v3913_v52 = vadd.f32 %v476_v31, %v3845_v21 }
 0x10a   :  { %5030 = vst [vmem:[#allocation13_spill] sm:$0xff] %v3904_v16  ;;  %5031 = vst [vmem:[#allocation14_spill] sm:$0xff] %v3907_v27 }
 0x10b   :  { %5032 = vst [vmem:[#allocation15_spill] sm:$0xff] %v3910_v29  ;;  %5033 = vst [vmem:[#allocation16_spill] sm:$0xff] %v3913_v52 }
 0x10d   :  { %v367_v43 = vpop.f32.mrb[12].mxu0  ;;  %v480_v8 = vpop.f32.mrb[12].mxu1 }
 0x10e   :  { %v3916_v6 = vadd.f32 %v367_v43, %v3847_v22  ;;  %v369_v12 = vpop.f32.mrb[13].mxu0  ;;  %v3919_v10 = vadd.f32 %v480_v8, %v3839_v18  ;;  %v482_v16 = vpop.f32.mrb[13].mxu1 }
 0x10f   :  { %v3922_v14 = vadd.f32 %v369_v12, %v3853_v25  ;;  %v371_v27 = vpop.f32.mrb[14].mxu0  ;;  %v3925_v1 = vadd.f32 %v482_v16, %v3845_v21  ;;  %v484_v29 = vpop.f32.mrb[14].mxu1 }
 0x110   :  { %5034 = vst [vmem:[#allocation17_spill] sm:$0xff] %v3916_v6  ;;  %5035 = vst [vmem:[#allocation18_spill] sm:$0xff] %v3919_v10  ;;  %v3928_v31 = vadd.f32 %v371_v27, %v3847_v22  ;;  %v373_v52 = vpop.f32.mrb[15].mxu0  ;;  %v3931_v43 = vadd.f32 %v484_v29, %v3839_v18  ;;  %v486_v6 = vpop.f32.mrb[15].mxu1 }
 0x111   :  { %5036 = vst [vmem:[#allocation19_spill] sm:$0xff] %v3922_v14  ;;  %5037 = vst [vmem:[#allocation20_spill] sm:$0xff] %v3925_v1  ;;  %v3934_v8 = vadd.f32 %v373_v52, %v3853_v25  ;;  %v3937_v10 = vadd.f32 %v486_v6, %v3845_v21 }
 0x112   :  { %5038 = vst [vmem:[#allocation21_spill] sm:$0xff] %v3928_v31  ;;  %5039 = vst [vmem:[#allocation22_spill] sm:$0xff] %v3931_v43 }
 0x113   :  { %5040 = vst [vmem:[#allocation23_spill] sm:$0xff] %v3934_v8  ;;  %5041 = vst [vmem:[#allocation24_spill] sm:$0xff] %v3937_v10 }
 0x115   :  { %v377_v12 = vpop.f32.mrb[16].mxu0  ;;  %v490_v14 = vpop.f32.mrb[16].mxu1 }
 0x116   :  { %v3940_v16 = vadd.f32 %v377_v12, %v3847_v22  ;;  %v379_v1 = vpop.f32.mrb[17].mxu0  ;;  %v3943_v27 = vadd.f32 %v490_v14, %v3839_v18  ;;  %v492_v31 = vpop.f32.mrb[17].mxu1 }
 0x117   :  { %v3946_v29 = vadd.f32 %v379_v1, %v3853_v25  ;;  %v381_v43 = vpop.f32.mrb[18].mxu0  ;;  %v3949_v52 = vadd.f32 %v492_v31, %v3845_v21  ;;  %v494_v8 = vpop.f32.mrb[18].mxu1 }
 0x118   :  { %5042 = vst [vmem:[#allocation25_spill] sm:$0xff] %v3940_v16  ;;  %5043 = vst [vmem:[#allocation26_spill] sm:$0xff] %v3943_v27  ;;  %v3952_v6 = vadd.f32 %v381_v43, %v3847_v22  ;;  %v383_v10 = vpop.f32.mrb[19].mxu0  ;;  %v3955_v12 = vadd.f32 %v494_v8, %v3839_v18  ;;  %v496_v16 = vpop.f32.mrb[19].mxu1 }
 0x119   :  { %5044 = vst [vmem:[#allocation27_spill] sm:$0xff] %v3946_v29  ;;  %5045 = vst [vmem:[#allocation28_spill] sm:$0xff] %v3949_v52  ;;  %v3958_v14 = vadd.f32 %v383_v10, %v3853_v25  ;;  %v3961_v27 = vadd.f32 %v496_v16, %v3845_v21 }
 0x11a   :  { %5046 = vst [vmem:[#allocation29_spill] sm:$0xff] %v3952_v6  ;;  %5047 = vst [vmem:[#allocation30_spill] sm:$0xff] %v3955_v12 }
 0x11b   :  { %5048 = vst [vmem:[#allocation31_spill] sm:$0xff] %v3958_v14  ;;  %5049 = vst [vmem:[#allocation32_spill] sm:$0xff] %v3961_v27 }
 0x11d   :  { %v387_v1 = vpop.f32.mrb[20].mxu0  ;;  %v500_v29 = vpop.f32.mrb[20].mxu1 }
 0x11e   :  { %v3964_v31 = vadd.f32 %v387_v1, %v3847_v22  ;;  %v389_v52 = vpop.f32.mrb[21].mxu0  ;;  %v3967_v43 = vadd.f32 %v500_v29, %v3839_v18  ;;  %v502_v6 = vpop.f32.mrb[21].mxu1 }
 0x11f   :  { %v3970_v8 = vadd.f32 %v389_v52, %v3853_v25  ;;  %v391_v12 = vpop.f32.mrb[22].mxu0  ;;  %v3973_v10 = vadd.f32 %v502_v6, %v3845_v21  ;;  %v504_v14 = vpop.f32.mrb[22].mxu1 }
 0x120   :  { %5050 = vst [vmem:[#allocation33_spill] sm:$0xff] %v3964_v31  ;;  %5051 = vst [vmem:[#allocation34_spill] sm:$0xff] %v3967_v43  ;;  %v3976_v16 = vadd.f32 %v391_v12, %v3847_v22  ;;  %v393_v27 = vpop.f32.mrb[23].mxu0  ;;  %v3979_v1 = vadd.f32 %v504_v14, %v3839_v18  ;;  %v506_v31 = vpop.f32.mrb[23].mxu1 }
 0x121   :  { %5052 = vst [vmem:[#allocation35_spill] sm:$0xff] %v3970_v8  ;;  %5053 = vst [vmem:[#allocation36_spill] sm:$0xff] %v3973_v10  ;;  %v3982_v29 = vadd.f32 %v393_v27, %v3853_v25  ;;  %v3985_v43 = vadd.f32 %v506_v31, %v3845_v21 }
 0x122   :  { %5054 = vst [vmem:[#allocation37_spill] sm:$0xff] %v3976_v16  ;;  %5055 = vst [vmem:[#allocation38_spill] sm:$0xff] %v3979_v1 }
 0x123   :  { %5056 = vst [vmem:[#allocation39_spill] sm:$0xff] %v3982_v29  ;;  %5057 = vst [vmem:[#allocation40_spill] sm:$0xff] %v3985_v43 }
 0x125   :  { %v397_v52 = vpop.f32.mrb[24].mxu0  ;;  %v510_v8 = vpop.f32.mrb[24].mxu1 }
 0x126   :  { %v3988_v6 = vadd.f32 %v397_v52, %v3847_v22  ;;  %v399_v10 = vpop.f32.mrb[25].mxu0  ;;  %v3991_v12 = vadd.f32 %v510_v8, %v3839_v18  ;;  %v512_v16 = vpop.f32.mrb[25].mxu1 }
 0x127   :  { %v3994_v14 = vadd.f32 %v399_v10, %v3853_v25  ;;  %v401_v1 = vpop.f32.mrb[26].mxu0  ;;  %v3997_v27 = vadd.f32 %v512_v16, %v3845_v21  ;;  %v514_v29 = vpop.f32.mrb[26].mxu1 }
 0x128   :  { %5058 = vst [vmem:[#allocation41_spill] sm:$0xff] %v3988_v6  ;;  %5059 = vst [vmem:[#allocation42_spill] sm:$0xff] %v3991_v12  ;;  %v4000_v31 = vadd.f32 %v401_v1, %v3847_v22  ;;  %v403_v43 = vpop.f32.mrb[27].mxu0  ;;  %v4003_v52 = vadd.f32 %v514_v29, %v3839_v18  ;;  %v516_v6 = vpop.f32.mrb[27].mxu1 }
 0x129   :  { %5060 = vst [vmem:[#allocation43_spill] sm:$0xff] %v3994_v14  ;;  %5061 = vst [vmem:[#allocation44_spill] sm:$0xff] %v3997_v27  ;;  %v4006_v8 = vadd.f32 %v403_v43, %v3853_v25  ;;  %v4009_v12 = vadd.f32 %v516_v6, %v3845_v21 }
 0x12a   :  { %5062 = vst [vmem:[#allocation45_spill] sm:$0xff] %v4000_v31  ;;  %5063 = vst [vmem:[#allocation46_spill] sm:$0xff] %v4003_v52 }
 0x12b   :  { %5064 = vst [vmem:[#allocation47_spill] sm:$0xff] %v4006_v8  ;;  %5065 = vst [vmem:[#allocation48_spill] sm:$0xff] %v4009_v12 }
 0x12d   :  { %v407_v10 = vpop.f32.mrb[28].mxu0  ;;  %v520_v14 = vpop.f32.mrb[28].mxu1 }
 0x12e   :  { %v4012_v16 = vadd.f32 %v407_v10, %v3847_v22  ;;  %v409_v27 = vpop.f32.mrb[29].mxu0  ;;  %v4015_v1 = vadd.f32 %v520_v14, %v3839_v18  ;;  %v522_v31 = vpop.f32.mrb[29].mxu1 }
 0x12f   :  { %v4018_v29 = vadd.f32 %v409_v27, %v3853_v25  ;;  %v411_v52 = vpop.f32.mrb[30].mxu0  ;;  %v4021_v43 = vadd.f32 %v522_v31, %v3845_v21  ;;  %v524_v8 = vpop.f32.mrb[30].mxu1  ;;  %v338_v27 = vadd.f32 %v3841_v19, %v3847_v22  ;;  %v451_v31 = vadd.f32 %v3843_v20, %v3839_v18 }
 0x130   :  { %5066 = vst [vmem:[#allocation49_spill] sm:$0xff] %v4012_v16  ;;  %5067 = vst [vmem:[#allocation50_spill] sm:$0xff] %v4015_v1  ;;  %v4024_v6 = vadd.f32 %v411_v52, %v3847_v22  ;;  %v413_v12 = vpop.f32.mrb[31].mxu0  ;;  %v4027_v10 = vadd.f32 %v524_v8, %v3839_v18  ;;  %v526_v16 = vpop.f32.mrb[31].mxu1  ;;  %v340_v52 = vadd.f32 %v3849_v23, %v3853_v25 }
 0x131   :  { %5068 = vst [vmem:[#allocation51_spill] sm:$0xff] %v4018_v29  ;;  %5069 = vst [vmem:[#allocation52_spill] sm:$0xff] %v4021_v43  ;;  %v4030_v14 = vadd.f32 %v413_v12, %v3853_v25  ;;  %v4033_v1 = vadd.f32 %v526_v16, %v3845_v21  ;;  %v453_v8 = vadd.f32 %v3851_v24, %v3845_v21 }
 0x132   :  { %5070 = vst [vmem:[#allocation53_spill] sm:$0xff] %v4024_v6  ;;  %5071 = vst [vmem:[#allocation54_spill] sm:$0xff] %v4027_v10 }
 0x133   :  { %5072 = vst [vmem:[#allocation55_spill] sm:$0xff] %v4030_v14  ;;  %5073 = vst [vmem:[#allocation56_spill] sm:$0xff] %v4033_v1 }
 0x135   :  { %v825_v10 = vpop.f32.mrb[32].mxu0  ;;  %v866_v6 = vpop.f32.mrb[32].mxu1 }
 0x136   :  { %v873_v43 = vadd.f32 %v825_v10, %v338_v27  ;;  %v875_v12 = vadd.f32 %v866_v6, %v451_v31  ;;  %v827_v14 = vpop.f32.mrb[33].mxu0  ;;  %v868_v29 = vpop.f32.mrb[33].mxu1 }
 0x137   :  { %v874_v16 = vadd.f32 %v827_v14, %v340_v52  ;;  %v876_v1 = vadd.f32 %v868_v29, %v453_v8  ;;  %v829_v26 = vpop.f32.mrb[34].mxu0  ;;  %v870_v17 = vpop.f32.mrb[34].mxu1 }
 0x138   :  { %v877_v19 = vpack.c.bf16 %v873_v43, %v873_v43  ;;  %v830_v22 = vpop.f32.mrb[35].mxu0  ;;  %v871_v15 = vpop.f32.mrb[35].mxu1  ;;  %v879_v6 = vpack.c.bf16 %v875_v12, %v875_v12 }
 0x139   :  { %v878_v18 = vpack.c.bf16 %v874_v16, %v874_v16  ;;  %v880_v23 = vpack.c.bf16 %v876_v1, %v876_v1 }
 0x13a   :  { %v2955_v20 = vmul.bf16 3216621497, %v877_v19 }
 0x13b   :  { %v2956_v13 = vmul.bf16 3216621497, %v878_v18  ;;  %v2957_v21 = vmul.bf16 3216621497, %v880_v23 }
 0x13c   :  { %3123 = vpow.bf16 %v2955_v20 }
 0x13d   :  { %3125 = vpow.bf16 %v2956_v13 }
 0x13e   :  { %3127 = vpow.bf16 %v2957_v21  ;;  %v5074_v21 = vmov 0  }
 0x147   :  { %v3124_v24 = vpop.eup %3123 }
 0x148   :  { %v3126_v25 = vpop.eup %3125  ;;  %v885_v10 = vadd.bf16 1065369472, %v3124_v24 }
 0x149   :  { %v892_v27 = vadd.bf16 1065369472, %v3126_v25  ;;  %v3128_v17 = vpop.eup %3127 }
 0x14a   :  { %3129 = vrcp.bf16 %v885_v10  ;;  %v900_v13 = vadd.bf16 1065369472, %v3128_v17 }
 0x14b   :  { %3131 = vrcp.bf16 %v892_v27 }
 0x14c   :  { %3133 = vtanh.bf16 %v879_v6 }
 0x14d   :  { %3135 = vrcp.bf16 %v900_v13 }
 0x155   :  { %v3130_v26 = vpop.eup %3129 }
 0x156   :  { %v3132_v29 = vpop.eup %3131  ;;  %v887_v15 = vmul.bf16 1065369472, %v3130_v26 }
 0x157   :  { %v3134_v43 = vpop.eup %3133  ;;  %v894_v14 = vmul.bf16 1065369472, %v3132_v29 }
 0x158   :  { %v905_v31 = vmul.bf16 %v3134_v43, %v887_v15  ;;  %v3136_v19 = vpop.eup %3135 }
 0x159   :  { %v903_v52 = vunpack.c.l.bf16 %v894_v14  ;;  %v902_v22 = vmul.bf16 1065369472, %v3136_v19 }
 0x15a   :  { %v906_v1 = vunpack.c.l.bf16 %v905_v31 }
 0x15b   :  { %v904_v8 = vmul.f32 0.0, %v903_v52 }
 0x15d   :  { %v4043_v16 = vadd.f32 %v906_v1, %v904_v8 }
 0x15f   :  { %v908_v12 = vpack.c.bf16 %v4043_v16, %v4043_v16 }
 0x161   :  { %3137 = vtanh.bf16 %v908_v12 }
 0x16c   :  { %v3138_v18 = vpop.eup %3137 }
 0x16d   :  { %v910_v20 = vmul.bf16 %v3138_v18, %v902_v22 }
 0x16f   :  { %912 = vst [vmem:[#allocation2] sm:$0xf] %v910_v20  ;;  %913 = vst [vmem:[%s5019_s4] sm:$0xf] %v910_v20 }
 0x176   :  { %v914_v23 = vld [vmem:[#allocation2] sm:$0xf] }
 0x177   :  { %954 = vmatmul.mubr.bf16.vlgmr.msra.gmra.mrb[36].mxu0 %v914_v23  ;;  %995 = vmatmul.mubr.bf16.vlgmr.msra.gmra.mrb[36].mxu1 %v914_v23 }
 0x178   :  { %1053 = vmatpush1.bf16.msra.mxu0 %v3584_v36  ;;  %1094 = vmatpush1.bf16.msra.mxu1 %v3596_v38 }
 0x179   :  { %1054 = vmatprep.subr.bf16.mxu0 %v3590_v37  ;;  %1095 = vmatprep.subr.bf16.mxu1 %v3601_v39 }
 0x17a   :  { %1084 = vmatprep.mubr.bf16.mxu0 %v5074_v21  ;;  %1125 = vmatprep.mubr.bf16.mxu1 %v5074_v21 }
 0x17c   :  { %1055 = vmatpush1.bf16.msra.mxu0 %v3608_v40  ;;  %1096 = vmatpush1.bf16.msra.mxu1 %v3621_v42 }
 0x17d   :  { %1056 = vmatprep.subr.bf16.mxu0 %v3615_v41  ;;  %1097 = vmatprep.subr.bf16.mxu1 %v3642_v46 }
 0x180   :  { %1057 = vmatpush1.bf16.msra.mxu0 %v3631_v44  ;;  %1098 = vmatpush1.bf16.msra.mxu1 %v3648_v47 }
 0x181   :  { %1058 = vmatprep.subr.bf16.mxu0 %v3636_v45  ;;  %1099 = vmatprep.subr.bf16.mxu1 %v3653_v48 }
 0x184   :  { %1059 = vmatpush1.bf16.msra.mxu0 %v3661_v49  ;;  %1100 = vmatpush1.bf16.msra.mxu1 %v3674_v51 }
 0x185   :  { %1060 = vmatprep.subr.bf16.mxu0 %v3666_v50  ;;  %1101 = vmatprep.subr.bf16.mxu1 %v3689_v54 }
 0x188   :  { %1061 = vmatpush1.bf16.msra.mxu0 %v3683_v53  ;;  %1102 = vmatpush1.bf16.msra.mxu1 %v3701_v56 }
 0x189   :  { %1062 = vmatprep.subr.bf16.mxu0 %v3695_v55  ;;  %1103 = vmatprep.subr.bf16.mxu1 %v3706_v57 }
 0x18c   :  { %1063 = vmatpush1.bf16.msra.mxu0 %v3714_v58  ;;  %1104 = vmatpush1.bf16.msra.mxu1 %v3727_v60 }
 0x18d   :  { %1064 = vmatprep.subr.bf16.mxu0 %v3721_v59  ;;  %1105 = vmatprep.subr.bf16.mxu1 %v3742_v63 }
 0x190   :  { %1065 = vmatpush1.bf16.msra.mxu0 %v3737_v62  ;;  %1106 = vmatpush1.bf16.msra.mxu1 %v3754_v2 }
 0x191   :  { %1066 = vmatprep.subr.bf16.mxu0 %v3749_v0  ;;  %1107 = vmatprep.subr.bf16.mxu1 %v3759_v3 }
 0x194   :  { %1067 = vmatpush1.bf16.msra.mxu0 %v3768_v4  ;;  %1108 = vmatpush1.bf16.msra.mxu1 %v3775_v5 }
 0x195   :  { %1183 = vmatprep.subr.bf16.mxu0 %v3571_v33  ;;  %1224 = vmatprep.subr.bf16.mxu1 %v3576_v34 }
 0x24a   :  { %v955_v24 = vpop.f32.mrb[36].mxu0  ;;  %v996_v25 = vpop.f32.mrb[36].mxu1 }
 0x24b   :  { %v1003_v10 = vadd.f32 %v955_v24, %v3856_v28  ;;  %v1005_v6 = vadd.f32 %v996_v25, %v3859_v30  ;;  %v957_v27 = vpop.f32.mrb[37].mxu0  ;;  %v998_v17 = vpop.f32.mrb[37].mxu1 }
 0x24c   :  { %v1004_v26 = vadd.f32 %v957_v27, %v3862_v32  ;;  %v1006_v29 = vadd.f32 %v998_v17, %v3865_v35  ;;  %v959_v15 = vpop.f32.mrb[38].mxu0  ;;  %v1000_v43 = vpop.f32.mrb[38].mxu1 }
 0x24d   :  { %v1007_v14 = vpack.c.bf16 %v1003_v10, %v1003_v10  ;;  %v960_v31 = vpop.f32.mrb[39].mxu0  ;;  %v1001_v52 = vpop.f32.mrb[39].mxu1  ;;  %v1009_v18 = vpack.c.bf16 %v1005_v6, %v1005_v6 }
 0x24e   :  { %v1008_v13 = vpack.c.bf16 %v1004_v26, %v1004_v26  ;;  %v1010_v12 = vpack.c.bf16 %v1006_v29, %v1006_v29 }
 0x24f   :  { %v2958_v1 = vmul.bf16 3216621497, %v1007_v14 }
 0x250   :  { %v2959_v8 = vmul.bf16 3216621497, %v1008_v13  ;;  %v2960_v28 = vmul.bf16 3216621497, %v1010_v12 }
 0x251   :  { %3139 = vpow.bf16 %v2958_v1 }
 0x252   :  { %3141 = vpow.bf16 %v2959_v8 }
 0x253   :  { %3143 = vpow.bf16 %v2960_v28 }
 0x25c   :  { %v3140_v19 = vpop.eup %3139 }
 0x25d   :  { %v3142_v30 = vpop.eup %3141  ;;  %v1015_v22 = vadd.bf16 1065369472, %v3140_v19 }
 0x25e   :  { %v1022_v20 = vadd.bf16 1065369472, %v3142_v30  ;;  %v3144_v32 = vpop.eup %3143 }
 0x25f   :  { %3145 = vrcp.bf16 %v1015_v22  ;;  %v1030_v26 = vadd.bf16 1065369472, %v3144_v32 }
 0x260   :  { %3147 = vrcp.bf16 %v1022_v20 }
 0x261   :  { %3149 = vtanh.bf16 %v1009_v18 }
 0x262   :  { %3151 = vrcp.bf16 %v1030_v26 }
 0x26a   :  { %v3146_v35 = vpop.eup %3145 }
 0x26b   :  { %v3148_v23 = vpop.eup %3147  ;;  %v1017_v24 = vmul.bf16 1065369472, %v3146_v35 }
 0x26c   :  { %v3150_v25 = vpop.eup %3149  ;;  %v1024_v10 = vmul.bf16 1065369472, %v3148_v23 }
 0x26d   :  { %v1035_v27 = vmul.bf16 %v3150_v25, %v1017_v24  ;;  %v3152_v14 = vpop.eup %3151 }
 0x26e   :  { %v1033_v17 = vunpack.c.l.bf16 %v1024_v10  ;;  %v1032_v31 = vmul.bf16 1065369472, %v3152_v14 }
 0x26f   :  { %v1036_v29 = vunpack.c.l.bf16 %v1035_v27 }
 0x270   :  { %v1034_v15 = vmul.f32 %v1033_v17, %v4043_v16 }
 0x272   :  { %v4089_v43 = vadd.f32 %v1036_v29, %v1034_v15 }
 0x274   :  { %v1038_v6 = vpack.c.bf16 %v4089_v43, %v4089_v43 }
 0x276   :  { %3153 = vtanh.bf16 %v1038_v6 }
 0x281   :  { %v3154_v52 = vpop.eup %3153 }
 0x282   :  { %v1040_v13 = vmul.bf16 %v3154_v52, %v1032_v31 }
 0x284   :  { %1042 = vst [vmem:[#allocation2] sm:$0xf] %v1040_v13  ;;  %2961 = vst [vmem:[%s5019_s4 + $0x4] sm:$0xf] %v1040_v13 }
 0x28b   :  { %v1045_v1 = vld [vmem:[#allocation2] sm:$0xf] }
 0x28c   :  { %1085 = vmatmul.mubr.bf16.vlgmr.msra.gmra.mrb[40].mxu0 %v1045_v1  ;;  %1126 = vmatmul.mubr.bf16.vlgmr.msra.gmra.mrb[40].mxu1 %v1045_v1 }
 0x28d   :  { %1184 = vmatpush1.bf16.msra.mxu0 %v3584_v36  ;;  %1225 = vmatpush1.bf16.msra.mxu1 %v3596_v38 }
 0x28e   :  { %1185 = vmatprep.subr.bf16.mxu0 %v3590_v37  ;;  %1226 = vmatprep.subr.bf16.mxu1 %v3601_v39 }
 0x28f   :  { %1215 = vmatprep.mubr.bf16.mxu0 %v5074_v21  ;;  %1256 = vmatprep.mubr.bf16.mxu1 %v5074_v21 }
 0x291   :  { %1186 = vmatpush1.bf16.msra.mxu0 %v3608_v40  ;;  %1227 = vmatpush1.bf16.msra.mxu1 %v3621_v42 }
 0x292   :  { %1187 = vmatprep.subr.bf16.mxu0 %v3615_v41  ;;  %1228 = vmatprep.subr.bf16.mxu1 %v3642_v46 }
 0x295   :  { %1188 = vmatpush1.bf16.msra.mxu0 %v3631_v44  ;;  %1229 = vmatpush1.bf16.msra.mxu1 %v3648_v47 }
 0x296   :  { %1189 = vmatprep.subr.bf16.mxu0 %v3636_v45  ;;  %1230 = vmatprep.subr.bf16.mxu1 %v3653_v48 }
 0x299   :  { %1190 = vmatpush1.bf16.msra.mxu0 %v3661_v49  ;;  %1231 = vmatpush1.bf16.msra.mxu1 %v3674_v51 }
 0x29a   :  { %1191 = vmatprep.subr.bf16.mxu0 %v3666_v50  ;;  %1232 = vmatprep.subr.bf16.mxu1 %v3689_v54 }
 0x29d   :  { %1192 = vmatpush1.bf16.msra.mxu0 %v3683_v53  ;;  %1233 = vmatpush1.bf16.msra.mxu1 %v3701_v56 }
 0x29e   :  { %1193 = vmatprep.subr.bf16.mxu0 %v3695_v55  ;;  %1234 = vmatprep.subr.bf16.mxu1 %v3706_v57 }
 0x2a1   :  { %1194 = vmatpush1.bf16.msra.mxu0 %v3714_v58  ;;  %1235 = vmatpush1.bf16.msra.mxu1 %v3727_v60 }
 0x2a2   :  { %1195 = vmatprep.subr.bf16.mxu0 %v3721_v59  ;;  %1236 = vmatprep.subr.bf16.mxu1 %v3742_v63 }
 0x2a5   :  { %1196 = vmatpush1.bf16.msra.mxu0 %v3737_v62  ;;  %1237 = vmatpush1.bf16.msra.mxu1 %v3754_v2 }
 0x2a6   :  { %1197 = vmatprep.subr.bf16.mxu0 %v3749_v0  ;;  %1238 = vmatprep.subr.bf16.mxu1 %v3759_v3 }
 0x2a9   :  { %1198 = vmatpush1.bf16.msra.mxu0 %v3768_v4  ;;  %1239 = vmatpush1.bf16.msra.mxu1 %v3775_v5 }
 0x2aa   :  { %1314 = vmatprep.subr.bf16.mxu0 %v3571_v33  ;;  %1355 = vmatprep.subr.bf16.mxu1 %v3576_v34 }
 0x35f   :  { %v1086_v36 = vpop.f32.mrb[40].mxu0  ;;  %v1127_v37 = vpop.f32.mrb[40].mxu1 }
 0x360   :  { %v1134_v38 = vadd.f32 %v1086_v36, %v3868_v61  ;;  %v1136_v39 = vadd.f32 %v1127_v37, %v3871_v7  ;;  %v1088_v40 = vpop.f32.mrb[41].mxu0  ;;  %v1129_v41 = vpop.f32.mrb[41].mxu1  ;;  %v4151_v36 = vld [vmem:[%s5017_s2 + $0x8] ss:$16 sps:$4 sm:$0xff]   ;;  %v4157_v37 = vld [vmem:[%s5017_s2 + $0x24] ss:$16 sps:$4 sm:$0xff]  }
 0x361   :  { %v1135_v42 = vadd.f32 %v1088_v40, %v3874_v9  ;;  %v1137_v44 = vadd.f32 %v1129_v41, %v3877_v11  ;;  %v1090_v45 = vpop.f32.mrb[42].mxu0  ;;  %v1131_v16 = vpop.f32.mrb[42].mxu1  ;;  %v4177_v40 = vld [vmem:[%s5017_s2 + $0x28] ss:$16 sps:$4 sm:$0xff]   ;;  %v4183_v41 = vld [vmem:[%s5017_s2 + $0x44] ss:$16 sps:$4 sm:$0xff]  }
 0x362   :  { %v1138_v8 = vpack.c.bf16 %v1134_v38, %v1134_v38  ;;  %v1091_v12 = vpop.f32.mrb[43].mxu0  ;;  %v1132_v28 = vpop.f32.mrb[43].mxu1  ;;  %v1140_v20 = vpack.c.bf16 %v1136_v39, %v1136_v39  ;;  %v4163_v38 = vld [vmem:[%s5017_s2 + $0x2c] ss:$16 sps:$4 sm:$0xff]   ;;  %v4171_v39 = vld [vmem:[%s5017_s2 + $0x20] ss:$16 sps:$4 sm:$0xff]  }
 0x363   :  { %v1139_v33 = vpack.c.bf16 %v1135_v42, %v1135_v42  ;;  %v1141_v30 = vpack.c.bf16 %v1137_v44, %v1137_v44  ;;  %v4190_v42 = vld [vmem:[%s5017_s2 + $0x40] ss:$16 sps:$4 sm:$0xff]   ;;  %v4197_v44 = vld [vmem:[%s5017_s2 + $0x64] ss:$16 sps:$4 sm:$0xff]  }
 0x364   :  { %v2962_v19 = vmul.bf16 3216621497, %v1138_v8 }
 0x365   :  { %v2963_v34 = vmul.bf16 3216621497, %v1139_v33  ;;  %v2964_v61 = vmul.bf16 3216621497, %v1141_v30 }
 0x366   :  { %3155 = vpow.bf16 %v2962_v19 }
 0x367   :  { %3157 = vpow.bf16 %v2963_v34 }
 0x368   :  { %3159 = vpow.bf16 %v2964_v61 }
 0x371   :  { %v3156_v22 = vpop.eup %3155 }
 0x372   :  { %v3158_v7 = vpop.eup %3157  ;;  %v1146_v18 = vadd.bf16 1065369472, %v3156_v22 }
 0x373   :  { %v1153_v32 = vadd.bf16 1065369472, %v3158_v7  ;;  %v3160_v9 = vpop.eup %3159 }
 0x374   :  { %3161 = vrcp.bf16 %v1146_v18  ;;  %v1161_v17 = vadd.bf16 1065369472, %v3160_v9 }
 0x375   :  { %3163 = vrcp.bf16 %v1153_v32 }
 0x376   :  { %3165 = vtanh.bf16 %v1140_v20 }
 0x377   :  { %3167 = vrcp.bf16 %v1161_v17 }
 0x37f   :  { %v3162_v11 = vpop.eup %3161 }
 0x380   :  { %v3164_v35 = vpop.eup %3163  ;;  %v1148_v23 = vmul.bf16 1065369472, %v3162_v11 }
 0x381   :  { %v3166_v24 = vpop.eup %3165  ;;  %v1155_v25 = vmul.bf16 1065369472, %v3164_v35 }
 0x382   :  { %v1166_v10 = vmul.bf16 %v3166_v24, %v1148_v23  ;;  %v3168_v14 = vpop.eup %3167 }
 0x383   :  { %v1164_v27 = vunpack.c.l.bf16 %v1155_v25  ;;  %v1163_v31 = vmul.bf16 1065369472, %v3168_v14  ;;  %v4269_v14 = vld [vmem:[%s5017_s2 + $0x6c] ss:$16 sps:$4 sm:$0xff]  }
 0x384   :  { %v1167_v26 = vunpack.c.l.bf16 %v1166_v10 }
 0x385   :  { %v1165_v29 = vmul.f32 %v1164_v27, %v4089_v43  ;;  %v4145_v43 = vld [vmem:[%s5017_s2] ss:$16 sps:$4 sm:$0xff]  }
 0x387   :  { %v4135_v15 = vadd.f32 %v1167_v26, %v1165_v29 }
 0x389   :  { %v1169_v6 = vpack.c.bf16 %v4135_v15, %v4135_v15 }
 0x38b   :  { %3169 = vtanh.bf16 %v1169_v6  ;;  %v4262_v6 = vld [vmem:[%s5017_s2 + $0x48] ss:$16 sps:$4 sm:$0xff]  }
 0x396   :  { %v3170_v52 = vpop.eup %3169 }
 0x397   :  { %v1171_v13 = vmul.bf16 %v3170_v52, %v1163_v31  ;;  %v4275_v31 = vld [vmem:[%s5017_s2 + $0x60] ss:$16 sps:$4 sm:$0xff]   ;;  %v4281_v52 = vld [vmem:[%s5017_s2 + $0x68] ss:$16 sps:$4 sm:$0xff]  }
 0x399   :  { %1173 = vst [vmem:[#allocation2] sm:$0xf] %v1171_v13  ;;  %2965 = vst [vmem:[%s5019_s4 + $0x8] sm:$0xf] %v1171_v13  ;;  %v4287_v13 = vld [vmem:[%s5017_s2 + $0x84] ss:$16 sps:$4 sm:$0xff]  }
 0x3a0   :  { %v1176_v1 = vld [vmem:[#allocation2] sm:$0xf] }
 0x3a1   :  { %1216 = vmatmul.mubr.bf16.vlgmr.msra.gmra.mrb[44].mxu0 %v1176_v1  ;;  %1257 = vmatmul.mubr.bf16.vlgmr.msra.gmra.mrb[44].mxu1 %v1176_v1  ;;  %v4293_v1 = vld [vmem:[%s5017_s2 + $0x8c] ss:$16 sps:$4 sm:$0xff]  }
 0x3a2   :  { %1315 = vmatpush1.bf16.msra.mxu0 %v4145_v43  ;;  %1356 = vmatpush1.bf16.msra.mxu1 %v4151_v36 }
 0x3a3   :  { %1316 = vmatprep.subr.bf16.mxu0 %v4157_v37  ;;  %1357 = vmatprep.subr.bf16.mxu1 %v4163_v38 }
 0x3a4   :  { %1346 = vmatprep.mubr.bf16.mxu0 %v5074_v21  ;;  %1387 = vmatprep.mubr.bf16.mxu1 %v5074_v21 }
 0x3a6   :  { %1317 = vmatpush1.bf16.msra.mxu0 %v4171_v39  ;;  %1358 = vmatpush1.bf16.msra.mxu1 %v4177_v40 }
 0x3a7   :  { %1318 = vmatprep.subr.bf16.mxu0 %v4183_v41  ;;  %1359 = vmatprep.subr.bf16.mxu1 %v3642_v46  ;;  %v4222_v46 = vld [vmem:[%s5017_s2 + $0x4] ss:$16 sps:$4 sm:$0xff]  }
 0x3aa   :  { %1319 = vmatpush1.bf16.msra.mxu0 %v4190_v42  ;;  %1360 = vmatpush1.bf16.msra.mxu1 %v3648_v47  ;;  %v4228_v47 = vld [vmem:[%s5017_s2 + $0xc] ss:$16 sps:$4 sm:$0xff]  }
 0x3ab   :  { %1320 = vmatprep.subr.bf16.mxu0 %v4197_v44  ;;  %1361 = vmatprep.subr.bf16.mxu1 %v3653_v48 }
 0x3ae   :  { %1321 = vmatpush1.bf16.msra.mxu0 %v3661_v49  ;;  %1362 = vmatpush1.bf16.msra.mxu1 %v3674_v51 }
 0x3af   :  { %1322 = vmatprep.subr.bf16.mxu0 %v3666_v50  ;;  %1363 = vmatprep.subr.bf16.mxu1 %v3689_v54  ;;  %v5075_v50 = vld [vmem:[#allocation5_spill] sm:$0xff] }
 0x3b2   :  { %1323 = vmatpush1.bf16.msra.mxu0 %v3683_v53  ;;  %1364 = vmatpush1.bf16.msra.mxu1 %v3701_v56  ;;  %v5076_v53 = vld [vmem:[#allocation6_spill] sm:$0xff] }
 0x3b3   :  { %1324 = vmatprep.subr.bf16.mxu0 %v3695_v55  ;;  %1365 = vmatprep.subr.bf16.mxu1 %v3706_v57  ;;  %v5077_v57 = vld [vmem:[#allocation7_spill] sm:$0xff] }
 0x3b6   :  { %1325 = vmatpush1.bf16.msra.mxu0 %v3714_v58  ;;  %1366 = vmatpush1.bf16.msra.mxu1 %v3727_v60 }
 0x3b7   :  { %1326 = vmatprep.subr.bf16.mxu0 %v3721_v59  ;;  %1367 = vmatprep.subr.bf16.mxu1 %v3742_v63  ;;  %v5078_v59 = vld [vmem:[#allocation8_spill] sm:$0xff] }
 0x3ba   :  { %1327 = vmatpush1.bf16.msra.mxu0 %v3737_v62  ;;  %1368 = vmatpush1.bf16.msra.mxu1 %v3754_v2 }
 0x3bb   :  { %1328 = vmatprep.subr.bf16.mxu0 %v3749_v0  ;;  %1369 = vmatprep.subr.bf16.mxu1 %v3759_v3 }
 0x3be   :  { %1329 = vmatpush1.bf16.msra.mxu0 %v3768_v4  ;;  %1370 = vmatpush1.bf16.msra.mxu1 %v3775_v5 }
 0x3bf   :  { %1445 = vmatprep.subr.bf16.mxu0 %v4222_v46  ;;  %1486 = vmatprep.subr.bf16.mxu1 %v4228_v47 }
 0x474   :  { %v1217_v48 = vpop.f32.mrb[44].mxu0  ;;  %v1258_v49 = vpop.f32.mrb[44].mxu1 }
 0x475   :  { %v1265_v51 = vadd.f32 %v1217_v48, %v5075_v50  ;;  %v1267_v54 = vadd.f32 %v1258_v49, %v5076_v53  ;;  %v1219_v55 = vpop.f32.mrb[45].mxu0  ;;  %v1260_v56 = vpop.f32.mrb[45].mxu1  ;;  %v4299_v48 = vld [vmem:[%s5017_s2 + $0x80] ss:$16 sps:$4 sm:$0xff]   ;;  %v4305_v49 = vld [vmem:[%s5017_s2 + $0x88] ss:$16 sps:$4 sm:$0xff]  }
 0x476   :  { %v1266_v58 = vadd.f32 %v1219_v55, %v5077_v57  ;;  %v1268_v60 = vadd.f32 %v1260_v56, %v5078_v59  ;;  %v1221_v62 = vpop.f32.mrb[46].mxu0  ;;  %v1262_v63 = vpop.f32.mrb[46].mxu1  ;;  %v4311_v50 = vld [vmem:[%s5017_s2 + $0xa4] ss:$16 sps:$4 sm:$0xff]   ;;  %v4323_v53 = vld [vmem:[%s5017_s2 + $0xa0] ss:$16 sps:$4 sm:$0xff]  }
 0x477   :  { %v1269_v0 = vpack.c.bf16 %v1265_v51, %v1265_v51  ;;  %v1222_v2 = vpop.f32.mrb[47].mxu0  ;;  %v1263_v3 = vpop.f32.mrb[47].mxu1  ;;  %v1271_v19 = vpack.c.bf16 %v1267_v54, %v1267_v54  ;;  %v4317_v51 = vld [vmem:[%s5017_s2 + $0xac] ss:$16 sps:$4 sm:$0xff]   ;;  %v4329_v54 = vld [vmem:[%s5017_s2 + $0xa8] ss:$16 sps:$4 sm:$0xff]  }
 0x478   :  { %v1270_v4 = vpack.c.bf16 %v1266_v58, %v1266_v58  ;;  %v1272_v16 = vpack.c.bf16 %v1268_v60, %v1268_v60  ;;  %v4335_v55 = vld [vmem:[%s5017_s2 + $0xc4] ss:$16 sps:$4 sm:$0xff]   ;;  %v4341_v56 = vld [vmem:[%s5017_s2 + $0xcc] ss:$16 sps:$4 sm:$0xff]   ;;  %v4347_v57 = vld [vmem:[%s5017_s2 + $0xc0] ss:$16 sps:$4 sm:$0xff]  }
 0x479   :  { %v2966_v5 = vmul.bf16 3216621497, %v1269_v0  ;;  %v4353_v58 = vld [vmem:[%s5017_s2 + $0xc8] ss:$16 sps:$4 sm:$0xff]   ;;  %v4359_v59 = vld [vmem:[%s5017_s2 + $0xe4] ss:$16 sps:$4 sm:$0xff]  }
 0x47a   :  { %v2967_v45 = vmul.bf16 3216621497, %v1270_v4  ;;  %v2968_v8 = vmul.bf16 3216621497, %v1272_v16  ;;  %v4365_v60 = vld [vmem:[%s5017_s2 + $0xec] ss:$16 sps:$4 sm:$0xff]  }
 0x47b   :  { %3171 = vpow.bf16 %v2966_v5  ;;  %v4371_v62 = vld [vmem:[%s5017_s2 + $0xe0] ss:$16 sps:$4 sm:$0xff]   ;;  %v4377_v63 = vld [vmem:[%s5017_s2 + $0xe8] ss:$16 sps:$4 sm:$0xff]  }
 0x47c   :  { %3173 = vpow.bf16 %v2967_v45  ;;  %v5079_v3 = vld [vmem:[#allocation9_spill] sm:$0xff]  ;;  %v5080_v5 = vld [vmem:[#allocation10_spill] sm:$0xff] }
 0x47d   :  { %3175 = vpow.bf16 %v2968_v8 }
 0x486   :  { %v3172_v12 = vpop.eup %3171 }
 0x487   :  { %v3174_v28 = vpop.eup %3173  ;;  %v1277_v33 = vadd.bf16 1065369472, %v3172_v12  ;;  %v5081_v12 = vld [vmem:[#allocation11_spill] sm:$0xff] }
 0x488   :  { %v1284_v34 = vadd.bf16 1065369472, %v3174_v28  ;;  %v3176_v30 = vpop.eup %3175 }
 0x489   :  { %3177 = vrcp.bf16 %v1277_v33  ;;  %v1292_v11 = vadd.bf16 1065369472, %v3176_v30  ;;  %v5082_v33 = vld [vmem:[#allocation12_spill] sm:$0xff] }
 0x48a   :  { %3179 = vrcp.bf16 %v1284_v34 }
 0x48b   :  { %3181 = vtanh.bf16 %v1271_v19 }
 0x48c   :  { %3183 = vrcp.bf16 %v1292_v11 }
 0x494   :  { %v3178_v61 = vpop.eup %3177 }
 0x495   :  { %v3180_v22 = vpop.eup %3179  ;;  %v1279_v7 = vmul.bf16 1065369472, %v3178_v61 }
 0x496   :  { %v3182_v18 = vpop.eup %3181  ;;  %v1286_v20 = vmul.bf16 1065369472, %v3180_v22 }
 0x497   :  { %v1297_v32 = vmul.bf16 %v3182_v18, %v1279_v7  ;;  %v3184_v10 = vpop.eup %3183 }
 0x498   :  { %v1295_v9 = vunpack.c.l.bf16 %v1286_v20  ;;  %v1294_v27 = vmul.bf16 1065369472, %v3184_v10 }
 0x499   :  { %v1298_v35 = vunpack.c.l.bf16 %v1297_v32 }
 0x49a   :  { %v1296_v23 = vmul.f32 %v1295_v9, %v4135_v15  ;;  %v4255_v15 = vld [vmem:[%s5017_s2 + $0x4c] ss:$16 sps:$4 sm:$0xff]  }
 0x49c   :  { %v4236_v24 = vadd.f32 %v1298_v35, %v1296_v23 }
 0x49e   :  { %v1300_v25 = vpack.c.bf16 %v4236_v24, %v4236_v24 }
 0x4a0   :  { %3185 = vtanh.bf16 %v1300_v25 }
 0x4ab   :  { %v3186_v17 = vpop.eup %3185 }
 0x4ac   :  { %v1302_v26 = vmul.bf16 %v3186_v17, %v1294_v27 }
 0x4ae   :  { %1304 = vst [vmem:[#allocation2] sm:$0xf] %v1302_v26  ;;  %2969 = vst [vmem:[%s5019_s4 + $0xc] sm:$0xf] %v1302_v26 }
 0x4b5   :  { %v1307_v29 = vld [vmem:[#allocation2] sm:$0xf] }
 0x4b6   :  { %1347 = vmatmul.mubr.bf16.vlgmr.msra.gmra.mrb[48].mxu0 %v1307_v29  ;;  %1388 = vmatmul.mubr.bf16.vlgmr.msra.gmra.mrb[48].mxu1 %v1307_v29 }
 0x4b7   :  { %1446 = vmatpush1.bf16.msra.mxu0 %v4145_v43  ;;  %1487 = vmatpush1.bf16.msra.mxu1 %v4151_v36 }
 0x4b8   :  { %1447 = vmatprep.subr.bf16.mxu0 %v4157_v37  ;;  %1488 = vmatprep.subr.bf16.mxu1 %v4163_v38 }
 0x4b9   :  { %1477 = vmatprep.mubr.bf16.mxu0 %v5074_v21  ;;  %1518 = vmatprep.mubr.bf16.mxu1 %v5074_v21 }
 0x4bb   :  { %1448 = vmatpush1.bf16.msra.mxu0 %v4171_v39  ;;  %1489 = vmatpush1.bf16.msra.mxu1 %v4177_v40 }
 0x4bc   :  { %1449 = vmatprep.subr.bf16.mxu0 %v4183_v41  ;;  %1490 = vmatprep.subr.bf16.mxu1 %v4255_v15 }
 0x4bf   :  { %1450 = vmatpush1.bf16.msra.mxu0 %v4190_v42  ;;  %1491 = vmatpush1.bf16.msra.mxu1 %v4262_v6 }
 0x4c0   :  { %1451 = vmatprep.subr.bf16.mxu0 %v4197_v44  ;;  %1492 = vmatprep.subr.bf16.mxu1 %v4269_v14 }
 0x4c3   :  { %1452 = vmatpush1.bf16.msra.mxu0 %v4275_v31  ;;  %1493 = vmatpush1.bf16.msra.mxu1 %v4281_v52 }
 0x4c4   :  { %1453 = vmatprep.subr.bf16.mxu0 %v4287_v13  ;;  %1494 = vmatprep.subr.bf16.mxu1 %v4293_v1 }
 0x4c7   :  { %1454 = vmatpush1.bf16.msra.mxu0 %v4299_v48  ;;  %1495 = vmatpush1.bf16.msra.mxu1 %v4305_v49 }
 0x4c8   :  { %1455 = vmatprep.subr.bf16.mxu0 %v4311_v50  ;;  %1496 = vmatprep.subr.bf16.mxu1 %v4317_v51 }
 0x4cb   :  { %1456 = vmatpush1.bf16.msra.mxu0 %v4323_v53  ;;  %1497 = vmatpush1.bf16.msra.mxu1 %v4329_v54 }
 0x4cc   :  { %1457 = vmatprep.subr.bf16.mxu0 %v4335_v55  ;;  %1498 = vmatprep.subr.bf16.mxu1 %v4341_v56 }
 0x4cf   :  { %1458 = vmatpush1.bf16.msra.mxu0 %v4347_v57  ;;  %1499 = vmatpush1.bf16.msra.mxu1 %v4353_v58 }
 0x4d0   :  { %1459 = vmatprep.subr.bf16.mxu0 %v4359_v59  ;;  %1500 = vmatprep.subr.bf16.mxu1 %v4365_v60 }
 0x4d3   :  { %1460 = vmatpush1.bf16.msra.mxu0 %v4371_v62  ;;  %1501 = vmatpush1.bf16.msra.mxu1 %v4377_v63 }
 0x4d4   :  { %1576 = vmatprep.subr.bf16.mxu0 %v4222_v46  ;;  %1617 = vmatprep.subr.bf16.mxu1 %v4228_v47 }
 0x589   :  { %v1348_v0 = vpop.f32.mrb[48].mxu0  ;;  %v1389_v2 = vpop.f32.mrb[48].mxu1 }
 0x58a   :  { %v1396_v4 = vadd.f32 %v1348_v0, %v5079_v3  ;;  %v1398_v45 = vadd.f32 %v1389_v2, %v5080_v5  ;;  %v1350_v16 = vpop.f32.mrb[49].mxu0  ;;  %v1391_v8 = vpop.f32.mrb[49].mxu1 }
 0x58b   :  { %v1397_v28 = vadd.f32 %v1350_v16, %v5081_v12  ;;  %v1399_v19 = vadd.f32 %v1391_v8, %v5082_v33  ;;  %v1352_v34 = vpop.f32.mrb[50].mxu0  ;;  %v1393_v30 = vpop.f32.mrb[50].mxu1 }
 0x58c   :  { %v1400_v61 = vpack.c.bf16 %v1396_v4, %v1396_v4  ;;  %v1353_v22 = vpop.f32.mrb[51].mxu0  ;;  %v1394_v7 = vpop.f32.mrb[51].mxu1  ;;  %v1402_v10 = vpack.c.bf16 %v1398_v45, %v1398_v45 }
 0x58d   :  { %v1401_v18 = vpack.c.bf16 %v1397_v28, %v1397_v28  ;;  %v1403_v9 = vpack.c.bf16 %v1399_v19, %v1399_v19  ;;  %v5083_v7 = vld [vmem:[#allocation13_spill] sm:$0xff] }
 0x58e   :  { %v2970_v20 = vmul.bf16 3216621497, %v1400_v61 }
 0x58f   :  { %v2971_v32 = vmul.bf16 3216621497, %v1401_v18  ;;  %v2972_v11 = vmul.bf16 3216621497, %v1403_v9 }
 0x590   :  { %3187 = vpow.bf16 %v2970_v20  ;;  %v5084_v20 = vld [vmem:[#allocation14_spill] sm:$0xff] }
 0x591   :  { %3189 = vpow.bf16 %v2971_v32 }
 0x592   :  { %3191 = vpow.bf16 %v2972_v11 }
 0x59b   :  { %v3188_v35 = vpop.eup %3187 }
 0x59c   :  { %v3190_v23 = vpop.eup %3189  ;;  %v1408_v25 = vadd.bf16 1065369472, %v3188_v35  ;;  %v5085_v35 = vld [vmem:[#allocation15_spill] sm:$0xff] }
 0x59d   :  { %v1415_v27 = vadd.bf16 1065369472, %v3190_v23  ;;  %v3192_v17 = vpop.eup %3191 }
 0x59e   :  { %3193 = vrcp.bf16 %v1408_v25  ;;  %v1423_v16 = vadd.bf16 1065369472, %v3192_v17  ;;  %v5086_v25 = vld [vmem:[#allocation16_spill] sm:$0xff] }
 0x59f   :  { %3195 = vrcp.bf16 %v1415_v27 }
 0x5a0   :  { %3197 = vtanh.bf16 %v1402_v10 }
 0x5a1   :  { %3199 = vrcp.bf16 %v1423_v16 }
 0x5a9   :  { %v3194_v26 = vpop.eup %3193 }
 0x5aa   :  { %v3196_v29 = vpop.eup %3195  ;;  %v1410_v0 = vmul.bf16 1065369472, %v3194_v26 }
 0x5ab   :  { %v3198_v2 = vpop.eup %3197  ;;  %v1417_v3 = vmul.bf16 1065369472, %v3196_v29 }
 0x5ac   :  { %v1428_v4 = vmul.bf16 %v3198_v2, %v1410_v0  ;;  %v3200_v33 = vpop.eup %3199 }
 0x5ad   :  { %v1426_v5 = vunpack.c.l.bf16 %v1417_v3  ;;  %v1425_v19 = vmul.bf16 1065369472, %v3200_v33 }
 0x5ae   :  { %v1429_v8 = vunpack.c.l.bf16 %v1428_v4 }
 0x5af   :  { %v1427_v12 = vmul.f32 %v1426_v5, %v4236_v24 }
 0x5b1   :  { %v4387_v28 = vadd.f32 %v1429_v8, %v1427_v12 }
 0x5b3   :  { %v1431_v45 = vpack.c.bf16 %v4387_v28, %v4387_v28 }
 0x5b5   :  { %3201 = vtanh.bf16 %v1431_v45 }
 0x5c0   :  { %v3202_v34 = vpop.eup %3201 }
 0x5c1   :  { %v1433_v30 = vmul.bf16 %v3202_v34, %v1425_v19 }
 0x5c3   :  { %1435 = vst [vmem:[#allocation2] sm:$0xf] %v1433_v30  ;;  %2973 = vst [vmem:[%s5019_s4 + $0x10] sm:$0xf] %v1433_v30 }
 0x5ca   :  { %v1438_v61 = vld [vmem:[#allocation2] sm:$0xf] }
 0x5cb   :  { %1478 = vmatmul.mubr.bf16.vlgmr.msra.gmra.mrb[52].mxu0 %v1438_v61  ;;  %1519 = vmatmul.mubr.bf16.vlgmr.msra.gmra.mrb[52].mxu1 %v1438_v61 }
 0x5cc   :  { %1577 = vmatpush1.bf16.msra.mxu0 %v4145_v43  ;;  %1618 = vmatpush1.bf16.msra.mxu1 %v4151_v36 }
 0x5cd   :  { %1578 = vmatprep.subr.bf16.mxu0 %v4157_v37  ;;  %1619 = vmatprep.subr.bf16.mxu1 %v4163_v38 }
 0x5ce   :  { %1608 = vmatprep.mubr.bf16.mxu0 %v5074_v21  ;;  %1649 = vmatprep.mubr.bf16.mxu1 %v5074_v21 }
 0x5d0   :  { %1579 = vmatpush1.bf16.msra.mxu0 %v4171_v39  ;;  %1620 = vmatpush1.bf16.msra.mxu1 %v4177_v40 }
 0x5d1   :  { %1580 = vmatprep.subr.bf16.mxu0 %v4183_v41  ;;  %1621 = vmatprep.subr.bf16.mxu1 %v4255_v15 }
 0x5d4   :  { %1581 = vmatpush1.bf16.msra.mxu0 %v4190_v42  ;;  %1622 = vmatpush1.bf16.msra.mxu1 %v4262_v6 }
 0x5d5   :  { %1582 = vmatprep.subr.bf16.mxu0 %v4197_v44  ;;  %1623 = vmatprep.subr.bf16.mxu1 %v4269_v14 }
 0x5d8   :  { %1583 = vmatpush1.bf16.msra.mxu0 %v4275_v31  ;;  %1624 = vmatpush1.bf16.msra.mxu1 %v4281_v52 }
 0x5d9   :  { %1584 = vmatprep.subr.bf16.mxu0 %v4287_v13  ;;  %1625 = vmatprep.subr.bf16.mxu1 %v4293_v1 }
 0x5dc   :  { %1585 = vmatpush1.bf16.msra.mxu0 %v4299_v48  ;;  %1626 = vmatpush1.bf16.msra.mxu1 %v4305_v49 }
 0x5dd   :  { %1586 = vmatprep.subr.bf16.mxu0 %v4311_v50  ;;  %1627 = vmatprep.subr.bf16.mxu1 %v4317_v51 }
 0x5e0   :  { %1587 = vmatpush1.bf16.msra.mxu0 %v4323_v53  ;;  %1628 = vmatpush1.bf16.msra.mxu1 %v4329_v54 }
 0x5e1   :  { %1588 = vmatprep.subr.bf16.mxu0 %v4335_v55  ;;  %1629 = vmatprep.subr.bf16.mxu1 %v4341_v56 }
 0x5e4   :  { %1589 = vmatpush1.bf16.msra.mxu0 %v4347_v57  ;;  %1630 = vmatpush1.bf16.msra.mxu1 %v4353_v58 }
 0x5e5   :  { %1590 = vmatprep.subr.bf16.mxu0 %v4359_v59  ;;  %1631 = vmatprep.subr.bf16.mxu1 %v4365_v60 }
 0x5e8   :  { %1591 = vmatpush1.bf16.msra.mxu0 %v4371_v62  ;;  %1632 = vmatpush1.bf16.msra.mxu1 %v4377_v63 }
 0x5e9   :  { %1707 = vmatprep.subr.bf16.mxu0 %v4222_v46  ;;  %1748 = vmatprep.subr.bf16.mxu1 %v4228_v47 }
 0x69e   :  { %v1479_v24 = vpop.f32.mrb[52].mxu0  ;;  %v1520_v22 = vpop.f32.mrb[52].mxu1 }
 0x69f   :  { %v1527_v18 = vadd.f32 %v1479_v24, %v5083_v7  ;;  %v1529_v32 = vadd.f32 %v1520_v22, %v5084_v20  ;;  %v1481_v9 = vpop.f32.mrb[53].mxu0  ;;  %v1522_v11 = vpop.f32.mrb[53].mxu1 }
 0x6a0   :  { %v1528_v23 = vadd.f32 %v1481_v9, %v5085_v35  ;;  %v1530_v10 = vadd.f32 %v1522_v11, %v5086_v25  ;;  %v1483_v27 = vpop.f32.mrb[54].mxu0  ;;  %v1524_v17 = vpop.f32.mrb[54].mxu1 }
 0x6a1   :  { %v1531_v26 = vpack.c.bf16 %v1527_v18, %v1527_v18  ;;  %v1484_v29 = vpop.f32.mrb[55].mxu0  ;;  %v1525_v0 = vpop.f32.mrb[55].mxu1  ;;  %v1533_v33 = vpack.c.bf16 %v1529_v32, %v1529_v32 }
 0x6a2   :  { %v1532_v2 = vpack.c.bf16 %v1528_v23, %v1528_v23  ;;  %v1534_v5 = vpack.c.bf16 %v1530_v10, %v1530_v10  ;;  %v5087_v0 = vld [vmem:[#allocation17_spill] sm:$0xff] }
 0x6a3   :  { %v2974_v3 = vmul.bf16 3216621497, %v1531_v26 }
 0x6a4   :  { %v2975_v4 = vmul.bf16 3216621497, %v1532_v2  ;;  %v2976_v16 = vmul.bf16 3216621497, %v1534_v5 }
 0x6a5   :  { %3203 = vpow.bf16 %v2974_v3  ;;  %v5088_v3 = vld [vmem:[#allocation18_spill] sm:$0xff] }
 0x6a6   :  { %3205 = vpow.bf16 %v2975_v4 }
 0x6a7   :  { %3207 = vpow.bf16 %v2976_v16 }
 0x6b0   :  { %v3204_v8 = vpop.eup %3203 }
 0x6b1   :  { %v3206_v12 = vpop.eup %3205  ;;  %v1539_v45 = vadd.bf16 1065369472, %v3204_v8  ;;  %v5089_v8 = vld [vmem:[#allocation19_spill] sm:$0xff] }
 0x6b2   :  { %v1546_v19 = vadd.bf16 1065369472, %v3206_v12  ;;  %v3208_v34 = vpop.eup %3207 }
 0x6b3   :  { %3209 = vrcp.bf16 %v1539_v45  ;;  %v1554_v9 = vadd.bf16 1065369472, %v3208_v34  ;;  %v5090_v45 = vld [vmem:[#allocation20_spill] sm:$0xff] }
 0x6b4   :  { %3211 = vrcp.bf16 %v1546_v19 }
 0x6b5   :  { %3213 = vtanh.bf16 %v1533_v33 }
 0x6b6   :  { %3215 = vrcp.bf16 %v1554_v9 }
 0x6be   :  { %v3210_v30 = vpop.eup %3209 }
 0x6bf   :  { %v3212_v61 = vpop.eup %3211  ;;  %v1541_v24 = vmul.bf16 1065369472, %v3210_v30 }
 0x6c0   :  { %v3214_v22 = vpop.eup %3213  ;;  %v1548_v7 = vmul.bf16 1065369472, %v3212_v61 }
 0x6c1   :  { %v1559_v18 = vmul.bf16 %v3214_v22, %v1541_v24  ;;  %v3216_v25 = vpop.eup %3215 }
 0x6c2   :  { %v1557_v20 = vunpack.c.l.bf16 %v1548_v7  ;;  %v1556_v10 = vmul.bf16 1065369472, %v3216_v25 }
 0x6c3   :  { %v1560_v11 = vunpack.c.l.bf16 %v1559_v18 }
 0x6c4   :  { %v1558_v35 = vmul.f32 %v1557_v20, %v4387_v28 }
 0x6c6   :  { %v4433_v23 = vadd.f32 %v1560_v11, %v1558_v35 }
 0x6c8   :  { %v1562_v32 = vpack.c.bf16 %v4433_v23, %v4433_v23 }
 0x6ca   :  { %3217 = vtanh.bf16 %v1562_v32 }
 0x6d5   :  { %v3218_v27 = vpop.eup %3217 }
 0x6d6   :  { %v1564_v17 = vmul.bf16 %v3218_v27, %v1556_v10 }
 0x6d8   :  { %1566 = vst [vmem:[#allocation2] sm:$0xf] %v1564_v17  ;;  %2977 = vst [vmem:[%s5019_s4 + $0x14] sm:$0xf] %v1564_v17 }
 0x6df   :  { %v1569_v26 = vld [vmem:[#allocation2] sm:$0xf] }
 0x6e0   :  { %1609 = vmatmul.mubr.bf16.vlgmr.msra.gmra.mrb[56].mxu0 %v1569_v26  ;;  %1650 = vmatmul.mubr.bf16.vlgmr.msra.gmra.mrb[56].mxu1 %v1569_v26 }
 0x6e1   :  { %1708 = vmatpush1.bf16.msra.mxu0 %v4145_v43  ;;  %1749 = vmatpush1.bf16.msra.mxu1 %v4151_v36 }
 0x6e2   :  { %1709 = vmatprep.subr.bf16.mxu0 %v4157_v37  ;;  %1750 = vmatprep.subr.bf16.mxu1 %v4163_v38 }
 0x6e3   :  { %1739 = vmatprep.mubr.bf16.mxu0 %v5074_v21  ;;  %1780 = vmatprep.mubr.bf16.mxu1 %v5074_v21 }
 0x6e5   :  { %1710 = vmatpush1.bf16.msra.mxu0 %v4171_v39  ;;  %1751 = vmatpush1.bf16.msra.mxu1 %v4177_v40 }
 0x6e6   :  { %1711 = vmatprep.subr.bf16.mxu0 %v4183_v41  ;;  %1752 = vmatprep.subr.bf16.mxu1 %v4255_v15 }
 0x6e9   :  { %1712 = vmatpush1.bf16.msra.mxu0 %v4190_v42  ;;  %1753 = vmatpush1.bf16.msra.mxu1 %v4262_v6 }
 0x6ea   :  { %1713 = vmatprep.subr.bf16.mxu0 %v4197_v44  ;;  %1754 = vmatprep.subr.bf16.mxu1 %v4269_v14 }
 0x6ed   :  { %1714 = vmatpush1.bf16.msra.mxu0 %v4275_v31  ;;  %1755 = vmatpush1.bf16.msra.mxu1 %v4281_v52 }
 0x6ee   :  { %1715 = vmatprep.subr.bf16.mxu0 %v4287_v13  ;;  %1756 = vmatprep.subr.bf16.mxu1 %v4293_v1 }
 0x6f1   :  { %1716 = vmatpush1.bf16.msra.mxu0 %v4299_v48  ;;  %1757 = vmatpush1.bf16.msra.mxu1 %v4305_v49 }
 0x6f2   :  { %1717 = vmatprep.subr.bf16.mxu0 %v4311_v50  ;;  %1758 = vmatprep.subr.bf16.mxu1 %v4317_v51 }
 0x6f5   :  { %1718 = vmatpush1.bf16.msra.mxu0 %v4323_v53  ;;  %1759 = vmatpush1.bf16.msra.mxu1 %v4329_v54 }
 0x6f6   :  { %1719 = vmatprep.subr.bf16.mxu0 %v4335_v55  ;;  %1760 = vmatprep.subr.bf16.mxu1 %v4341_v56 }
 0x6f9   :  { %1720 = vmatpush1.bf16.msra.mxu0 %v4347_v57  ;;  %1761 = vmatpush1.bf16.msra.mxu1 %v4353_v58 }
 0x6fa   :  { %1721 = vmatprep.subr.bf16.mxu0 %v4359_v59  ;;  %1762 = vmatprep.subr.bf16.mxu1 %v4365_v60 }
 0x6fd   :  { %1722 = vmatpush1.bf16.msra.mxu0 %v4371_v62  ;;  %1763 = vmatpush1.bf16.msra.mxu1 %v4377_v63 }
 0x6fe   :  { %1838 = vmatprep.subr.bf16.mxu0 %v4222_v46  ;;  %1879 = vmatprep.subr.bf16.mxu1 %v4228_v47 }
 0x7b3   :  { %v1610_v28 = vpop.f32.mrb[56].mxu0  ;;  %v1651_v29 = vpop.f32.mrb[56].mxu1 }
 0x7b4   :  { %v1658_v2 = vadd.f32 %v1610_v28, %v5087_v0  ;;  %v1660_v4 = vadd.f32 %v1651_v29, %v5088_v3  ;;  %v1612_v5 = vpop.f32.mrb[57].mxu0  ;;  %v1653_v16 = vpop.f32.mrb[57].mxu1 }
 0x7b5   :  { %v1659_v12 = vadd.f32 %v1612_v5, %v5089_v8  ;;  %v1661_v33 = vadd.f32 %v1653_v16, %v5090_v45  ;;  %v1614_v19 = vpop.f32.mrb[58].mxu0  ;;  %v1655_v34 = vpop.f32.mrb[58].mxu1 }
 0x7b6   :  { %v1662_v30 = vpack.c.bf16 %v1658_v2, %v1658_v2  ;;  %v1615_v61 = vpop.f32.mrb[59].mxu0  ;;  %v1656_v24 = vpop.f32.mrb[59].mxu1  ;;  %v1664_v25 = vpack.c.bf16 %v1660_v4, %v1660_v4 }
 0x7b7   :  { %v1663_v22 = vpack.c.bf16 %v1659_v12, %v1659_v12  ;;  %v1665_v20 = vpack.c.bf16 %v1661_v33, %v1661_v33  ;;  %v5091_v24 = vld [vmem:[#allocation21_spill] sm:$0xff] }
 0x7b8   :  { %v2978_v7 = vmul.bf16 3216621497, %v1662_v30 }
 0x7b9   :  { %v2979_v18 = vmul.bf16 3216621497, %v1663_v22  ;;  %v2980_v9 = vmul.bf16 3216621497, %v1665_v20 }
 0x7ba   :  { %3219 = vpow.bf16 %v2978_v7  ;;  %v5092_v7 = vld [vmem:[#allocation22_spill] sm:$0xff] }
 0x7bb   :  { %3221 = vpow.bf16 %v2979_v18 }
 0x7bc   :  { %3223 = vpow.bf16 %v2980_v9 }
 0x7c5   :  { %v3220_v11 = vpop.eup %3219 }
 0x7c6   :  { %v3222_v35 = vpop.eup %3221  ;;  %v1670_v32 = vadd.bf16 1065369472, %v3220_v11  ;;  %v5093_v11 = vld [vmem:[#allocation23_spill] sm:$0xff] }
 0x7c7   :  { %v1677_v10 = vadd.bf16 1065369472, %v3222_v35  ;;  %v3224_v27 = vpop.eup %3223 }
 0x7c8   :  { %3225 = vrcp.bf16 %v1670_v32  ;;  %v1685_v5 = vadd.bf16 1065369472, %v3224_v27  ;;  %v5094_v32 = vld [vmem:[#allocation24_spill] sm:$0xff] }
 0x7c9   :  { %3227 = vrcp.bf16 %v1677_v10 }
 0x7ca   :  { %3229 = vtanh.bf16 %v1664_v25 }
 0x7cb   :  { %3231 = vrcp.bf16 %v1685_v5 }
 0x7d3   :  { %v3226_v17 = vpop.eup %3225 }
 0x7d4   :  { %v3228_v26 = vpop.eup %3227  ;;  %v1672_v28 = vmul.bf16 1065369472, %v3226_v17 }
 0x7d5   :  { %v3230_v29 = vpop.eup %3229  ;;  %v1679_v0 = vmul.bf16 1065369472, %v3228_v26 }
 0x7d6   :  { %v1690_v2 = vmul.bf16 %v3230_v29, %v1672_v28  ;;  %v3232_v45 = vpop.eup %3231 }
 0x7d7   :  { %v1688_v3 = vunpack.c.l.bf16 %v1679_v0  ;;  %v1687_v33 = vmul.bf16 1065369472, %v3232_v45 }
 0x7d8   :  { %v1691_v16 = vunpack.c.l.bf16 %v1690_v2 }
 0x7d9   :  { %v1689_v8 = vmul.f32 %v1688_v3, %v4433_v23 }
 0x7db   :  { %v4479_v12 = vadd.f32 %v1691_v16, %v1689_v8 }
 0x7dd   :  { %v1693_v4 = vpack.c.bf16 %v4479_v12, %v4479_v12 }
 0x7df   :  { %3233 = vtanh.bf16 %v1693_v4 }
 0x7ea   :  { %v3234_v19 = vpop.eup %3233 }
 0x7eb   :  { %v1695_v34 = vmul.bf16 %v3234_v19, %v1687_v33 }
 0x7ed   :  { %1697 = vst [vmem:[#allocation2] sm:$0xf] %v1695_v34  ;;  %2981 = vst [vmem:[%s5019_s4 + $0x18] sm:$0xf] %v1695_v34 }
 0x7f4   :  { %v1700_v30 = vld [vmem:[#allocation2] sm:$0xf] }
 0x7f5   :  { %1740 = vmatmul.mubr.bf16.vlgmr.msra.gmra.mrb[60].mxu0 %v1700_v30  ;;  %1781 = vmatmul.mubr.bf16.vlgmr.msra.gmra.mrb[60].mxu1 %v1700_v30 }
 0x7f6   :  { %1839 = vmatpush1.bf16.msra.mxu0 %v4145_v43  ;;  %1880 = vmatpush1.bf16.msra.mxu1 %v4151_v36 }
 0x7f7   :  { %1840 = vmatprep.subr.bf16.mxu0 %v4157_v37  ;;  %1881 = vmatprep.subr.bf16.mxu1 %v4163_v38 }
 0x7f8   :  { %1870 = vmatprep.mubr.bf16.mxu0 %v5074_v21  ;;  %1911 = vmatprep.mubr.bf16.mxu1 %v5074_v21 }
 0x7fa   :  { %1841 = vmatpush1.bf16.msra.mxu0 %v4171_v39  ;;  %1882 = vmatpush1.bf16.msra.mxu1 %v4177_v40 }
 0x7fb   :  { %1842 = vmatprep.subr.bf16.mxu0 %v4183_v41  ;;  %1883 = vmatprep.subr.bf16.mxu1 %v4255_v15 }
 0x7fe   :  { %1843 = vmatpush1.bf16.msra.mxu0 %v4190_v42  ;;  %1884 = vmatpush1.bf16.msra.mxu1 %v4262_v6 }
 0x7ff   :  { %1844 = vmatprep.subr.bf16.mxu0 %v4197_v44  ;;  %1885 = vmatprep.subr.bf16.mxu1 %v4269_v14 }
 0x802   :  { %1845 = vmatpush1.bf16.msra.mxu0 %v4275_v31  ;;  %1886 = vmatpush1.bf16.msra.mxu1 %v4281_v52 }
 0x803   :  { %1846 = vmatprep.subr.bf16.mxu0 %v4287_v13  ;;  %1887 = vmatprep.subr.bf16.mxu1 %v4293_v1 }
 0x806   :  { %1847 = vmatpush1.bf16.msra.mxu0 %v4299_v48  ;;  %1888 = vmatpush1.bf16.msra.mxu1 %v4305_v49 }
 0x807   :  { %1848 = vmatprep.subr.bf16.mxu0 %v4311_v50  ;;  %1889 = vmatprep.subr.bf16.mxu1 %v4317_v51 }
 0x80a   :  { %1849 = vmatpush1.bf16.msra.mxu0 %v4323_v53  ;;  %1890 = vmatpush1.bf16.msra.mxu1 %v4329_v54 }
 0x80b   :  { %1850 = vmatprep.subr.bf16.mxu0 %v4335_v55  ;;  %1891 = vmatprep.subr.bf16.mxu1 %v4341_v56 }
 0x80e   :  { %1851 = vmatpush1.bf16.msra.mxu0 %v4347_v57  ;;  %1892 = vmatpush1.bf16.msra.mxu1 %v4353_v58 }
 0x80f   :  { %1852 = vmatprep.subr.bf16.mxu0 %v4359_v59  ;;  %1893 = vmatprep.subr.bf16.mxu1 %v4365_v60 }
 0x812   :  { %1853 = vmatpush1.bf16.msra.mxu0 %v4371_v62  ;;  %1894 = vmatpush1.bf16.msra.mxu1 %v4377_v63 }
 0x813   :  { %1969 = vmatprep.subr.bf16.mxu0 %v4222_v46  ;;  %2010 = vmatprep.subr.bf16.mxu1 %v4228_v47 }
 0x8c8   :  { %v1741_v23 = vpop.f32.mrb[60].mxu0  ;;  %v1782_v61 = vpop.f32.mrb[60].mxu1 }
 0x8c9   :  { %v1789_v22 = vadd.f32 %v1741_v23, %v5091_v24  ;;  %v1791_v18 = vadd.f32 %v1782_v61, %v5092_v7  ;;  %v1743_v20 = vpop.f32.mrb[61].mxu0  ;;  %v1784_v9 = vpop.f32.mrb[61].mxu1 }
 0x8ca   :  { %v1790_v35 = vadd.f32 %v1743_v20, %v5093_v11  ;;  %v1792_v25 = vadd.f32 %v1784_v9, %v5094_v32  ;;  %v1745_v10 = vpop.f32.mrb[62].mxu0  ;;  %v1786_v27 = vpop.f32.mrb[62].mxu1 }
 0x8cb   :  { %v1793_v17 = vpack.c.bf16 %v1789_v22, %v1789_v22  ;;  %v1746_v26 = vpop.f32.mrb[63].mxu0  ;;  %v1787_v28 = vpop.f32.mrb[63].mxu1  ;;  %v1795_v45 = vpack.c.bf16 %v1791_v18, %v1791_v18 }
 0x8cc   :  { %v1794_v29 = vpack.c.bf16 %v1790_v35, %v1790_v35  ;;  %v1796_v3 = vpack.c.bf16 %v1792_v25, %v1792_v25  ;;  %v5098_v26 = vld [vmem:[#allocation28_spill] sm:$0xff] }
 0x8cd   :  { %v2982_v0 = vmul.bf16 3216621497, %v1793_v17 }
 0x8ce   :  { %v2983_v2 = vmul.bf16 3216621497, %v1794_v29  ;;  %v2984_v5 = vmul.bf16 3216621497, %v1796_v3 }
 0x8cf   :  { %3235 = vpow.bf16 %v2982_v0 }
 0x8d0   :  { %3237 = vpow.bf16 %v2983_v2 }
 0x8d1   :  { %3239 = vpow.bf16 %v2984_v5 }
 0x8da   :  { %v3236_v16 = vpop.eup %3235 }
 0x8db   :  { %v3238_v8 = vpop.eup %3237  ;;  %v1801_v4 = vadd.bf16 1065369472, %v3236_v16 }
 0x8dc   :  { %v1808_v33 = vadd.bf16 1065369472, %v3238_v8  ;;  %v3240_v19 = vpop.eup %3239 }
 0x8dd   :  { %3241 = vrcp.bf16 %v1801_v4  ;;  %v1816_v20 = vadd.bf16 1065369472, %v3240_v19 }
 0x8de   :  { %3243 = vrcp.bf16 %v1808_v33 }
 0x8df   :  { %3245 = vtanh.bf16 %v1795_v45 }
 0x8e0   :  { %3247 = vrcp.bf16 %v1816_v20 }
 0x8e8   :  { %v3242_v34 = vpop.eup %3241 }
 0x8e9   :  { %v3244_v30 = vpop.eup %3243  ;;  %v1803_v23 = vmul.bf16 1065369472, %v3242_v34 }
 0x8ea   :  { %v3246_v61 = vpop.eup %3245  ;;  %v1810_v24 = vmul.bf16 1065369472, %v3244_v30 }
 0x8eb   :  { %v1821_v22 = vmul.bf16 %v3246_v61, %v1803_v23  ;;  %v3248_v32 = vpop.eup %3247 }
 0x8ec   :  { %v1819_v7 = vunpack.c.l.bf16 %v1810_v24  ;;  %v1818_v25 = vmul.bf16 1065369472, %v3248_v32 }
 0x8ed   :  { %v1822_v9 = vunpack.c.l.bf16 %v1821_v22 }
 0x8ee   :  { %v1820_v11 = vmul.f32 %v1819_v7, %v4479_v12 }
 0x8f0   :  { %v4525_v35 = vadd.f32 %v1822_v9, %v1820_v11 }
 0x8f2   :  { %v1824_v18 = vpack.c.bf16 %v4525_v35, %v4525_v35 }
 0x8f4   :  { %3249 = vtanh.bf16 %v1824_v18 }
 0x8ff   :  { %v3250_v10 = vpop.eup %3249 }
 0x900   :  { %v1826_v27 = vmul.bf16 %v3250_v10, %v1818_v25 }
 0x902   :  { %2985 = vst [vmem:[%s5019_s4 + $0x1c] sm:$0xf] %v1826_v27  ;;  %1828 = vst [vmem:[#allocation2] sm:$0xf] %v1826_v27 }
 0x909   :  { %v1831_v17 = vld [vmem:[#allocation2] sm:$0xf] }
 0x90a   :  { %1871 = vmatmul.mubr.bf16.vlgmr.msra.gmra.mrb[64].mxu0 %v1831_v17  ;;  %1912 = vmatmul.mubr.bf16.vlgmr.msra.gmra.mrb[64].mxu1 %v1831_v17 }
 0x90b   :  { %1970 = vmatpush1.bf16.msra.mxu0 %v4145_v43  ;;  %2011 = vmatpush1.bf16.msra.mxu1 %v4151_v36 }
 0x90c   :  { %1971 = vmatprep.subr.bf16.mxu0 %v4157_v37  ;;  %2012 = vmatprep.subr.bf16.mxu1 %v4163_v38  ;;  %v5095_v37 = vld [vmem:[#allocation25_spill] sm:$0xff] }
 0x90d   :  { %2001 = vmatprep.mubr.bf16.mxu0 %v5074_v21  ;;  %2042 = vmatprep.mubr.bf16.mxu1 %v5074_v21 }
 0x90f   :  { %1972 = vmatpush1.bf16.msra.mxu0 %v4171_v39  ;;  %2013 = vmatpush1.bf16.msra.mxu1 %v4177_v40  ;;  %v5096_v39 = vld [vmem:[#allocation26_spill] sm:$0xff] }
 0x910   :  { %1973 = vmatprep.subr.bf16.mxu0 %v4183_v41  ;;  %2014 = vmatprep.subr.bf16.mxu1 %v4255_v15 }
 0x913   :  { %1974 = vmatpush1.bf16.msra.mxu0 %v4190_v42  ;;  %2015 = vmatpush1.bf16.msra.mxu1 %v4262_v6 }
 0x914   :  { %1975 = vmatprep.subr.bf16.mxu0 %v4197_v44  ;;  %2016 = vmatprep.subr.bf16.mxu1 %v4269_v14  ;;  %v5097_v44 = vld [vmem:[#allocation27_spill] sm:$0xff] }
 0x917   :  { %1976 = vmatpush1.bf16.msra.mxu0 %v4275_v31  ;;  %2017 = vmatpush1.bf16.msra.mxu1 %v4281_v52 }
 0x918   :  { %1977 = vmatprep.subr.bf16.mxu0 %v4287_v13  ;;  %2018 = vmatprep.subr.bf16.mxu1 %v4293_v1 }
 0x91b   :  { %1978 = vmatpush1.bf16.msra.mxu0 %v4299_v48  ;;  %2019 = vmatpush1.bf16.msra.mxu1 %v4305_v49 }
 0x91c   :  { %1979 = vmatprep.subr.bf16.mxu0 %v4311_v50  ;;  %2020 = vmatprep.subr.bf16.mxu1 %v4317_v51 }
 0x91f   :  { %1980 = vmatpush1.bf16.msra.mxu0 %v4323_v53  ;;  %2021 = vmatpush1.bf16.msra.mxu1 %v4329_v54 }
 0x920   :  { %1981 = vmatprep.subr.bf16.mxu0 %v4335_v55  ;;  %2022 = vmatprep.subr.bf16.mxu1 %v4341_v56 }
 0x923   :  { %1982 = vmatpush1.bf16.msra.mxu0 %v4347_v57  ;;  %2023 = vmatpush1.bf16.msra.mxu1 %v4353_v58 }
 0x924   :  { %1983 = vmatprep.subr.bf16.mxu0 %v4359_v59  ;;  %2024 = vmatprep.subr.bf16.mxu1 %v4365_v60 }
 0x927   :  { %1984 = vmatpush1.bf16.msra.mxu0 %v4371_v62  ;;  %2025 = vmatpush1.bf16.msra.mxu1 %v4377_v63 }
 0x928   :  { %2100 = vmatprep.subr.bf16.mxu0 %v4222_v46  ;;  %2141 = vmatprep.subr.bf16.mxu1 %v4228_v47 }
 0x9dd   :  { %v1872_v43 = vpop.f32.mrb[64].mxu0  ;;  %v1913_v36 = vpop.f32.mrb[64].mxu1 }
 0x9de   :  { %v1920_v38 = vadd.f32 %v1872_v43, %v5095_v37  ;;  %v1922_v40 = vadd.f32 %v1913_v36, %v5096_v39  ;;  %v1874_v41 = vpop.f32.mrb[65].mxu0  ;;  %v1915_v42 = vpop.f32.mrb[65].mxu1  ;;  %v4587_v39 = vld [vmem:[%s5017_s2 + $0x8] ss:$16 sps:$4 sm:$0xff]  }
 0x9df   :  { %v1921_v12 = vadd.f32 %v1874_v41, %v5097_v44  ;;  %v1923_v28 = vadd.f32 %v1915_v42, %v5098_v26  ;;  %v1876_v29 = vpop.f32.mrb[66].mxu0  ;;  %v1917_v0 = vpop.f32.mrb[66].mxu1  ;;  %v4599_v41 = vld [vmem:[%s5017_s2 + $0x2c] ss:$16 sps:$4 sm:$0xff]   ;;  %v4607_v42 = vld [vmem:[%s5017_s2 + $0x20] ss:$16 sps:$4 sm:$0xff]  }
 0x9e0   :  { %v1924_v2 = vpack.c.bf16 %v1920_v38, %v1920_v38  ;;  %v1877_v3 = vpop.f32.mrb[67].mxu0  ;;  %v1918_v5 = vpop.f32.mrb[67].mxu1  ;;  %v1926_v34 = vpack.c.bf16 %v1922_v40, %v1922_v40  ;;  %v4593_v40 = vld [vmem:[%s5017_s2 + $0x24] ss:$16 sps:$4 sm:$0xff]   ;;  %v4613_v44 = vld [vmem:[%s5017_s2 + $0x28] ss:$16 sps:$4 sm:$0xff]  }
 0x9e1   :  { %v1925_v46 = vpack.c.bf16 %v1921_v12, %v1921_v12  ;;  %v1927_v8 = vpack.c.bf16 %v1923_v28, %v1923_v28  ;;  %v4619_v12 = vld [vmem:[%s5017_s2 + $0x44] ss:$16 sps:$4 sm:$0xff]   ;;  %v4626_v26 = vld [vmem:[%s5017_s2 + $0x40] ss:$16 sps:$4 sm:$0xff]  }
 0x9e2   :  { %v2986_v16 = vmul.bf16 3216621497, %v1924_v2  ;;  %v4633_v28 = vld [vmem:[%s5017_s2 + $0x64] ss:$16 sps:$4 sm:$0xff]  }
 0x9e3   :  { %v2987_v47 = vmul.bf16 3216621497, %v1925_v46  ;;  %v2988_v4 = vmul.bf16 3216621497, %v1927_v8 }
 0x9e4   :  { %3251 = vpow.bf16 %v2986_v16 }
 0x9e5   :  { %3253 = vpow.bf16 %v2987_v47 }
 0x9e6   :  { %3255 = vpow.bf16 %v2988_v4 }
 0x9ef   :  { %v3252_v45 = vpop.eup %3251 }
 0x9f0   :  { %v3254_v33 = vpop.eup %3253  ;;  %v1932_v19 = vadd.bf16 1065369472, %v3252_v45 }
 0x9f1   :  { %v1939_v30 = vadd.bf16 1065369472, %v3254_v33  ;;  %v3256_v23 = vpop.eup %3255 }
 0x9f2   :  { %3257 = vrcp.bf16 %v1932_v19  ;;  %v1947_v18 = vadd.bf16 1065369472, %v3256_v23 }
 0x9f3   :  { %3259 = vrcp.bf16 %v1939_v30 }
 0x9f4   :  { %3261 = vtanh.bf16 %v1926_v34 }
 0x9f5   :  { %3263 = vrcp.bf16 %v1947_v18 }
 0x9fd   :  { %v3258_v61 = vpop.eup %3257 }
 0x9fe   :  { %v3260_v24 = vpop.eup %3259  ;;  %v1934_v22 = vmul.bf16 1065369472, %v3258_v61 }
 0x9ff   :  { %v3262_v7 = vpop.eup %3261  ;;  %v1941_v20 = vmul.bf16 1065369472, %v3260_v24 }
 0xa00   :  { %v1952_v9 = vmul.bf16 %v3262_v7, %v1934_v22  ;;  %v3264_v17 = vpop.eup %3263 }
 0xa01   :  { %v1950_v11 = vunpack.c.l.bf16 %v1941_v20  ;;  %v1949_v43 = vmul.bf16 1065369472, %v3264_v17  ;;  %v4705_v17 = vld [vmem:[%s5017_s2 + $0x6c] ss:$16 sps:$4 sm:$0xff]  }
 0xa02   :  { %v1953_v32 = vunpack.c.l.bf16 %v1952_v9 }
 0xa03   :  { %v1951_v25 = vmul.f32 %v1950_v11, %v4525_v35  ;;  %v4581_v35 = vld [vmem:[%s5017_s2] ss:$16 sps:$4 sm:$0xff]  }
 0xa05   :  { %v4571_v10 = vadd.f32 %v1953_v32, %v1951_v25 }
 0xa07   :  { %v1955_v27 = vpack.c.bf16 %v4571_v10, %v4571_v10 }
 0xa09   :  { %3265 = vtanh.bf16 %v1955_v27  ;;  %v4698_v27 = vld [vmem:[%s5017_s2 + $0x48] ss:$16 sps:$4 sm:$0xff]  }
 0xa14   :  { %v3266_v36 = vpop.eup %3265 }
 0xa15   :  { %v1957_v37 = vmul.bf16 %v3266_v36, %v1949_v43  ;;  %v4711_v43 = vld [vmem:[%s5017_s2 + $0x60] ss:$16 sps:$4 sm:$0xff]   ;;  %v4717_v36 = vld [vmem:[%s5017_s2 + $0x68] ss:$16 sps:$4 sm:$0xff]  }
 0xa17   :  { %2989 = vst [vmem:[%s5019_s4 + $0x20] sm:$0xf] %v1957_v37  ;;  %1959 = vst [vmem:[#allocation2] sm:$0xf] %v1957_v37  ;;  %v4723_v37 = vld [vmem:[%s5017_s2 + $0x84] ss:$16 sps:$4 sm:$0xff]  }
 0xa1e   :  { %v1962_v38 = vld [vmem:[#allocation2] sm:$0xf] }
 0xa1f   :  { %2002 = vmatmul.mubr.bf16.vlgmr.msra.gmra.mrb[68].mxu0 %v1962_v38  ;;  %2043 = vmatmul.mubr.bf16.vlgmr.msra.gmra.mrb[68].mxu1 %v1962_v38  ;;  %v4729_v38 = vld [vmem:[%s5017_s2 + $0x8c] ss:$16 sps:$4 sm:$0xff]  }
 0xa20   :  { %2101 = vmatpush1.bf16.msra.mxu0 %v4581_v35  ;;  %2142 = vmatpush1.bf16.msra.mxu1 %v4587_v39 }
 0xa21   :  { %2102 = vmatprep.subr.bf16.mxu0 %v4593_v40  ;;  %2143 = vmatprep.subr.bf16.mxu1 %v4599_v41 }
 0xa22   :  { %2132 = vmatprep.mubr.bf16.mxu0 %v5074_v21  ;;  %2173 = vmatprep.mubr.bf16.mxu1 %v5074_v21 }
 0xa24   :  { %2103 = vmatpush1.bf16.msra.mxu0 %v4607_v42  ;;  %2144 = vmatpush1.bf16.msra.mxu1 %v4613_v44 }
 0xa25   :  { %2104 = vmatprep.subr.bf16.mxu0 %v4619_v12  ;;  %2145 = vmatprep.subr.bf16.mxu1 %v4255_v15  ;;  %v4658_v15 = vld [vmem:[%s5017_s2 + $0x4] ss:$16 sps:$4 sm:$0xff]  }
 0xa28   :  { %2105 = vmatpush1.bf16.msra.mxu0 %v4626_v26  ;;  %2146 = vmatpush1.bf16.msra.mxu1 %v4262_v6  ;;  %v4664_v6 = vld [vmem:[%s5017_s2 + $0xc] ss:$16 sps:$4 sm:$0xff]  }
 0xa29   :  { %2106 = vmatprep.subr.bf16.mxu0 %v4633_v28  ;;  %2147 = vmatprep.subr.bf16.mxu1 %v4269_v14 }
 0xa2c   :  { %2107 = vmatpush1.bf16.msra.mxu0 %v4275_v31  ;;  %2148 = vmatpush1.bf16.msra.mxu1 %v4281_v52  ;;  %v5099_v52 = vld [vmem:[#allocation29_spill] sm:$0xff] }
 0xa2d   :  { %2108 = vmatprep.subr.bf16.mxu0 %v4287_v13  ;;  %2149 = vmatprep.subr.bf16.mxu1 %v4293_v1  ;;  %v5100_v1 = vld [vmem:[#allocation30_spill] sm:$0xff] }
 0xa30   :  { %2109 = vmatpush1.bf16.msra.mxu0 %v4299_v48  ;;  %2150 = vmatpush1.bf16.msra.mxu1 %v4305_v49 }
 0xa31   :  { %2110 = vmatprep.subr.bf16.mxu0 %v4311_v50  ;;  %2151 = vmatprep.subr.bf16.mxu1 %v4317_v51  ;;  %v5101_v51 = vld [vmem:[#allocation31_spill] sm:$0xff] }
 0xa34   :  { %2111 = vmatpush1.bf16.msra.mxu0 %v4323_v53  ;;  %2152 = vmatpush1.bf16.msra.mxu1 %v4329_v54  ;;  %v5102_v54 = vld [vmem:[#allocation32_spill] sm:$0xff] }
 0xa35   :  { %2112 = vmatprep.subr.bf16.mxu0 %v4335_v55  ;;  %2153 = vmatprep.subr.bf16.mxu1 %v4341_v56 }
 0xa38   :  { %2113 = vmatpush1.bf16.msra.mxu0 %v4347_v57  ;;  %2154 = vmatpush1.bf16.msra.mxu1 %v4353_v58 }
 0xa39   :  { %2114 = vmatprep.subr.bf16.mxu0 %v4359_v59  ;;  %2155 = vmatprep.subr.bf16.mxu1 %v4365_v60 }
 0xa3c   :  { %2115 = vmatpush1.bf16.msra.mxu0 %v4371_v62  ;;  %2156 = vmatpush1.bf16.msra.mxu1 %v4377_v63 }
 0xa3d   :  { %2231 = vmatprep.subr.bf16.mxu0 %v4658_v15  ;;  %2272 = vmatprep.subr.bf16.mxu1 %v4664_v6 }
 0xaf2   :  { %v2003_v14 = vpop.f32.mrb[68].mxu0  ;;  %v2044_v31 = vpop.f32.mrb[68].mxu1 }
 0xaf3   :  { %v2051_v13 = vadd.f32 %v2003_v14, %v5099_v52  ;;  %v2053_v48 = vadd.f32 %v2044_v31, %v5100_v1  ;;  %v2005_v49 = vpop.f32.mrb[69].mxu0  ;;  %v2046_v50 = vpop.f32.mrb[69].mxu1  ;;  %v4735_v14 = vld [vmem:[%s5017_s2 + $0x80] ss:$16 sps:$4 sm:$0xff]   ;;  %v4741_v31 = vld [vmem:[%s5017_s2 + $0x88] ss:$16 sps:$4 sm:$0xff]  }
 0xaf4   :  { %v2052_v53 = vadd.f32 %v2005_v49, %v5101_v51  ;;  %v2054_v55 = vadd.f32 %v2046_v50, %v5102_v54  ;;  %v2007_v56 = vpop.f32.mrb[70].mxu0  ;;  %v2048_v57 = vpop.f32.mrb[70].mxu1  ;;  %v4747_v52 = vld [vmem:[%s5017_s2 + $0xa4] ss:$16 sps:$4 sm:$0xff]   ;;  %v4759_v1 = vld [vmem:[%s5017_s2 + $0xa0] ss:$16 sps:$4 sm:$0xff]  }
 0xaf5   :  { %v2055_v58 = vpack.c.bf16 %v2051_v13, %v2051_v13  ;;  %v2008_v59 = vpop.f32.mrb[71].mxu0  ;;  %v2049_v60 = vpop.f32.mrb[71].mxu1  ;;  %v2057_v16 = vpack.c.bf16 %v2053_v48, %v2053_v48  ;;  %v4753_v13 = vld [vmem:[%s5017_s2 + $0xac] ss:$16 sps:$4 sm:$0xff]   ;;  %v4765_v48 = vld [vmem:[%s5017_s2 + $0xa8] ss:$16 sps:$4 sm:$0xff]  }
 0xaf6   :  { %v2056_v62 = vpack.c.bf16 %v2052_v53, %v2052_v53  ;;  %v2058_v0 = vpack.c.bf16 %v2054_v55, %v2054_v55  ;;  %v4771_v49 = vld [vmem:[%s5017_s2 + $0xc4] ss:$16 sps:$4 sm:$0xff]   ;;  %v4777_v50 = vld [vmem:[%s5017_s2 + $0xcc] ss:$16 sps:$4 sm:$0xff]   ;;  %v4783_v51 = vld [vmem:[%s5017_s2 + $0xc0] ss:$16 sps:$4 sm:$0xff]  }
 0xaf7   :  { %v2990_v63 = vmul.bf16 3216621497, %v2055_v58  ;;  %v4789_v53 = vld [vmem:[%s5017_s2 + $0xc8] ss:$16 sps:$4 sm:$0xff]   ;;  %v4795_v54 = vld [vmem:[%s5017_s2 + $0xe4] ss:$16 sps:$4 sm:$0xff]  }
 0xaf8   :  { %v2991_v29 = vmul.bf16 3216621497, %v2056_v62  ;;  %v2992_v2 = vmul.bf16 3216621497, %v2058_v0  ;;  %v4801_v55 = vld [vmem:[%s5017_s2 + $0xec] ss:$16 sps:$4 sm:$0xff]  }
 0xaf9   :  { %3267 = vpow.bf16 %v2990_v63  ;;  %v4807_v56 = vld [vmem:[%s5017_s2 + $0xe0] ss:$16 sps:$4 sm:$0xff]   ;;  %v4813_v57 = vld [vmem:[%s5017_s2 + $0xe8] ss:$16 sps:$4 sm:$0xff]  }
 0xafa   :  { %3269 = vpow.bf16 %v2991_v29  ;;  %v5103_v60 = vld [vmem:[#allocation33_spill] sm:$0xff]  ;;  %v5104_v63 = vld [vmem:[#allocation34_spill] sm:$0xff] }
 0xafb   :  { %3271 = vpow.bf16 %v2992_v2 }
 0xb04   :  { %v3268_v3 = vpop.eup %3267 }
 0xb05   :  { %v3270_v5 = vpop.eup %3269  ;;  %v2063_v46 = vadd.bf16 1065369472, %v3268_v3  ;;  %v5105_v3 = vld [vmem:[#allocation35_spill] sm:$0xff] }
 0xb06   :  { %v2070_v47 = vadd.bf16 1065369472, %v3270_v5  ;;  %v3272_v8 = vpop.eup %3271 }
 0xb07   :  { %3273 = vrcp.bf16 %v2063_v46  ;;  %v2078_v61 = vadd.bf16 1065369472, %v3272_v8  ;;  %v5106_v46 = vld [vmem:[#allocation36_spill] sm:$0xff] }
 0xb08   :  { %3275 = vrcp.bf16 %v2070_v47 }
 0xb09   :  { %3277 = vtanh.bf16 %v2057_v16 }
 0xb0a   :  { %3279 = vrcp.bf16 %v2078_v61 }
 0xb12   :  { %v3274_v4 = vpop.eup %3273 }
 0xb13   :  { %v3276_v45 = vpop.eup %3275  ;;  %v2065_v33 = vmul.bf16 1065369472, %v3274_v4 }
 0xb14   :  { %v3278_v19 = vpop.eup %3277  ;;  %v2072_v34 = vmul.bf16 1065369472, %v3276_v45 }
 0xb15   :  { %v2083_v30 = vmul.bf16 %v3278_v19, %v2065_v33  ;;  %v3280_v9 = vpop.eup %3279 }
 0xb16   :  { %v2081_v23 = vunpack.c.l.bf16 %v2072_v34  ;;  %v2080_v11 = vmul.bf16 1065369472, %v3280_v9 }
 0xb17   :  { %v2084_v24 = vunpack.c.l.bf16 %v2083_v30 }
 0xb18   :  { %v2082_v22 = vmul.f32 %v2081_v23, %v4571_v10  ;;  %v4691_v10 = vld [vmem:[%s5017_s2 + $0x4c] ss:$16 sps:$4 sm:$0xff]  }
 0xb1a   :  { %v4672_v7 = vadd.f32 %v2084_v24, %v2082_v22 }
 0xb1c   :  { %v2086_v20 = vpack.c.bf16 %v4672_v7, %v4672_v7 }
 0xb1e   :  { %3281 = vtanh.bf16 %v2086_v20 }
 0xb29   :  { %v3282_v18 = vpop.eup %3281 }
 0xb2a   :  { %v2088_v32 = vmul.bf16 %v3282_v18, %v2080_v11 }
 0xb2c   :  { %2993 = vst [vmem:[%s5019_s4 + $0x24] sm:$0xf] %v2088_v32  ;;  %2090 = vst [vmem:[#allocation2] sm:$0xf] %v2088_v32 }
 0xb33   :  { %v2093_v25 = vld [vmem:[#allocation2] sm:$0xf] }
 0xb34   :  { %2133 = vmatmul.mubr.bf16.vlgmr.msra.gmra.mrb[72].mxu0 %v2093_v25  ;;  %2174 = vmatmul.mubr.bf16.vlgmr.msra.gmra.mrb[72].mxu1 %v2093_v25 }
 0xb35   :  { %2232 = vmatpush1.bf16.msra.mxu0 %v4581_v35  ;;  %2273 = vmatpush1.bf16.msra.mxu1 %v4587_v39 }
 0xb36   :  { %2233 = vmatprep.subr.bf16.mxu0 %v4593_v40  ;;  %2274 = vmatprep.subr.bf16.mxu1 %v4599_v41 }
 0xb37   :  { %2263 = vmatprep.mubr.bf16.mxu0 %v5074_v21  ;;  %2304 = vmatprep.mubr.bf16.mxu1 %v5074_v21 }
 0xb39   :  { %2234 = vmatpush1.bf16.msra.mxu0 %v4607_v42  ;;  %2275 = vmatpush1.bf16.msra.mxu1 %v4613_v44 }
 0xb3a   :  { %2235 = vmatprep.subr.bf16.mxu0 %v4619_v12  ;;  %2276 = vmatprep.subr.bf16.mxu1 %v4691_v10 }
 0xb3d   :  { %2236 = vmatpush1.bf16.msra.mxu0 %v4626_v26  ;;  %2277 = vmatpush1.bf16.msra.mxu1 %v4698_v27 }
 0xb3e   :  { %2237 = vmatprep.subr.bf16.mxu0 %v4633_v28  ;;  %2278 = vmatprep.subr.bf16.mxu1 %v4705_v17 }
 0xb41   :  { %2238 = vmatpush1.bf16.msra.mxu0 %v4711_v43  ;;  %2279 = vmatpush1.bf16.msra.mxu1 %v4717_v36 }
 0xb42   :  { %2239 = vmatprep.subr.bf16.mxu0 %v4723_v37  ;;  %2280 = vmatprep.subr.bf16.mxu1 %v4729_v38 }
 0xb45   :  { %2240 = vmatpush1.bf16.msra.mxu0 %v4735_v14  ;;  %2281 = vmatpush1.bf16.msra.mxu1 %v4741_v31 }
 0xb46   :  { %2241 = vmatprep.subr.bf16.mxu0 %v4747_v52  ;;  %2282 = vmatprep.subr.bf16.mxu1 %v4753_v13 }
 0xb49   :  { %2242 = vmatpush1.bf16.msra.mxu0 %v4759_v1  ;;  %2283 = vmatpush1.bf16.msra.mxu1 %v4765_v48 }
 0xb4a   :  { %2243 = vmatprep.subr.bf16.mxu0 %v4771_v49  ;;  %2284 = vmatprep.subr.bf16.mxu1 %v4777_v50 }
 0xb4d   :  { %2244 = vmatpush1.bf16.msra.mxu0 %v4783_v51  ;;  %2285 = vmatpush1.bf16.msra.mxu1 %v4789_v53 }
 0xb4e   :  { %2245 = vmatprep.subr.bf16.mxu0 %v4795_v54  ;;  %2286 = vmatprep.subr.bf16.mxu1 %v4801_v55 }
 0xb51   :  { %2246 = vmatpush1.bf16.msra.mxu0 %v4807_v56  ;;  %2287 = vmatpush1.bf16.msra.mxu1 %v4813_v57 }
 0xb52   :  { %2362 = vmatprep.subr.bf16.mxu0 %v4658_v15  ;;  %2403 = vmatprep.subr.bf16.mxu1 %v4664_v6 }
 0xc07   :  { %v2134_v58 = vpop.f32.mrb[72].mxu0  ;;  %v2175_v59 = vpop.f32.mrb[72].mxu1 }
 0xc08   :  { %v2182_v62 = vadd.f32 %v2134_v58, %v5103_v60  ;;  %v2184_v29 = vadd.f32 %v2175_v59, %v5104_v63  ;;  %v2136_v0 = vpop.f32.mrb[73].mxu0  ;;  %v2177_v2 = vpop.f32.mrb[73].mxu1 }
 0xc09   :  { %v2183_v5 = vadd.f32 %v2136_v0, %v5105_v3  ;;  %v2185_v16 = vadd.f32 %v2177_v2, %v5106_v46  ;;  %v2138_v47 = vpop.f32.mrb[74].mxu0  ;;  %v2179_v8 = vpop.f32.mrb[74].mxu1 }
 0xc0a   :  { %v2186_v4 = vpack.c.bf16 %v2182_v62, %v2182_v62  ;;  %v2139_v45 = vpop.f32.mrb[75].mxu0  ;;  %v2180_v33 = vpop.f32.mrb[75].mxu1  ;;  %v2188_v9 = vpack.c.bf16 %v2184_v29, %v2184_v29 }
 0xc0b   :  { %v2187_v19 = vpack.c.bf16 %v2183_v5, %v2183_v5  ;;  %v2189_v23 = vpack.c.bf16 %v2185_v16, %v2185_v16  ;;  %v5107_v33 = vld [vmem:[#allocation37_spill] sm:$0xff] }
 0xc0c   :  { %v2994_v34 = vmul.bf16 3216621497, %v2186_v4 }
 0xc0d   :  { %v2995_v30 = vmul.bf16 3216621497, %v2187_v19  ;;  %v2996_v61 = vmul.bf16 3216621497, %v2189_v23 }
 0xc0e   :  { %3283 = vpow.bf16 %v2994_v34  ;;  %v5108_v34 = vld [vmem:[#allocation38_spill] sm:$0xff] }
 0xc0f   :  { %3285 = vpow.bf16 %v2995_v30 }
 0xc10   :  { %3287 = vpow.bf16 %v2996_v61 }
 0xc19   :  { %v3284_v24 = vpop.eup %3283 }
 0xc1a   :  { %v3286_v22 = vpop.eup %3285  ;;  %v2194_v20 = vadd.bf16 1065369472, %v3284_v24  ;;  %v5109_v24 = vld [vmem:[#allocation39_spill] sm:$0xff] }
 0xc1b   :  { %v2201_v11 = vadd.bf16 1065369472, %v3286_v22  ;;  %v3288_v18 = vpop.eup %3287 }
 0xc1c   :  { %3289 = vrcp.bf16 %v2194_v20  ;;  %v2209_v0 = vadd.bf16 1065369472, %v3288_v18  ;;  %v5110_v20 = vld [vmem:[#allocation40_spill] sm:$0xff] }
 0xc1d   :  { %3291 = vrcp.bf16 %v2201_v11 }
 0xc1e   :  { %3293 = vtanh.bf16 %v2188_v9 }
 0xc1f   :  { %3295 = vrcp.bf16 %v2209_v0 }
 0xc27   :  { %v3290_v32 = vpop.eup %3289 }
 0xc28   :  { %v3292_v25 = vpop.eup %3291  ;;  %v2196_v58 = vmul.bf16 1065369472, %v3290_v32 }
 0xc29   :  { %v3294_v59 = vpop.eup %3293  ;;  %v2203_v60 = vmul.bf16 1065369472, %v3292_v25 }
 0xc2a   :  { %v2214_v62 = vmul.bf16 %v3294_v59, %v2196_v58  ;;  %v3296_v46 = vpop.eup %3295 }
 0xc2b   :  { %v2212_v63 = vunpack.c.l.bf16 %v2203_v60  ;;  %v2211_v16 = vmul.bf16 1065369472, %v3296_v46 }
 0xc2c   :  { %v2215_v2 = vunpack.c.l.bf16 %v2214_v62 }
 0xc2d   :  { %v2213_v3 = vmul.f32 %v2212_v63, %v4672_v7 }
 0xc2f   :  { %v4823_v5 = vadd.f32 %v2215_v2, %v2213_v3 }
 0xc31   :  { %v2217_v29 = vpack.c.bf16 %v4823_v5, %v4823_v5 }
 0xc33   :  { %3297 = vtanh.bf16 %v2217_v29 }
 0xc3e   :  { %v3298_v47 = vpop.eup %3297 }
 0xc3f   :  { %v2219_v8 = vmul.bf16 %v3298_v47, %v2211_v16 }
 0xc41   :  { %2997 = vst [vmem:[%s5019_s4 + $0x28] sm:$0xf] %v2219_v8  ;;  %2221 = vst [vmem:[#allocation2] sm:$0xf] %v2219_v8 }
 0xc48   :  { %v2224_v4 = vld [vmem:[#allocation2] sm:$0xf] }
 0xc49   :  { %2264 = vmatmul.mubr.bf16.vlgmr.msra.gmra.mrb[76].mxu0 %v2224_v4  ;;  %2305 = vmatmul.mubr.bf16.vlgmr.msra.gmra.mrb[76].mxu1 %v2224_v4 }
 0xc4a   :  { %2363 = vmatpush1.bf16.msra.mxu0 %v4581_v35  ;;  %2404 = vmatpush1.bf16.msra.mxu1 %v4587_v39 }
 0xc4b   :  { %2364 = vmatprep.subr.bf16.mxu0 %v4593_v40  ;;  %2405 = vmatprep.subr.bf16.mxu1 %v4599_v41 }
 0xc4c   :  { %2394 = vmatprep.mubr.bf16.mxu0 %v5074_v21  ;;  %2435 = vmatprep.mubr.bf16.mxu1 %v5074_v21 }
 0xc4e   :  { %2365 = vmatpush1.bf16.msra.mxu0 %v4607_v42  ;;  %2406 = vmatpush1.bf16.msra.mxu1 %v4613_v44 }
 0xc4f   :  { %2366 = vmatprep.subr.bf16.mxu0 %v4619_v12  ;;  %2407 = vmatprep.subr.bf16.mxu1 %v4691_v10 }
 0xc52   :  { %2367 = vmatpush1.bf16.msra.mxu0 %v4626_v26  ;;  %2408 = vmatpush1.bf16.msra.mxu1 %v4698_v27 }
 0xc53   :  { %2368 = vmatprep.subr.bf16.mxu0 %v4633_v28  ;;  %2409 = vmatprep.subr.bf16.mxu1 %v4705_v17 }
 0xc56   :  { %2369 = vmatpush1.bf16.msra.mxu0 %v4711_v43  ;;  %2410 = vmatpush1.bf16.msra.mxu1 %v4717_v36 }
 0xc57   :  { %2370 = vmatprep.subr.bf16.mxu0 %v4723_v37  ;;  %2411 = vmatprep.subr.bf16.mxu1 %v4729_v38 }
 0xc5a   :  { %2371 = vmatpush1.bf16.msra.mxu0 %v4735_v14  ;;  %2412 = vmatpush1.bf16.msra.mxu1 %v4741_v31 }
 0xc5b   :  { %2372 = vmatprep.subr.bf16.mxu0 %v4747_v52  ;;  %2413 = vmatprep.subr.bf16.mxu1 %v4753_v13 }
 0xc5e   :  { %2373 = vmatpush1.bf16.msra.mxu0 %v4759_v1  ;;  %2414 = vmatpush1.bf16.msra.mxu1 %v4765_v48 }
 0xc5f   :  { %2374 = vmatprep.subr.bf16.mxu0 %v4771_v49  ;;  %2415 = vmatprep.subr.bf16.mxu1 %v4777_v50 }
 0xc62   :  { %2375 = vmatpush1.bf16.msra.mxu0 %v4783_v51  ;;  %2416 = vmatpush1.bf16.msra.mxu1 %v4789_v53 }
 0xc63   :  { %2376 = vmatprep.subr.bf16.mxu0 %v4795_v54  ;;  %2417 = vmatprep.subr.bf16.mxu1 %v4801_v55 }
 0xc66   :  { %2377 = vmatpush1.bf16.msra.mxu0 %v4807_v56  ;;  %2418 = vmatpush1.bf16.msra.mxu1 %v4813_v57 }
 0xc67   :  { %2493 = vmatprep.subr.bf16.mxu0 %v4658_v15  ;;  %2534 = vmatprep.subr.bf16.mxu1 %v4664_v6 }
 0xd1c   :  { %v2265_v7 = vpop.f32.mrb[76].mxu0  ;;  %v2306_v45 = vpop.f32.mrb[76].mxu1 }
 0xd1d   :  { %v2313_v19 = vadd.f32 %v2265_v7, %v5107_v33  ;;  %v2315_v30 = vadd.f32 %v2306_v45, %v5108_v34  ;;  %v2267_v23 = vpop.f32.mrb[77].mxu0  ;;  %v2308_v61 = vpop.f32.mrb[77].mxu1 }
 0xd1e   :  { %v2314_v22 = vadd.f32 %v2267_v23, %v5109_v24  ;;  %v2316_v9 = vadd.f32 %v2308_v61, %v5110_v20  ;;  %v2269_v11 = vpop.f32.mrb[78].mxu0  ;;  %v2310_v18 = vpop.f32.mrb[78].mxu1 }
 0xd1f   :  { %v2317_v32 = vpack.c.bf16 %v2313_v19, %v2313_v19  ;;  %v2270_v25 = vpop.f32.mrb[79].mxu0  ;;  %v2311_v58 = vpop.f32.mrb[79].mxu1  ;;  %v2319_v46 = vpack.c.bf16 %v2315_v30, %v2315_v30 }
 0xd20   :  { %v2318_v59 = vpack.c.bf16 %v2314_v22, %v2314_v22  ;;  %v2320_v63 = vpack.c.bf16 %v2316_v9, %v2316_v9  ;;  %v5111_v58 = vld [vmem:[#allocation41_spill] sm:$0xff] }
 0xd21   :  { %v2998_v60 = vmul.bf16 3216621497, %v2317_v32 }
 0xd22   :  { %v2999_v62 = vmul.bf16 3216621497, %v2318_v59  ;;  %v3000_v0 = vmul.bf16 3216621497, %v2320_v63 }
 0xd23   :  { %3299 = vpow.bf16 %v2998_v60  ;;  %v5112_v60 = vld [vmem:[#allocation42_spill] sm:$0xff] }
 0xd24   :  { %3301 = vpow.bf16 %v2999_v62 }
 0xd25   :  { %3303 = vpow.bf16 %v3000_v0 }
 0xd2e   :  { %v3300_v2 = vpop.eup %3299 }
 0xd2f   :  { %v3302_v3 = vpop.eup %3301  ;;  %v2325_v29 = vadd.bf16 1065369472, %v3300_v2  ;;  %v5113_v2 = vld [vmem:[#allocation43_spill] sm:$0xff] }
 0xd30   :  { %v2332_v16 = vadd.bf16 1065369472, %v3302_v3  ;;  %v3304_v47 = vpop.eup %3303 }
 0xd31   :  { %3305 = vrcp.bf16 %v2325_v29  ;;  %v2340_v23 = vadd.bf16 1065369472, %v3304_v47  ;;  %v5114_v29 = vld [vmem:[#allocation44_spill] sm:$0xff] }
 0xd32   :  { %3307 = vrcp.bf16 %v2332_v16 }
 0xd33   :  { %3309 = vtanh.bf16 %v2319_v46 }
 0xd34   :  { %3311 = vrcp.bf16 %v2340_v23 }
 0xd3c   :  { %v3306_v8 = vpop.eup %3305 }
 0xd3d   :  { %v3308_v4 = vpop.eup %3307  ;;  %v2327_v7 = vmul.bf16 1065369472, %v3306_v8 }
 0xd3e   :  { %v3310_v45 = vpop.eup %3309  ;;  %v2334_v33 = vmul.bf16 1065369472, %v3308_v4 }
 0xd3f   :  { %v2345_v19 = vmul.bf16 %v3310_v45, %v2327_v7  ;;  %v3312_v20 = vpop.eup %3311 }
 0xd40   :  { %v2343_v34 = vunpack.c.l.bf16 %v2334_v33  ;;  %v2342_v9 = vmul.bf16 1065369472, %v3312_v20 }
 0xd41   :  { %v2346_v61 = vunpack.c.l.bf16 %v2345_v19 }
 0xd42   :  { %v2344_v24 = vmul.f32 %v2343_v34, %v4823_v5 }
 0xd44   :  { %v4869_v22 = vadd.f32 %v2346_v61, %v2344_v24 }
 0xd46   :  { %v2348_v30 = vpack.c.bf16 %v4869_v22, %v4869_v22 }
 0xd48   :  { %3313 = vtanh.bf16 %v2348_v30 }
 0xd53   :  { %v3314_v11 = vpop.eup %3313 }
 0xd54   :  { %v2350_v18 = vmul.bf16 %v3314_v11, %v2342_v9 }
 0xd56   :  { %3001 = vst [vmem:[%s5019_s4 + $0x2c] sm:$0xf] %v2350_v18  ;;  %2352 = vst [vmem:[#allocation2] sm:$0xf] %v2350_v18 }
 0xd5d   :  { %v2355_v32 = vld [vmem:[#allocation2] sm:$0xf] }
 0xd5e   :  { %2395 = vmatmul.mubr.bf16.vlgmr.msra.gmra.mrb[80].mxu0 %v2355_v32  ;;  %2436 = vmatmul.mubr.bf16.vlgmr.msra.gmra.mrb[80].mxu1 %v2355_v32 }
 0xd5f   :  { %2494 = vmatpush1.bf16.msra.mxu0 %v4581_v35  ;;  %2535 = vmatpush1.bf16.msra.mxu1 %v4587_v39 }
 0xd60   :  { %2495 = vmatprep.subr.bf16.mxu0 %v4593_v40  ;;  %2536 = vmatprep.subr.bf16.mxu1 %v4599_v41 }
 0xd61   :  { %2525 = vmatprep.mubr.bf16.mxu0 %v5074_v21  ;;  %2566 = vmatprep.mubr.bf16.mxu1 %v5074_v21 }
 0xd63   :  { %2496 = vmatpush1.bf16.msra.mxu0 %v4607_v42  ;;  %2537 = vmatpush1.bf16.msra.mxu1 %v4613_v44 }
 0xd64   :  { %2497 = vmatprep.subr.bf16.mxu0 %v4619_v12  ;;  %2538 = vmatprep.subr.bf16.mxu1 %v4691_v10 }
 0xd67   :  { %2498 = vmatpush1.bf16.msra.mxu0 %v4626_v26  ;;  %2539 = vmatpush1.bf16.msra.mxu1 %v4698_v27 }
 0xd68   :  { %2499 = vmatprep.subr.bf16.mxu0 %v4633_v28  ;;  %2540 = vmatprep.subr.bf16.mxu1 %v4705_v17 }
 0xd6b   :  { %2500 = vmatpush1.bf16.msra.mxu0 %v4711_v43  ;;  %2541 = vmatpush1.bf16.msra.mxu1 %v4717_v36 }
 0xd6c   :  { %2501 = vmatprep.subr.bf16.mxu0 %v4723_v37  ;;  %2542 = vmatprep.subr.bf16.mxu1 %v4729_v38 }
 0xd6f   :  { %2502 = vmatpush1.bf16.msra.mxu0 %v4735_v14  ;;  %2543 = vmatpush1.bf16.msra.mxu1 %v4741_v31 }
 0xd70   :  { %2503 = vmatprep.subr.bf16.mxu0 %v4747_v52  ;;  %2544 = vmatprep.subr.bf16.mxu1 %v4753_v13 }
 0xd73   :  { %2504 = vmatpush1.bf16.msra.mxu0 %v4759_v1  ;;  %2545 = vmatpush1.bf16.msra.mxu1 %v4765_v48 }
 0xd74   :  { %2505 = vmatprep.subr.bf16.mxu0 %v4771_v49  ;;  %2546 = vmatprep.subr.bf16.mxu1 %v4777_v50 }
 0xd77   :  { %2506 = vmatpush1.bf16.msra.mxu0 %v4783_v51  ;;  %2547 = vmatpush1.bf16.msra.mxu1 %v4789_v53 }
 0xd78   :  { %2507 = vmatprep.subr.bf16.mxu0 %v4795_v54  ;;  %2548 = vmatprep.subr.bf16.mxu1 %v4801_v55 }
 0xd7b   :  { %2508 = vmatpush1.bf16.msra.mxu0 %v4807_v56  ;;  %2549 = vmatpush1.bf16.msra.mxu1 %v4813_v57 }
 0xd7c   :  { %2624 = vmatprep.subr.bf16.mxu0 %v4658_v15  ;;  %2665 = vmatprep.subr.bf16.mxu1 %v4664_v6 }
 0xe31   :  { %v2396_v5 = vpop.f32.mrb[80].mxu0  ;;  %v2437_v25 = vpop.f32.mrb[80].mxu1 }
 0xe32   :  { %v2444_v59 = vadd.f32 %v2396_v5, %v5111_v58  ;;  %v2446_v62 = vadd.f32 %v2437_v25, %v5112_v60  ;;  %v2398_v63 = vpop.f32.mrb[81].mxu0  ;;  %v2439_v0 = vpop.f32.mrb[81].mxu1 }
 0xe33   :  { %v2445_v3 = vadd.f32 %v2398_v63, %v5113_v2  ;;  %v2447_v46 = vadd.f32 %v2439_v0, %v5114_v29  ;;  %v2400_v16 = vpop.f32.mrb[82].mxu0  ;;  %v2441_v47 = vpop.f32.mrb[82].mxu1 }
 0xe34   :  { %v2448_v8 = vpack.c.bf16 %v2444_v59, %v2444_v59  ;;  %v2401_v4 = vpop.f32.mrb[83].mxu0  ;;  %v2442_v7 = vpop.f32.mrb[83].mxu1  ;;  %v2450_v20 = vpack.c.bf16 %v2446_v62, %v2446_v62 }
 0xe35   :  { %v2449_v45 = vpack.c.bf16 %v2445_v3, %v2445_v3  ;;  %v2451_v34 = vpack.c.bf16 %v2447_v46, %v2447_v46  ;;  %v5115_v7 = vld [vmem:[#allocation45_spill] sm:$0xff] }
 0xe36   :  { %v3002_v33 = vmul.bf16 3216621497, %v2448_v8 }
 0xe37   :  { %v3003_v19 = vmul.bf16 3216621497, %v2449_v45  ;;  %v3004_v23 = vmul.bf16 3216621497, %v2451_v34 }
 0xe38   :  { %3315 = vpow.bf16 %v3002_v33  ;;  %v5116_v33 = vld [vmem:[#allocation46_spill] sm:$0xff] }
 0xe39   :  { %3317 = vpow.bf16 %v3003_v19 }
 0xe3a   :  { %3319 = vpow.bf16 %v3004_v23 }
 0xe43   :  { %v3316_v61 = vpop.eup %3315 }
 0xe44   :  { %v3318_v24 = vpop.eup %3317  ;;  %v2456_v30 = vadd.bf16 1065369472, %v3316_v61  ;;  %v5117_v61 = vld [vmem:[#allocation47_spill] sm:$0xff] }
 0xe45   :  { %v2463_v9 = vadd.bf16 1065369472, %v3318_v24  ;;  %v3320_v11 = vpop.eup %3319 }
 0xe46   :  { %3321 = vrcp.bf16 %v2456_v30  ;;  %v2471_v63 = vadd.bf16 1065369472, %v3320_v11  ;;  %v5118_v30 = vld [vmem:[#allocation48_spill] sm:$0xff] }
 0xe47   :  { %3323 = vrcp.bf16 %v2463_v9 }
 0xe48   :  { %3325 = vtanh.bf16 %v2450_v20 }
 0xe49   :  { %3327 = vrcp.bf16 %v2471_v63 }
 0xe51   :  { %v3322_v18 = vpop.eup %3321 }
 0xe52   :  { %v3324_v32 = vpop.eup %3323  ;;  %v2458_v5 = vmul.bf16 1065369472, %v3322_v18 }
 0xe53   :  { %v3326_v25 = vpop.eup %3325  ;;  %v2465_v58 = vmul.bf16 1065369472, %v3324_v32 }
 0xe54   :  { %v2476_v59 = vmul.bf16 %v3326_v25, %v2458_v5  ;;  %v3328_v29 = vpop.eup %3327 }
 0xe55   :  { %v2474_v60 = vunpack.c.l.bf16 %v2465_v58  ;;  %v2473_v46 = vmul.bf16 1065369472, %v3328_v29 }
 0xe56   :  { %v2477_v0 = vunpack.c.l.bf16 %v2476_v59 }
 0xe57   :  { %v2475_v2 = vmul.f32 %v2474_v60, %v4869_v22 }
 0xe59   :  { %v4915_v3 = vadd.f32 %v2477_v0, %v2475_v2 }
 0xe5b   :  { %v2479_v62 = vpack.c.bf16 %v4915_v3, %v4915_v3 }
 0xe5d   :  { %3329 = vtanh.bf16 %v2479_v62 }
 0xe68   :  { %v3330_v16 = vpop.eup %3329 }
 0xe69   :  { %v2481_v47 = vmul.bf16 %v3330_v16, %v2473_v46 }
 0xe6b   :  { %3005 = vst [vmem:[%s5019_s4 + $0x30] sm:$0xf] %v2481_v47  ;;  %2483 = vst [vmem:[#allocation2] sm:$0xf] %v2481_v47 }
 0xe72   :  { %v2486_v8 = vld [vmem:[#allocation2] sm:$0xf] }
 0xe73   :  { %2526 = vmatmul.mubr.bf16.vlgmr.msra.gmra.mrb[84].mxu0 %v2486_v8  ;;  %2567 = vmatmul.mubr.bf16.vlgmr.msra.gmra.mrb[84].mxu1 %v2486_v8 }
 0xe74   :  { %2625 = vmatpush1.bf16.msra.mxu0 %v4581_v35  ;;  %2666 = vmatpush1.bf16.msra.mxu1 %v4587_v39 }
 0xe75   :  { %2626 = vmatprep.subr.bf16.mxu0 %v4593_v40  ;;  %2667 = vmatprep.subr.bf16.mxu1 %v4599_v41 }
 0xe76   :  { %2656 = vmatprep.mubr.bf16.mxu0 %v5074_v21  ;;  %2697 = vmatprep.mubr.bf16.mxu1 %v5074_v21 }
 0xe78   :  { %2627 = vmatpush1.bf16.msra.mxu0 %v4607_v42  ;;  %2668 = vmatpush1.bf16.msra.mxu1 %v4613_v44 }
 0xe79   :  { %2628 = vmatprep.subr.bf16.mxu0 %v4619_v12  ;;  %2669 = vmatprep.subr.bf16.mxu1 %v4691_v10 }
 0xe7c   :  { %2629 = vmatpush1.bf16.msra.mxu0 %v4626_v26  ;;  %2670 = vmatpush1.bf16.msra.mxu1 %v4698_v27 }
 0xe7d   :  { %2630 = vmatprep.subr.bf16.mxu0 %v4633_v28  ;;  %2671 = vmatprep.subr.bf16.mxu1 %v4705_v17 }
 0xe80   :  { %2631 = vmatpush1.bf16.msra.mxu0 %v4711_v43  ;;  %2672 = vmatpush1.bf16.msra.mxu1 %v4717_v36 }
 0xe81   :  { %2632 = vmatprep.subr.bf16.mxu0 %v4723_v37  ;;  %2673 = vmatprep.subr.bf16.mxu1 %v4729_v38 }
 0xe84   :  { %2633 = vmatpush1.bf16.msra.mxu0 %v4735_v14  ;;  %2674 = vmatpush1.bf16.msra.mxu1 %v4741_v31 }
 0xe85   :  { %2634 = vmatprep.subr.bf16.mxu0 %v4747_v52  ;;  %2675 = vmatprep.subr.bf16.mxu1 %v4753_v13 }
 0xe88   :  { %2635 = vmatpush1.bf16.msra.mxu0 %v4759_v1  ;;  %2676 = vmatpush1.bf16.msra.mxu1 %v4765_v48 }
 0xe89   :  { %2636 = vmatprep.subr.bf16.mxu0 %v4771_v49  ;;  %2677 = vmatprep.subr.bf16.mxu1 %v4777_v50 }
 0xe8c   :  { %2637 = vmatpush1.bf16.msra.mxu0 %v4783_v51  ;;  %2678 = vmatpush1.bf16.msra.mxu1 %v4789_v53 }
 0xe8d   :  { %2638 = vmatprep.subr.bf16.mxu0 %v4795_v54  ;;  %2679 = vmatprep.subr.bf16.mxu1 %v4801_v55 }
 0xe90   :  { %2639 = vmatpush1.bf16.msra.mxu0 %v4807_v56  ;;  %2680 = vmatpush1.bf16.msra.mxu1 %v4813_v57 }
 0xe91   :  { %2755 = vmatprep.subr.bf16.mxu0 %v4658_v15  ;;  %2796 = vmatprep.subr.bf16.mxu1 %v4664_v6 }
 0xf46   :  { %v2527_v22 = vpop.f32.mrb[84].mxu0  ;;  %v2568_v4 = vpop.f32.mrb[84].mxu1 }
 0xf47   :  { %v2575_v45 = vadd.f32 %v2527_v22, %v5115_v7  ;;  %v2577_v19 = vadd.f32 %v2568_v4, %v5116_v33  ;;  %v2529_v34 = vpop.f32.mrb[85].mxu0  ;;  %v2570_v23 = vpop.f32.mrb[85].mxu1 }
 0xf48   :  { %v2576_v24 = vadd.f32 %v2529_v34, %v5117_v61  ;;  %v2578_v20 = vadd.f32 %v2570_v23, %v5118_v30  ;;  %v2531_v9 = vpop.f32.mrb[86].mxu0  ;;  %v2572_v11 = vpop.f32.mrb[86].mxu1 }
 0xf49   :  { %v2579_v18 = vpack.c.bf16 %v2575_v45, %v2575_v45  ;;  %v2532_v32 = vpop.f32.mrb[87].mxu0  ;;  %v2573_v5 = vpop.f32.mrb[87].mxu1  ;;  %v2581_v2 = vpack.c.bf16 %v2577_v19, %v2577_v19 }
 0xf4a   :  { %v2580_v15 = vpack.c.bf16 %v2576_v24, %v2576_v24  ;;  %v2582_v58 = vpack.c.bf16 %v2578_v20, %v2578_v20 }
 0xf4b   :  { %v3006_v25 = vmul.bf16 3216621497, %v2579_v18 }
 0xf4c   :  { %v3007_v6 = vmul.bf16 3216621497, %v2580_v15  ;;  %v3008_v59 = vmul.bf16 3216621497, %v2582_v58 }
 0xf4d   :  { %3331 = vpow.bf16 %v3006_v25 }
 0xf4e   :  { %3333 = vpow.bf16 %v3007_v6 }
 0xf4f   :  { %3335 = vpow.bf16 %v3008_v59 }
 0xf58   :  { %v3332_v60 = vpop.eup %3331 }
 0xf59   :  { %v3334_v63 = vpop.eup %3333  ;;  %v2587_v0 = vadd.bf16 1065369472, %v3332_v60 }
 0xf5a   :  { %v2594_v62 = vadd.bf16 1065369472, %v3334_v63  ;;  %v3336_v29 = vpop.eup %3335 }
 0xf5b   :  { %3337 = vrcp.bf16 %v2587_v0  ;;  %v2602_v45 = vadd.bf16 1065369472, %v3336_v29 }
 0xf5c   :  { %3339 = vrcp.bf16 %v2594_v62 }
 0xf5d   :  { %3341 = vtanh.bf16 %v2581_v2 }
 0xf5e   :  { %3343 = vrcp.bf16 %v2602_v45 }
 0xf66   :  { %v3338_v46 = vpop.eup %3337 }
 0xf67   :  { %v3340_v16 = vpop.eup %3339  ;;  %v2589_v47 = vmul.bf16 1065369472, %v3338_v46  ;;  %v5123_v46 = vld [vmem:[#allocation53_spill] sm:$0xff] }
 0xf68   :  { %v3342_v8 = vpop.eup %3341  ;;  %v2596_v22 = vmul.bf16 1065369472, %v3340_v16 }
 0xf69   :  { %v2607_v4 = vmul.bf16 %v3342_v8, %v2589_v47  ;;  %v3344_v61 = vpop.eup %3343  ;;  %v5124_v47 = vld [vmem:[#allocation54_spill] sm:$0xff] }
 0xf6a   :  { %v2605_v7 = vunpack.c.l.bf16 %v2596_v22  ;;  %v2604_v24 = vmul.bf16 1065369472, %v3344_v61 }
 0xf6b   :  { %v2608_v33 = vunpack.c.l.bf16 %v2607_v4 }
 0xf6c   :  { %v2606_v34 = vmul.f32 %v2605_v7, %v4915_v3  ;;  %v5125_v7 = vld [vmem:[#allocation55_spill] sm:$0xff] }
 0xf6e   :  { %v4961_v23 = vadd.f32 %v2608_v33, %v2606_v34  ;;  %v5126_v33 = vld [vmem:[#allocation56_spill] sm:$0xff] }
 0xf70   :  { %v2610_v19 = vpack.c.bf16 %v4961_v23, %v4961_v23 }
 0xf72   :  { %3345 = vtanh.bf16 %v2610_v19 }
 0xf7d   :  { %v3346_v30 = vpop.eup %3345 }
 0xf7e   :  { %v2612_v20 = vmul.bf16 %v3346_v30, %v2604_v24 }
 0xf80   :  { %3009 = vst [vmem:[%s5019_s4 + $0x34] sm:$0xf] %v2612_v20  ;;  %2614 = vst [vmem:[#allocation2] sm:$0xf] %v2612_v20 }
 0xf87   :  { %v2617_v9 = vld [vmem:[#allocation2] sm:$0xf] }
 0xf88   :  { %2657 = vmatmul.mubr.bf16.vlgmr.msra.gmra.mrb[88].mxu0 %v2617_v9  ;;  %2698 = vmatmul.mubr.bf16.vlgmr.msra.gmra.mrb[88].mxu1 %v2617_v9 }
 0xf89   :  { %2756 = vmatpush1.bf16.msra.mxu0 %v4581_v35  ;;  %2797 = vmatpush1.bf16.msra.mxu1 %v4587_v39  ;;  %v5119_v39 = vld [vmem:[#allocation49_spill] sm:$0xff] }
 0xf8a   :  { %2757 = vmatprep.subr.bf16.mxu0 %v4593_v40  ;;  %2798 = vmatprep.subr.bf16.mxu1 %v4599_v41  ;;  %v5120_v41 = vld [vmem:[#allocation50_spill] sm:$0xff] }
 0xf8b   :  { %2787 = vmatprep.mubr.bf16.mxu0 %v5074_v21  ;;  %2828 = vmatprep.mubr.bf16.mxu1 %v5074_v21 }
 0xf8d   :  { %2758 = vmatpush1.bf16.msra.mxu0 %v4607_v42  ;;  %2799 = vmatpush1.bf16.msra.mxu1 %v4613_v44 }
 0xf8e   :  { %2759 = vmatprep.subr.bf16.mxu0 %v4619_v12  ;;  %2800 = vmatprep.subr.bf16.mxu1 %v4691_v10  ;;  %v5122_v10 = vld [vmem:[#allocation52_spill] sm:$0xff] }
 0xf91   :  { %2760 = vmatpush1.bf16.msra.mxu0 %v4626_v26  ;;  %2801 = vmatpush1.bf16.msra.mxu1 %v4698_v27  ;;  %v5121_v26 = vld [vmem:[#allocation51_spill] sm:$0xff] }
 0xf92   :  { %2761 = vmatprep.subr.bf16.mxu0 %v4633_v28  ;;  %2802 = vmatprep.subr.bf16.mxu1 %v4705_v17 }
 0xf95   :  { %2762 = vmatpush1.bf16.msra.mxu0 %v4711_v43  ;;  %2803 = vmatpush1.bf16.msra.mxu1 %v4717_v36 }
 0xf96   :  { %2763 = vmatprep.subr.bf16.mxu0 %v4723_v37  ;;  %2804 = vmatprep.subr.bf16.mxu1 %v4729_v38 }
 0xf99   :  { %2764 = vmatpush1.bf16.msra.mxu0 %v4735_v14  ;;  %2805 = vmatpush1.bf16.msra.mxu1 %v4741_v31 }
 0xf9a   :  { %2765 = vmatprep.subr.bf16.mxu0 %v4747_v52  ;;  %2806 = vmatprep.subr.bf16.mxu1 %v4753_v13 }
 0xf9d   :  { %2766 = vmatpush1.bf16.msra.mxu0 %v4759_v1  ;;  %2807 = vmatpush1.bf16.msra.mxu1 %v4765_v48 }
 0xf9e   :  { %2767 = vmatprep.subr.bf16.mxu0 %v4771_v49  ;;  %2808 = vmatprep.subr.bf16.mxu1 %v4777_v50 }
 0xfa1   :  { %2768 = vmatpush1.bf16.msra.mxu0 %v4783_v51  ;;  %2809 = vmatpush1.bf16.msra.mxu1 %v4789_v53 }
 0xfa2   :  { %2769 = vmatprep.subr.bf16.mxu0 %v4795_v54  ;;  %2810 = vmatprep.subr.bf16.mxu1 %v4801_v55 }
 0xfa5   :  { %2770 = vmatpush1.bf16.msra.mxu0 %v4807_v56  ;;  %2811 = vmatpush1.bf16.msra.mxu1 %v4813_v57 }
0x105b   :  { %v2658_v21 = vpop.f32.mrb[88].mxu0  ;;  %v2699_v35 = vpop.f32.mrb[88].mxu1 }
0x105c   :  { %v2706_v40 = vadd.f32 %v2658_v21, %v5119_v39  ;;  %v2708_v42 = vadd.f32 %v2699_v35, %v5120_v41  ;;  %v2660_v44 = vpop.f32.mrb[89].mxu0  ;;  %v2701_v12 = vpop.f32.mrb[89].mxu1 }
0x105d   :  { %v2707_v28 = vadd.f32 %v2660_v44, %v5121_v26  ;;  %v2709_v27 = vadd.f32 %v2701_v12, %v5122_v10  ;;  %v2662_v17 = vpop.f32.mrb[90].mxu0  ;;  %v2703_v43 = vpop.f32.mrb[90].mxu1 }
0x105e   :  { %v2710_v36 = vpack.c.bf16 %v2706_v40, %v2706_v40  ;;  %v2663_v37 = vpop.f32.mrb[91].mxu0  ;;  %v2704_v38 = vpop.f32.mrb[91].mxu1  ;;  %v2712_v51 = vpack.c.bf16 %v2708_v42, %v2708_v42 }
0x105f   :  { %v2711_v14 = vpack.c.bf16 %v2707_v28, %v2707_v28  ;;  %v2713_v13 = vpack.c.bf16 %v2709_v27, %v2709_v27 }
0x1060   :  { %v3010_v31 = vmul.bf16 3216621497, %v2710_v36 }
0x1061   :  { %v3011_v52 = vmul.bf16 3216621497, %v2711_v14  ;;  %v3012_v1 = vmul.bf16 3216621497, %v2713_v13 }
0x1062   :  { %3347 = vpow.bf16 %v3010_v31 }
0x1063   :  { %3349 = vpow.bf16 %v3011_v52 }
0x1064   :  { %3351 = vpow.bf16 %v3012_v1 }
0x106d   :  { %v3348_v48 = vpop.eup %3347 }
0x106e   :  { %v3350_v49 = vpop.eup %3349  ;;  %v2718_v50 = vadd.bf16 1065369472, %v3348_v48 }
0x106f   :  { %v2725_v53 = vadd.bf16 1065369472, %v3350_v49  ;;  %v3352_v54 = vpop.eup %3351 }
0x1070   :  { %3353 = vrcp.bf16 %v2718_v50  ;;  %v2733_v5 = vadd.bf16 1065369472, %v3352_v54 }
0x1071   :  { %3355 = vrcp.bf16 %v2725_v53 }
0x1072   :  { %3357 = vtanh.bf16 %v2712_v51 }
0x1073   :  { %3359 = vrcp.bf16 %v2733_v5 }
0x107b   :  { %v3354_v55 = vpop.eup %3353 }
0x107c   :  { %v3356_v56 = vpop.eup %3355  ;;  %v2720_v57 = vmul.bf16 1065369472, %v3354_v55 }
0x107d   :  { %v3358_v3 = vpop.eup %3357  ;;  %v2727_v11 = vmul.bf16 1065369472, %v3356_v56 }
0x107e   :  { %v2738_v18 = vmul.bf16 %v3358_v3, %v2720_v57  ;;  %v3360_v59 = vpop.eup %3359 }
0x107f   :  { %v2736_v32 = vunpack.c.l.bf16 %v2727_v11  ;;  %v2735_v60 = vmul.bf16 1065369472, %v3360_v59 }
0x1080   :  { %v2739_v15 = vunpack.c.l.bf16 %v2738_v18 }
0x1081   :  { %v2737_v25 = vmul.f32 %v2736_v32, %v4961_v23 }
0x1083   :  { %v2740_v6 = vadd.f32 %v2739_v15, %v2737_v25 }
0x1085   :  { %v2741_v58 = vpack.c.bf16 %v2740_v6, %v2740_v6 }
0x1087   :  { %3361 = vtanh.bf16 %v2741_v58 }
0x1092   :  { %v3362_v63 = vpop.eup %3361 }
0x1093   :  { %v2743_v0 = vmul.bf16 %v3362_v63, %v2735_v60 }
0x1095   :  { %3013 = vst [vmem:[%s5019_s4 + $0x38] sm:$0xf] %v2743_v0  ;;  %2745 = vst [vmem:[#allocation2] sm:$0xf] %v2743_v0 }
0x109c   :  { %v2748_v2 = vld [vmem:[#allocation2] sm:$0xf] }
0x109d   :  { %2788 = vmatmul.mubr.bf16.vlgmr.msra.gmra.mrb[92].mxu0 %v2748_v2  ;;  %2829 = vmatmul.mubr.bf16.vlgmr.msra.gmra.mrb[92].mxu1 %v2748_v2 }
0x1170   :  { %v2789_v62 = vpop.f32.mrb[92].mxu0  ;;  %v2830_v29 = vpop.f32.mrb[92].mxu1 }
0x1171   :  { %v2837_v16 = vadd.f32 %v2789_v62, %v5123_v46  ;;  %v2839_v8 = vadd.f32 %v2830_v29, %v5124_v47  ;;  %v2791_v22 = vpop.f32.mrb[93].mxu0  ;;  %v2832_v4 = vpop.f32.mrb[93].mxu1 }
0x1172   :  { %v2838_v45 = vadd.f32 %v2791_v22, %v5125_v7  ;;  %v2840_v34 = vadd.f32 %v2832_v4, %v5126_v33  ;;  %v2793_v23 = vpop.f32.mrb[94].mxu0  ;;  %v2834_v19 = vpop.f32.mrb[94].mxu1 }
0x1173   :  { %v2841_v61 = vpack.c.bf16 %v2837_v16, %v2837_v16  ;;  %v2794_v24 = vpop.f32.mrb[95].mxu0  ;;  %v2835_v30 = vpop.f32.mrb[95].mxu1  ;;  %v2843_v44 = vpack.c.bf16 %v2839_v8, %v2839_v8 }
0x1174   :  { %v2842_v20 = vpack.c.bf16 %v2838_v45, %v2838_v45  ;;  %v2844_v35 = vpack.c.bf16 %v2840_v34, %v2840_v34 }
0x1175   :  { %v3014_v9 = vmul.bf16 3216621497, %v2841_v61 }
0x1176   :  { %v3015_v21 = vmul.bf16 3216621497, %v2842_v20  ;;  %v3016_v39 = vmul.bf16 3216621497, %v2844_v35 }
0x1177   :  { %3363 = vpow.bf16 %v3014_v9 }
0x1178   :  { %3365 = vpow.bf16 %v3015_v21 }
0x1179   :  { %3367 = vpow.bf16 %v3016_v39 }
0x1182   :  { %v3364_v40 = vpop.eup %3363 }
0x1183   :  { %v3366_v41 = vpop.eup %3365  ;;  %v2849_v42 = vadd.bf16 1065369472, %v3364_v40 }
0x1184   :  { %v2856_v12 = vadd.bf16 1065369472, %v3366_v41  ;;  %v3368_v26 = vpop.eup %3367 }
0x1185   :  { %3369 = vrcp.bf16 %v2849_v42  ;;  %v2864_v38 = vadd.bf16 1065369472, %v3368_v26 }
0x1186   :  { %3371 = vrcp.bf16 %v2856_v12 }
0x1187   :  { %3373 = vtanh.bf16 %v2843_v44 }
0x1188   :  { %3375 = vrcp.bf16 %v2864_v38 }
0x1190   :  { %v3370_v28 = vpop.eup %3369 }
0x1191   :  { %v3372_v10 = vpop.eup %3371  ;;  %v2851_v27 = vmul.bf16 1065369472, %v3370_v28 }
0x1192   :  { %v3374_v17 = vpop.eup %3373  ;;  %v2858_v43 = vmul.bf16 1065369472, %v3372_v10 }
0x1193   :  { %v2869_v36 = vmul.bf16 %v3374_v17, %v2851_v27  ;;  %v3376_v1 = vpop.eup %3375 }
0x1194   :  { %v2867_v37 = vunpack.c.l.bf16 %v2858_v43  ;;  %v2866_v48 = vmul.bf16 1065369472, %v3376_v1 }
0x1195   :  { %v2870_v14 = vunpack.c.l.bf16 %v2869_v36 }
0x1196   :  { %v2868_v31 = vmul.f32 %v2867_v37, %v2740_v6 }
0x1198   :  { %v2871_v52 = vadd.f32 %v2870_v14, %v2868_v31 }
0x119a   :  { %v2872_v13 = vpack.c.bf16 %v2871_v52, %v2871_v52 }
0x119c   :  { %3377 = vtanh.bf16 %v2872_v13 }
0x11a7   :  { %v3378_v49 = vpop.eup %3377 }
0x11a8   :  { %v2874_v50 = vmul.bf16 %v3378_v49, %v2866_v48 }
0x11aa   :  { %2876 = vst [vmem:[#allocation2] sm:$0xf] %v2874_v50  ;;  %3017 = vst [vmem:[%s5019_s4 + $0x3c] sm:$0xf] %v2874_v50 }

</bundles_post_ra>
